<compile_context>
chip_gen: v5e
topology: v5e:2x2
jax: 0.10.0
libtpu: 0.0.40
codegen_flags: <defaults>
</compile_context>

<pallas_src>
import jax
import jax.numpy as jnp
from jax.experimental import pallas as pl
from jax.experimental.pallas import tpu as pltpu

KERN = 5
IN_HW = 78
OUT_HW = IN_HW - KERN + 1          # 74 (valid conv)
FLAT = OUT_HW * OUT_HW             # 5476 == (78 - 5 + 1) ** 2
H1, H2, H3 = 300, 50, 5

# fused-kernel layout constants
LANES = 128                        # conv-output columns padded 74 -> 128
ROWS_PAD = 80                      # conv-output rows padded 74 -> 80
SLAB = 80                          # w1 rows per conv-output row (74 -> 80, zero padded)
TR = 16                            # conv rows (w1 slabs) consumed per grid step
NK = ROWS_PAD // TR                # 5 grid steps over the linear1 contraction
XROWS = 88                         # padded input rows (>= 80 + 4, multiple of 8)
XCOLS = LANES + KERN - 1           # 132: padded input cols before lane-shifting


def convnet_kernel(x_ref, cw_ref, cb_ref, w1_ref, b1_ref, w2_ref, b2_ref,
                   w3_ref, b3_ref, o_ref, conv_scr, h1_acc):
    k = pl.program_id(0)

    # ---- step 0: 5x5 valid conv (cross-correlation) + bias + ReLU, kept in VMEM.
    # Padded rows/cols of conv_scr hold finite garbage that is multiplied by the
    # zero-padded w1 slab rows, so it never affects the result.
    @pl.when(k == 0)
    def _():
        acc = jnp.zeros((ROWS_PAD, LANES), jnp.float32)
        for dj in range(KERN):
            xs = x_ref[dj]                                   # (88,128), lane-shifted by dj
            for di in range(KERN):
                acc = acc + cw_ref[di * KERN + dj] * xs[di:di + ROWS_PAD, :]
        conv_scr[...] = jnp.maximum(acc + cb_ref[0], 0.0)    # relu(conv + b)
        h1_acc[...] = jnp.zeros_like(h1_acc)

    # ---- every step: accumulate TR conv rows' contribution to linear1.
    # Row-major flatten (torch .view) is realized by pairing conv row r with the
    # pre-rearranged w1 slab r (80 rows, last 6 zero), avoiding any in-kernel reshape.
    base = pl.multiple_of(k * TR, TR)
    c_blk = conv_scr[pl.ds(base, TR), :]                     # (16,128) f32
    c_bf = c_blk[:, :SLAB].astype(jnp.bfloat16)              # (16,80) bf16
    part = jnp.zeros((1, H1), jnp.float32)
    for t in range(TR):
        lhs = c_bf[t:t + 1, :]                               # (1,80)   bf16
        rhs = w1_ref[t * SLAB:(t + 1) * SLAB, :]             # (80,300) bf16 slab
        part = part + jnp.dot(lhs, rhs, preferred_element_type=jnp.float32)
    h1_acc[...] += part

    # ---- last step: bias + ReLU, then the two small linears.
    @pl.when(k == NK - 1)
    def _():
        h1 = jnp.maximum(h1_acc[...] + b1_ref[...], 0.0)     # (1,300) f32
        # TODO(synk): torch.nn.Dropout(p=0.3) is identity at inference; omitted.
        h2 = jnp.dot(h1.astype(jnp.bfloat16), w2_ref[...],
                     preferred_element_type=jnp.float32) + b2_ref[...]
        h2 = jnp.maximum(h2, 0.0)                            # (1,50) f32
        o_ref[...] = jnp.dot(h2, w3_ref[...],
                             preferred_element_type=jnp.float32) + b3_ref[...]


def convnet_pallas(x_shifts, cw, cb, w1p, b1, w2, b2, w3, b3):
    smem = pltpu.MemorySpace.SMEM
    return pl.pallas_call(
        convnet_kernel,
        out_shape=jax.ShapeDtypeStruct((1, H3), jnp.float32),
        grid=(NK,),
        in_specs=[
            pl.BlockSpec((KERN, XROWS, LANES), lambda k: (0, 0, 0)),   # shifted input (resident)
            pl.BlockSpec(memory_space=smem),                           # 25 conv weights (scalars)
            pl.BlockSpec(memory_space=smem),                           # conv bias
            pl.BlockSpec((TR * SLAB, H1), lambda k: (k, 0)),           # w1 slabs: streamed over k
            pl.BlockSpec((1, H1), lambda k: (0, 0)),
            pl.BlockSpec((H1, H2), lambda k: (0, 0)),
            pl.BlockSpec((1, H2), lambda k: (0, 0)),
            pl.BlockSpec((H2, H3), lambda k: (0, 0)),
            pl.BlockSpec((1, H3), lambda k: (0, 0)),
        ],
        out_specs=pl.BlockSpec((1, H3), lambda k: (0, 0)),
        scratch_shapes=[
            pltpu.VMEM((ROWS_PAD, LANES), jnp.float32),   # conv activation (lane padded)
            pltpu.VMEM((1, H1), jnp.float32),             # linear1 f32 accumulator
        ],
        compiler_params=pltpu.CompilerParams(
            dimension_semantics=("arbitrary",)),          # reduction axis
    )(x_shifts, cw, cb, w1p, b1, w2, b2, w3, b3)


def init_params(key):
    # Deterministic synthetic parameters with the shapes implied by __init__.
    ks = jax.random.split(key, 8)
    s = 0.02
    conv_w = jax.random.normal(ks[0], (KERN * KERN,), jnp.float32) * s   # Conv2d(1,1,5), flattened
    conv_b = jax.random.normal(ks[1], (1,), jnp.float32) * s
    w1 = jax.random.normal(ks[2], (FLAT, H1), jnp.float32) * s           # Linear(5476,300), (in,out)
    b1 = jax.random.normal(ks[3], (1, H1), jnp.float32) * s
    w2 = jax.random.normal(ks[4], (H1, H2), jnp.float32) * s             # Linear(300,50)
    b2 = jax.random.normal(ks[5], (1, H2), jnp.float32) * s
    w3 = jax.random.normal(ks[6], (H2, H3), jnp.float32) * s             # Linear(50,5)
    b3 = jax.random.normal(ks[7], (1, H3), jnp.float32) * s
    return conv_w, conv_b, w1, b1, w2, b2, w3, b3


def prepare_params(params):
    # One-time layout / dtype prep (outside the hot path).
    conv_w, conv_b, w1, b1, w2, b2, w3, b3 = params
    # w1 row i*74+j  ->  slab layout row i*80+j, zero rows elsewhere, cast to bf16.
    w1_3d = w1.reshape(OUT_HW, OUT_HW, H1)
    w1_3d = jnp.pad(w1_3d, ((0, ROWS_PAD - OUT_HW), (0, SLAB - OUT_HW), (0, 0)))
    w1p = w1_3d.reshape(ROWS_PAD * SLAB, H1).astype(jnp.bfloat16)
    w2b = w2.astype(jnp.bfloat16)
    return conv_w, conv_b, w1p, b1, w2b, b2, w3, b3


def prepare_input(x):
    # Zero-pad the (78,78) image and build 5 lane-shifted (88,128) copies so the
    # in-kernel conv only needs lane-aligned slices.
    xp = jnp.zeros((XROWS, XCOLS), jnp.float32).at[:IN_HW, :IN_HW].set(
        x.astype(jnp.float32))
    return jnp.stack([xp[:, dj:dj + LANES] for dj in range(KERN)], axis=0)


@jax.jit
def convnet_forward(x, prepared):
    return convnet_pallas(prepare_input(x), *prepared)


@jax.jit
def reference_forward(x, params):
    # Pure-JAX reference (f32, highest precision) of the PyTorch forward.
    conv_w, conv_b, w1, b1, w2, b2, w3, b3 = params
    w2d = conv_w.reshape(KERN, KERN)
    c = jnp.zeros((OUT_HW, OUT_HW), jnp.float32)
    for di in range(KERN):
        for dj in range(KERN):
            c = c + w2d[di, dj] * x[di:di + OUT_HW, dj:dj + OUT_HW]
    c = jnp.maximum(c + conv_b[0], 0.0)
    v = c.reshape(1, FLAT)
    hp = jax.lax.Precision.HIGHEST
    h1 = jnp.maximum(jnp.dot(v, w1, precision=hp) + b1, 0.0)
    h2 = jnp.maximum(jnp.dot(h1, w2, precision=hp) + b2, 0.0)
    return jnp.dot(h2, w3, precision=hp) + b3


if __name__ == "__main__":
    key = jax.random.PRNGKey(0)
    kx, kp = jax.random.split(key)
    # The module wraps x as [[x]] and linear1 requires a single (78,78) image.
    x = jax.random.normal(kx, (IN_HW, IN_HW), jnp.float32)
    params = init_params(kp)
    prepared = prepare_params(params)

    out = convnet_forward(x, prepared)
    jax.block_until_ready(out)
    assert out.shape == (1, H3) and out.dtype == jnp.float32

    ref = reference_forward(x, params)
    err = float(jnp.max(jnp.abs(out - ref)))
    assert err < 2e-2, f"kernel mismatch vs reference (max abs err {err})"
    print("KERNEL_OK")
</pallas_src>

<mosaic_0001>
module attributes {stable_mosaic.version = 11 : i64} {
  func.func @convnet_kernel(%arg0: i32, %arg1: memref<5x88x128xf32, #tpu.memory_space<vmem>>, %arg2: memref<25xf32, #tpu.memory_space<smem>>, %arg3: memref<1xf32, #tpu.memory_space<smem>>, %arg4: memref<1280x300xbf16, #tpu.memory_space<vmem>>, %arg5: memref<1x300xf32, #tpu.memory_space<vmem>>, %arg6: memref<300x50xbf16, #tpu.memory_space<vmem>>, %arg7: memref<1x50xf32, #tpu.memory_space<vmem>>, %arg8: memref<50x5xf32, #tpu.memory_space<vmem>>, %arg9: memref<1x5xf32, #tpu.memory_space<vmem>>, %arg10: memref<1x5xf32, #tpu.memory_space<vmem>>, %arg11: memref<80x128xf32, #tpu.memory_space<vmem>>, %arg12: memref<1x300xf32, #tpu.memory_space<vmem>>) attributes {dimension_semantics = [#tpu.dimension_semantics<arbitrary>], iteration_bounds = array<i64: 5>, scalar_prefetch = 0 : i64, scratch_operands = 2 : i64, tpu.core_type = #tpu.core_type<tc>, window_params = [{pipeline_mode = #tpu.pipeline_mode<synchronous>, transform_indices = @transform_0, window_bounds = array<i64: 5, 88, 128>}, {transform_indices = @transform_1, window_bounds = array<i64: 25>}, {transform_indices = @transform_2, window_bounds = array<i64: 1>}, {transform_indices = @transform_3, window_bounds = array<i64: 1280, 300>}, {pipeline_mode = #tpu.pipeline_mode<synchronous>, transform_indices = @transform_4, window_bounds = array<i64: 1, 300>}, {pipeline_mode = #tpu.pipeline_mode<synchronous>, transform_indices = @transform_5, window_bounds = array<i64: 300, 50>}, {pipeline_mode = #tpu.pipeline_mode<synchronous>, transform_indices = @transform_6, window_bounds = array<i64: 1, 50>}, {pipeline_mode = #tpu.pipeline_mode<synchronous>, transform_indices = @transform_7, window_bounds = array<i64: 50, 5>}, {pipeline_mode = #tpu.pipeline_mode<synchronous>, transform_indices = @transform_8, window_bounds = array<i64: 1, 5>}, {pipeline_mode = #tpu.pipeline_mode<synchronous>, transform_indices = @transform_9, window_bounds = array<i64: 1, 5>}]} {
    %c0_i32 = arith.constant 0 : i32
    %0 = arith.cmpi eq, %arg0, %c0_i32 : i32
    %1 = arith.extui %0 : i1 to i32
    %c0_i32_0 = arith.constant 0 : i32
    %2 = arith.cmpi ne, %1, %c0_i32_0 : i32
    scf.if %2 {
      %cst_39 = arith.constant 0.000000e+00 : f32
      %80 = vector.broadcast %cst_39 : f32 to vector<80x128xf32>
      %c0_40 = arith.constant 0 : index
      %c0_41 = arith.constant 0 : index
      %c0_42 = arith.constant 0 : index
      %81 = vector.load %arg1[%c0_40, %c0_41, %c0_42] : memref<5x88x128xf32, #tpu.memory_space<vmem>>, vector<1x88x128xf32>
      %82 = vector.shape_cast %81 : vector<1x88x128xf32> to vector<88x128xf32>
      %c0_43 = arith.constant 0 : index
      %83 = memref.load %arg2[%c0_43] : memref<25xf32, #tpu.memory_space<smem>>
      %84 = vector.extract_strided_slice %82 {offsets = [0, 0], sizes = [80, 128], strides = [1, 1]} : vector<88x128xf32> to vector<80x128xf32>
      %85 = vector.broadcast %83 : f32 to vector<80x128xf32>
      %86 = arith.mulf %85, %84 : vector<80x128xf32>
      %87 = arith.addf %80, %86 : vector<80x128xf32>
      %c5 = arith.constant 5 : index
      %88 = memref.load %arg2[%c5] : memref<25xf32, #tpu.memory_space<smem>>
      %89 = vector.extract_strided_slice %82 {offsets = [1, 0], sizes = [80, 128], strides = [1, 1]} : vector<88x128xf32> to vector<80x128xf32>
      %90 = vector.broadcast %88 : f32 to vector<80x128xf32>
      %91 = arith.mulf %90, %89 : vector<80x128xf32>
      %92 = arith.addf %87, %91 : vector<80x128xf32>
      %c10 = arith.constant 10 : index
      %93 = memref.load %arg2[%c10] : memref<25xf32, #tpu.memory_space<smem>>
      %94 = vector.extract_strided_slice %82 {offsets = [2, 0], sizes = [80, 128], strides = [1, 1]} : vector<88x128xf32> to vector<80x128xf32>
      %95 = vector.broadcast %93 : f32 to vector<80x128xf32>
      %96 = arith.mulf %95, %94 : vector<80x128xf32>
      %97 = arith.addf %92, %96 : vector<80x128xf32>
      %c15 = arith.constant 15 : index
      %98 = memref.load %arg2[%c15] : memref<25xf32, #tpu.memory_space<smem>>
      %99 = vector.extract_strided_slice %82 {offsets = [3, 0], sizes = [80, 128], strides = [1, 1]} : vector<88x128xf32> to vector<80x128xf32>
      %100 = vector.broadcast %98 : f32 to vector<80x128xf32>
      %101 = arith.mulf %100, %99 : vector<80x128xf32>
      %102 = arith.addf %97, %101 : vector<80x128xf32>
      %c20 = arith.constant 20 : index
      %103 = memref.load %arg2[%c20] : memref<25xf32, #tpu.memory_space<smem>>
      %104 = vector.extract_strided_slice %82 {offsets = [4, 0], sizes = [80, 128], strides = [1, 1]} : vector<88x128xf32> to vector<80x128xf32>
      %105 = vector.broadcast %103 : f32 to vector<80x128xf32>
      %106 = arith.mulf %105, %104 : vector<80x128xf32>
      %107 = arith.addf %102, %106 : vector<80x128xf32>
      %c1 = arith.constant 1 : index
      %c0_44 = arith.constant 0 : index
      %c0_45 = arith.constant 0 : index
      %108 = vector.load %arg1[%c1, %c0_44, %c0_45] : memref<5x88x128xf32, #tpu.memory_space<vmem>>, vector<1x88x128xf32>
      %109 = vector.shape_cast %108 : vector<1x88x128xf32> to vector<88x128xf32>
      %c1_46 = arith.constant 1 : index
      %110 = memref.load %arg2[%c1_46] : memref<25xf32, #tpu.memory_space<smem>>
      %111 = vector.extract_strided_slice %109 {offsets = [0, 0], sizes = [80, 128], strides = [1, 1]} : vector<88x128xf32> to vector<80x128xf32>
      %112 = vector.broadcast %110 : f32 to vector<80x128xf32>
      %113 = arith.mulf %112, %111 : vector<80x128xf32>
      %114 = arith.addf %107, %113 : vector<80x128xf32>
      %c6 = arith.constant 6 : index
      %115 = memref.load %arg2[%c6] : memref<25xf32, #tpu.memory_space<smem>>
      %116 = vector.extract_strided_slice %109 {offsets = [1, 0], sizes = [80, 128], strides = [1, 1]} : vector<88x128xf32> to vector<80x128xf32>
      %117 = vector.broadcast %115 : f32 to vector<80x128xf32>
      %118 = arith.mulf %117, %116 : vector<80x128xf32>
      %119 = arith.addf %114, %118 : vector<80x128xf32>
      %c11 = arith.constant 11 : index
      %120 = memref.load %arg2[%c11] : memref<25xf32, #tpu.memory_space<smem>>
      %121 = vector.extract_strided_slice %109 {offsets = [2, 0], sizes = [80, 128], strides = [1, 1]} : vector<88x128xf32> to vector<80x128xf32>
      %122 = vector.broadcast %120 : f32 to vector<80x128xf32>
      %123 = arith.mulf %122, %121 : vector<80x128xf32>
      %124 = arith.addf %119, %123 : vector<80x128xf32>
      %c16 = arith.constant 16 : index
      %125 = memref.load %arg2[%c16] : memref<25xf32, #tpu.memory_space<smem>>
      %126 = vector.extract_strided_slice %109 {offsets = [3, 0], sizes = [80, 128], strides = [1, 1]} : vector<88x128xf32> to vector<80x128xf32>
      %127 = vector.broadcast %125 : f32 to vector<80x128xf32>
      %128 = arith.mulf %127, %126 : vector<80x128xf32>
      %129 = arith.addf %124, %128 : vector<80x128xf32>
      %c21 = arith.constant 21 : index
      %130 = memref.load %arg2[%c21] : memref<25xf32, #tpu.memory_space<smem>>
      %131 = vector.extract_strided_slice %109 {offsets = [4, 0], sizes = [80, 128], strides = [1, 1]} : vector<88x128xf32> to vector<80x128xf32>
      %132 = vector.broadcast %130 : f32 to vector<80x128xf32>
      %133 = arith.mulf %132, %131 : vector<80x128xf32>
      %134 = arith.addf %129, %133 : vector<80x128xf32>
      %c2 = arith.constant 2 : index
      %c0_47 = arith.constant 0 : index
      %c0_48 = arith.constant 0 : index
      %135 = vector.load %arg1[%c2, %c0_47, %c0_48] : memref<5x88x128xf32, #tpu.memory_space<vmem>>, vector<1x88x128xf32>
      %136 = vector.shape_cast %135 : vector<1x88x128xf32> to vector<88x128xf32>
      %c2_49 = arith.constant 2 : index
      %137 = memref.load %arg2[%c2_49] : memref<25xf32, #tpu.memory_space<smem>>
      %138 = vector.extract_strided_slice %136 {offsets = [0, 0], sizes = [80, 128], strides = [1, 1]} : vector<88x128xf32> to vector<80x128xf32>
      %139 = vector.broadcast %137 : f32 to vector<80x128xf32>
      %140 = arith.mulf %139, %138 : vector<80x128xf32>
      %141 = arith.addf %134, %140 : vector<80x128xf32>
      %c7 = arith.constant 7 : index
      %142 = memref.load %arg2[%c7] : memref<25xf32, #tpu.memory_space<smem>>
      %143 = vector.extract_strided_slice %136 {offsets = [1, 0], sizes = [80, 128], strides = [1, 1]} : vector<88x128xf32> to vector<80x128xf32>
      %144 = vector.broadcast %142 : f32 to vector<80x128xf32>
      %145 = arith.mulf %144, %143 : vector<80x128xf32>
      %146 = arith.addf %141, %145 : vector<80x128xf32>
      %c12 = arith.constant 12 : index
      %147 = memref.load %arg2[%c12] : memref<25xf32, #tpu.memory_space<smem>>
      %148 = vector.extract_strided_slice %136 {offsets = [2, 0], sizes = [80, 128], strides = [1, 1]} : vector<88x128xf32> to vector<80x128xf32>
      %149 = vector.broadcast %147 : f32 to vector<80x128xf32>
      %150 = arith.mulf %149, %148 : vector<80x128xf32>
      %151 = arith.addf %146, %150 : vector<80x128xf32>
      %c17 = arith.constant 17 : index
      %152 = memref.load %arg2[%c17] : memref<25xf32, #tpu.memory_space<smem>>
      %153 = vector.extract_strided_slice %136 {offsets = [3, 0], sizes = [80, 128], strides = [1, 1]} : vector<88x128xf32> to vector<80x128xf32>
      %154 = vector.broadcast %152 : f32 to vector<80x128xf32>
      %155 = arith.mulf %154, %153 : vector<80x128xf32>
      %156 = arith.addf %151, %155 : vector<80x128xf32>
      %c22 = arith.constant 22 : index
      %157 = memref.load %arg2[%c22] : memref<25xf32, #tpu.memory_space<smem>>
      %158 = vector.extract_strided_slice %136 {offsets = [4, 0], sizes = [80, 128], strides = [1, 1]} : vector<88x128xf32> to vector<80x128xf32>
      %159 = vector.broadcast %157 : f32 to vector<80x128xf32>
      %160 = arith.mulf %159, %158 : vector<80x128xf32>
      %161 = arith.addf %156, %160 : vector<80x128xf32>
      %c3 = arith.constant 3 : index
      %c0_50 = arith.constant 0 : index
      %c0_51 = arith.constant 0 : index
      %162 = vector.load %arg1[%c3, %c0_50, %c0_51] : memref<5x88x128xf32, #tpu.memory_space<vmem>>, vector<1x88x128xf32>
      %163 = vector.shape_cast %162 : vector<1x88x128xf32> to vector<88x128xf32>
      %c3_52 = arith.constant 3 : index
      %164 = memref.load %arg2[%c3_52] : memref<25xf32, #tpu.memory_space<smem>>
      %165 = vector.extract_strided_slice %163 {offsets = [0, 0], sizes = [80, 128], strides = [1, 1]} : vector<88x128xf32> to vector<80x128xf32>
      %166 = vector.broadcast %164 : f32 to vector<80x128xf32>
      %167 = arith.mulf %166, %165 : vector<80x128xf32>
      %168 = arith.addf %161, %167 : vector<80x128xf32>
      %c8 = arith.constant 8 : index
      %169 = memref.load %arg2[%c8] : memref<25xf32, #tpu.memory_space<smem>>
      %170 = vector.extract_strided_slice %163 {offsets = [1, 0], sizes = [80, 128], strides = [1, 1]} : vector<88x128xf32> to vector<80x128xf32>
      %171 = vector.broadcast %169 : f32 to vector<80x128xf32>
      %172 = arith.mulf %171, %170 : vector<80x128xf32>
      %173 = arith.addf %168, %172 : vector<80x128xf32>
      %c13 = arith.constant 13 : index
      %174 = memref.load %arg2[%c13] : memref<25xf32, #tpu.memory_space<smem>>
      %175 = vector.extract_strided_slice %163 {offsets = [2, 0], sizes = [80, 128], strides = [1, 1]} : vector<88x128xf32> to vector<80x128xf32>
      %176 = vector.broadcast %174 : f32 to vector<80x128xf32>
      %177 = arith.mulf %176, %175 : vector<80x128xf32>
      %178 = arith.addf %173, %177 : vector<80x128xf32>
      %c18 = arith.constant 18 : index
      %179 = memref.load %arg2[%c18] : memref<25xf32, #tpu.memory_space<smem>>
      %180 = vector.extract_strided_slice %163 {offsets = [3, 0], sizes = [80, 128], strides = [1, 1]} : vector<88x128xf32> to vector<80x128xf32>
      %181 = vector.broadcast %179 : f32 to vector<80x128xf32>
      %182 = arith.mulf %181, %180 : vector<80x128xf32>
      %183 = arith.addf %178, %182 : vector<80x128xf32>
      %c23 = arith.constant 23 : index
      %184 = memref.load %arg2[%c23] : memref<25xf32, #tpu.memory_space<smem>>
      %185 = vector.extract_strided_slice %163 {offsets = [4, 0], sizes = [80, 128], strides = [1, 1]} : vector<88x128xf32> to vector<80x128xf32>
      %186 = vector.broadcast %184 : f32 to vector<80x128xf32>
      %187 = arith.mulf %186, %185 : vector<80x128xf32>
      %188 = arith.addf %183, %187 : vector<80x128xf32>
      %c4 = arith.constant 4 : index
      %c0_53 = arith.constant 0 : index
      %c0_54 = arith.constant 0 : index
      %189 = vector.load %arg1[%c4, %c0_53, %c0_54] : memref<5x88x128xf32, #tpu.memory_space<vmem>>, vector<1x88x128xf32>
      %190 = vector.shape_cast %189 : vector<1x88x128xf32> to vector<88x128xf32>
      %c4_55 = arith.constant 4 : index
      %191 = memref.load %arg2[%c4_55] : memref<25xf32, #tpu.memory_space<smem>>
      %192 = vector.extract_strided_slice %190 {offsets = [0, 0], sizes = [80, 128], strides = [1, 1]} : vector<88x128xf32> to vector<80x128xf32>
      %193 = vector.broadcast %191 : f32 to vector<80x128xf32>
      %194 = arith.mulf %193, %192 : vector<80x128xf32>
      %195 = arith.addf %188, %194 : vector<80x128xf32>
      %c9 = arith.constant 9 : index
      %196 = memref.load %arg2[%c9] : memref<25xf32, #tpu.memory_space<smem>>
      %197 = vector.extract_strided_slice %190 {offsets = [1, 0], sizes = [80, 128], strides = [1, 1]} : vector<88x128xf32> to vector<80x128xf32>
      %198 = vector.broadcast %196 : f32 to vector<80x128xf32>
      %199 = arith.mulf %198, %197 : vector<80x128xf32>
      %200 = arith.addf %195, %199 : vector<80x128xf32>
      %c14 = arith.constant 14 : index
      %201 = memref.load %arg2[%c14] : memref<25xf32, #tpu.memory_space<smem>>
      %202 = vector.extract_strided_slice %190 {offsets = [2, 0], sizes = [80, 128], strides = [1, 1]} : vector<88x128xf32> to vector<80x128xf32>
      %203 = vector.broadcast %201 : f32 to vector<80x128xf32>
      %204 = arith.mulf %203, %202 : vector<80x128xf32>
      %205 = arith.addf %200, %204 : vector<80x128xf32>
      %c19 = arith.constant 19 : index
      %206 = memref.load %arg2[%c19] : memref<25xf32, #tpu.memory_space<smem>>
      %207 = vector.extract_strided_slice %190 {offsets = [3, 0], sizes = [80, 128], strides = [1, 1]} : vector<88x128xf32> to vector<80x128xf32>
      %208 = vector.broadcast %206 : f32 to vector<80x128xf32>
      %209 = arith.mulf %208, %207 : vector<80x128xf32>
      %210 = arith.addf %205, %209 : vector<80x128xf32>
      %c24 = arith.constant 24 : index
      %211 = memref.load %arg2[%c24] : memref<25xf32, #tpu.memory_space<smem>>
      %212 = vector.extract_strided_slice %190 {offsets = [4, 0], sizes = [80, 128], strides = [1, 1]} : vector<88x128xf32> to vector<80x128xf32>
      %213 = vector.broadcast %211 : f32 to vector<80x128xf32>
      %214 = arith.mulf %213, %212 : vector<80x128xf32>
      %215 = arith.addf %210, %214 : vector<80x128xf32>
      %c0_56 = arith.constant 0 : index
      %216 = memref.load %arg3[%c0_56] : memref<1xf32, #tpu.memory_space<smem>>
      %217 = vector.broadcast %216 : f32 to vector<80x128xf32>
      %218 = arith.addf %215, %217 : vector<80x128xf32>
      %cst_57 = arith.constant 0.000000e+00 : f32
      %219 = vector.broadcast %cst_57 : f32 to vector<80x128xf32>
      %220 = arith.maximumf %218, %219 : vector<80x128xf32>
      %c0_58 = arith.constant 0 : index
      %c0_59 = arith.constant 0 : index
      %221 = vector.load %arg11[%c0_58, %c0_59] : memref<80x128xf32, #tpu.memory_space<vmem>>, vector<80x128xf32>
      tpu.vector_store %arg11[%c0_58, %c0_59], %220 {strides = array<i32>} : memref<80x128xf32, #tpu.memory_space<vmem>>, vector<80x128xf32>,
      %cst_60 = arith.constant 0.000000e+00 : f32
      %222 = vector.broadcast %cst_60 : f32 to vector<1x300xf32>
      %c0_61 = arith.constant 0 : index
      %c0_62 = arith.constant 0 : index
      %223 = vector.load %arg12[%c0_61, %c0_62] : memref<1x300xf32, #tpu.memory_space<vmem>>, vector<1x300xf32>
      tpu.vector_store %arg12[%c0_61, %c0_62], %222 {strides = array<i32>} : memref<1x300xf32, #tpu.memory_space<vmem>>, vector<1x300xf32>,
    } else {
    }
    %c16_i32 = arith.constant 16 : i32
    %3 = arith.muli %arg0, %c16_i32 : i32
    %4 = tpu.assume_multiple %3, 16 : i32
    %5 = arith.index_cast %4 : i32 to index
    %c0 = arith.constant 0 : index
    %6 = vector.load %arg11[%5, %c0] : memref<80x128xf32, #tpu.memory_space<vmem>>, vector<16x128xf32>
    %7 = vector.extract_strided_slice %6 {offsets = [0, 0], sizes = [16, 80], strides = [1, 1]} : vector<16x128xf32> to vector<16x80xf32>
    %8 = arith.truncf %7 : vector<16x80xf32> to vector<16x80xbf16>
    %cst = arith.constant 0.000000e+00 : f32
    %9 = vector.broadcast %cst : f32 to vector<1x300xf32>
    %10 = vector.extract_strided_slice %8 {offsets = [0, 0], sizes = [1, 80], strides = [1, 1]} : vector<16x80xbf16> to vector<1x80xbf16>
    %c0_1 = arith.constant 0 : index
    %c0_2 = arith.constant 0 : index
    %11 = vector.load %arg4[%c0_1, %c0_2] : memref<1280x300xbf16, #tpu.memory_space<vmem>>, vector<80x300xbf16>
    %cst_3 = arith.constant dense<0.000000e+00> : vector<1x300xf32>
    %12 = tpu.matmul %10, %11, %cst_3 {dimension_numbers = #tpu.dot_dimension_numbers<[1], [0], [0], [1], [0, 0, 1, 1], [], []>} : vector<1x80xbf16>, vector<80x300xbf16>, vector<1x300xf32> -> vector<1x300xf32>
    %13 = arith.addf %9, %12 : vector<1x300xf32>
    %14 = vector.extract_strided_slice %8 {offsets = [1, 0], sizes = [1, 80], strides = [1, 1]} : vector<16x80xbf16> to vector<1x80xbf16>
    %c80 = arith.constant 80 : index
    %c0_4 = arith.constant 0 : index
    %15 = vector.load %arg4[%c80, %c0_4] : memref<1280x300xbf16, #tpu.memory_space<vmem>>, vector<80x300xbf16>
    %cst_5 = arith.constant dense<0.000000e+00> : vector<1x300xf32>
    %16 = tpu.matmul %14, %15, %cst_5 {dimension_numbers = #tpu.dot_dimension_numbers<[1], [0], [0], [1], [0, 0, 1, 1], [], []>} : vector<1x80xbf16>, vector<80x300xbf16>, vector<1x300xf32> -> vector<1x300xf32>
    %17 = arith.addf %13, %16 : vector<1x300xf32>
    %18 = vector.extract_strided_slice %8 {offsets = [2, 0], sizes = [1, 80], strides = [1, 1]} : vector<16x80xbf16> to vector<1x80xbf16>
    %c160 = arith.constant 160 : index
    %c0_6 = arith.constant 0 : index
    %19 = vector.load %arg4[%c160, %c0_6] : memref<1280x300xbf16, #tpu.memory_space<vmem>>, vector<80x300xbf16>
    %cst_7 = arith.constant dense<0.000000e+00> : vector<1x300xf32>
    %20 = tpu.matmul %18, %19, %cst_7 {dimension_numbers = #tpu.dot_dimension_numbers<[1], [0], [0], [1], [0, 0, 1, 1], [], []>} : vector<1x80xbf16>, vector<80x300xbf16>, vector<1x300xf32> -> vector<1x300xf32>
    %21 = arith.addf %17, %20 : vector<1x300xf32>
    %22 = vector.extract_strided_slice %8 {offsets = [3, 0], sizes = [1, 80], strides = [1, 1]} : vector<16x80xbf16> to vector<1x80xbf16>
    %c240 = arith.constant 240 : index
    %c0_8 = arith.constant 0 : index
    %23 = vector.load %arg4[%c240, %c0_8] : memref<1280x300xbf16, #tpu.memory_space<vmem>>, vector<80x300xbf16>
    %cst_9 = arith.constant dense<0.000000e+00> : vector<1x300xf32>
    %24 = tpu.matmul %22, %23, %cst_9 {dimension_numbers = #tpu.dot_dimension_numbers<[1], [0], [0], [1], [0, 0, 1, 1], [], []>} : vector<1x80xbf16>, vector<80x300xbf16>, vector<1x300xf32> -> vector<1x300xf32>
    %25 = arith.addf %21, %24 : vector<1x300xf32>
    %26 = vector.extract_strided_slice %8 {offsets = [4, 0], sizes = [1, 80], strides = [1, 1]} : vector<16x80xbf16> to vector<1x80xbf16>
    %c320 = arith.constant 320 : index
    %c0_10 = arith.constant 0 : index
    %27 = vector.load %arg4[%c320, %c0_10] : memref<1280x300xbf16, #tpu.memory_space<vmem>>, vector<80x300xbf16>
    %cst_11 = arith.constant dense<0.000000e+00> : vector<1x300xf32>
    %28 = tpu.matmul %26, %27, %cst_11 {dimension_numbers = #tpu.dot_dimension_numbers<[1], [0], [0], [1], [0, 0, 1, 1], [], []>} : vector<1x80xbf16>, vector<80x300xbf16>, vector<1x300xf32> -> vector<1x300xf32>
    %29 = arith.addf %25, %28 : vector<1x300xf32>
    %30 = vector.extract_strided_slice %8 {offsets = [5, 0], sizes = [1, 80], strides = [1, 1]} : vector<16x80xbf16> to vector<1x80xbf16>
    %c400 = arith.constant 400 : index
    %c0_12 = arith.constant 0 : index
    %31 = vector.load %arg4[%c400, %c0_12] : memref<1280x300xbf16, #tpu.memory_space<vmem>>, vector<80x300xbf16>
    %cst_13 = arith.constant dense<0.000000e+00> : vector<1x300xf32>
    %32 = tpu.matmul %30, %31, %cst_13 {dimension_numbers = #tpu.dot_dimension_numbers<[1], [0], [0], [1], [0, 0, 1, 1], [], []>} : vector<1x80xbf16>, vector<80x300xbf16>, vector<1x300xf32> -> vector<1x300xf32>
    %33 = arith.addf %29, %32 : vector<1x300xf32>
    %34 = vector.extract_strided_slice %8 {offsets = [6, 0], sizes = [1, 80], strides = [1, 1]} : vector<16x80xbf16> to vector<1x80xbf16>
    %c480 = arith.constant 480 : index
    %c0_14 = arith.constant 0 : index
    %35 = vector.load %arg4[%c480, %c0_14] : memref<1280x300xbf16, #tpu.memory_space<vmem>>, vector<80x300xbf16>
    %cst_15 = arith.constant dense<0.000000e+00> : vector<1x300xf32>
    %36 = tpu.matmul %34, %35, %cst_15 {dimension_numbers = #tpu.dot_dimension_numbers<[1], [0], [0], [1], [0, 0, 1, 1], [], []>} : vector<1x80xbf16>, vector<80x300xbf16>, vector<1x300xf32> -> vector<1x300xf32>
    %37 = arith.addf %33, %36 : vector<1x300xf32>
    %38 = vector.extract_strided_slice %8 {offsets = [7, 0], sizes = [1, 80], strides = [1, 1]} : vector<16x80xbf16> to vector<1x80xbf16>
    %c560 = arith.constant 560 : index
    %c0_16 = arith.constant 0 : index
    %39 = vector.load %arg4[%c560, %c0_16] : memref<1280x300xbf16, #tpu.memory_space<vmem>>, vector<80x300xbf16>
    %cst_17 = arith.constant dense<0.000000e+00> : vector<1x300xf32>
    %40 = tpu.matmul %38, %39, %cst_17 {dimension_numbers = #tpu.dot_dimension_numbers<[1], [0], [0], [1], [0, 0, 1, 1], [], []>} : vector<1x80xbf16>, vector<80x300xbf16>, vector<1x300xf32> -> vector<1x300xf32>
    %41 = arith.addf %37, %40 : vector<1x300xf32>
    %42 = vector.extract_strided_slice %8 {offsets = [8, 0], sizes = [1, 80], strides = [1, 1]} : vector<16x80xbf16> to vector<1x80xbf16>
    %c640 = arith.constant 640 : index
    %c0_18 = arith.constant 0 : index
    %43 = vector.load %arg4[%c640, %c0_18] : memref<1280x300xbf16, #tpu.memory_space<vmem>>, vector<80x300xbf16>
    %cst_19 = arith.constant dense<0.000000e+00> : vector<1x300xf32>
    %44 = tpu.matmul %42, %43, %cst_19 {dimension_numbers = #tpu.dot_dimension_numbers<[1], [0], [0], [1], [0, 0, 1, 1], [], []>} : vector<1x80xbf16>, vector<80x300xbf16>, vector<1x300xf32> -> vector<1x300xf32>
    %45 = arith.addf %41, %44 : vector<1x300xf32>
    %46 = vector.extract_strided_slice %8 {offsets = [9, 0], sizes = [1, 80], strides = [1, 1]} : vector<16x80xbf16> to vector<1x80xbf16>
    %c720 = arith.constant 720 : index
    %c0_20 = arith.constant 0 : index
    %47 = vector.load %arg4[%c720, %c0_20] : memref<1280x300xbf16, #tpu.memory_space<vmem>>, vector<80x300xbf16>
    %cst_21 = arith.constant dense<0.000000e+00> : vector<1x300xf32>
    %48 = tpu.matmul %46, %47, %cst_21 {dimension_numbers = #tpu.dot_dimension_numbers<[1], [0], [0], [1], [0, 0, 1, 1], [], []>} : vector<1x80xbf16>, vector<80x300xbf16>, vector<1x300xf32> -> vector<1x300xf32>
    %49 = arith.addf %45, %48 : vector<1x300xf32>
    %50 = vector.extract_strided_slice %8 {offsets = [10, 0], sizes = [1, 80], strides = [1, 1]} : vector<16x80xbf16> to vector<1x80xbf16>
    %c800 = arith.constant 800 : index
    %c0_22 = arith.constant 0 : index
    %51 = vector.load %arg4[%c800, %c0_22] : memref<1280x300xbf16, #tpu.memory_space<vmem>>, vector<80x300xbf16>
    %cst_23 = arith.constant dense<0.000000e+00> : vector<1x300xf32>
    %52 = tpu.matmul %50, %51, %cst_23 {dimension_numbers = #tpu.dot_dimension_numbers<[1], [0], [0], [1], [0, 0, 1, 1], [], []>} : vector<1x80xbf16>, vector<80x300xbf16>, vector<1x300xf32> -> vector<1x300xf32>
    %53 = arith.addf %49, %52 : vector<1x300xf32>
    %54 = vector.extract_strided_slice %8 {offsets = [11, 0], sizes = [1, 80], strides = [1, 1]} : vector<16x80xbf16> to vector<1x80xbf16>
    %c880 = arith.constant 880 : index
    %c0_24 = arith.constant 0 : index
    %55 = vector.load %arg4[%c880, %c0_24] : memref<1280x300xbf16, #tpu.memory_space<vmem>>, vector<80x300xbf16>
    %cst_25 = arith.constant dense<0.000000e+00> : vector<1x300xf32>
    %56 = tpu.matmul %54, %55, %cst_25 {dimension_numbers = #tpu.dot_dimension_numbers<[1], [0], [0], [1], [0, 0, 1, 1], [], []>} : vector<1x80xbf16>, vector<80x300xbf16>, vector<1x300xf32> -> vector<1x300xf32>
    %57 = arith.addf %53, %56 : vector<1x300xf32>
    %58 = vector.extract_strided_slice %8 {offsets = [12, 0], sizes = [1, 80], strides = [1, 1]} : vector<16x80xbf16> to vector<1x80xbf16>
    %c960 = arith.constant 960 : index
    %c0_26 = arith.constant 0 : index
    %59 = vector.load %arg4[%c960, %c0_26] : memref<1280x300xbf16, #tpu.memory_space<vmem>>, vector<80x300xbf16>
    %cst_27 = arith.constant dense<0.000000e+00> : vector<1x300xf32>
    %60 = tpu.matmul %58, %59, %cst_27 {dimension_numbers = #tpu.dot_dimension_numbers<[1], [0], [0], [1], [0, 0, 1, 1], [], []>} : vector<1x80xbf16>, vector<80x300xbf16>, vector<1x300xf32> -> vector<1x300xf32>
    %61 = arith.addf %57, %60 : vector<1x300xf32>
    %62 = vector.extract_strided_slice %8 {offsets = [13, 0], sizes = [1, 80], strides = [1, 1]} : vector<16x80xbf16> to vector<1x80xbf16>
    %c1040 = arith.constant 1040 : index
    %c0_28 = arith.constant 0 : index
    %63 = vector.load %arg4[%c1040, %c0_28] : memref<1280x300xbf16, #tpu.memory_space<vmem>>, vector<80x300xbf16>
    %cst_29 = arith.constant dense<0.000000e+00> : vector<1x300xf32>
    %64 = tpu.matmul %62, %63, %cst_29 {dimension_numbers = #tpu.dot_dimension_numbers<[1], [0], [0], [1], [0, 0, 1, 1], [], []>} : vector<1x80xbf16>, vector<80x300xbf16>, vector<1x300xf32> -> vector<1x300xf32>
    %65 = arith.addf %61, %64 : vector<1x300xf32>
    %66 = vector.extract_strided_slice %8 {offsets = [14, 0], sizes = [1, 80], strides = [1, 1]} : vector<16x80xbf16> to vector<1x80xbf16>
    %c1120 = arith.constant 1120 : index
    %c0_30 = arith.constant 0 : index
    %67 = vector.load %arg4[%c1120, %c0_30] : memref<1280x300xbf16, #tpu.memory_space<vmem>>, vector<80x300xbf16>
    %cst_31 = arith.constant dense<0.000000e+00> : vector<1x300xf32>
    %68 = tpu.matmul %66, %67, %cst_31 {dimension_numbers = #tpu.dot_dimension_numbers<[1], [0], [0], [1], [0, 0, 1, 1], [], []>} : vector<1x80xbf16>, vector<80x300xbf16>, vector<1x300xf32> -> vector<1x300xf32>
    %69 = arith.addf %65, %68 : vector<1x300xf32>
    %70 = vector.extract_strided_slice %8 {offsets = [15, 0], sizes = [1, 80], strides = [1, 1]} : vector<16x80xbf16> to vector<1x80xbf16>
    %c1200 = arith.constant 1200 : index
    %c0_32 = arith.constant 0 : index
    %71 = vector.load %arg4[%c1200, %c0_32] : memref<1280x300xbf16, #tpu.memory_space<vmem>>, vector<80x300xbf16>
    %cst_33 = arith.constant dense<0.000000e+00> : vector<1x300xf32>
    %72 = tpu.matmul %70, %71, %cst_33 {dimension_numbers = #tpu.dot_dimension_numbers<[1], [0], [0], [1], [0, 0, 1, 1], [], []>} : vector<1x80xbf16>, vector<80x300xbf16>, vector<1x300xf32> -> vector<1x300xf32>
    %73 = arith.addf %69, %72 : vector<1x300xf32>
    %c0_34 = arith.constant 0 : index
    %c0_35 = arith.constant 0 : index
    %74 = vector.load %arg12[%c0_34, %c0_35] : memref<1x300xf32, #tpu.memory_space<vmem>>, vector<1x300xf32>
    %75 = arith.addf %74, %73 : vector<1x300xf32>
    %c0_36 = arith.constant 0 : index
    %c0_37 = arith.constant 0 : index
    %76 = vector.load %arg12[%c0_36, %c0_37] : memref<1x300xf32, #tpu.memory_space<vmem>>, vector<1x300xf32>
    tpu.vector_store %arg12[%c0_36, %c0_37], %75 {strides = array<i32>} : memref<1x300xf32, #tpu.memory_space<vmem>>, vector<1x300xf32>,
    %c4_i32 = arith.constant 4 : i32
    %77 = arith.cmpi eq, %arg0, %c4_i32 : i32
    %78 = arith.extui %77 : i1 to i32
    %c0_i32_38 = arith.constant 0 : i32
    %79 = arith.cmpi ne, %78, %c0_i32_38 : i32
    scf.if %79 {
      %c0_39 = arith.constant 0 : index
      %c0_40 = arith.constant 0 : index
      %80 = vector.load %arg12[%c0_39, %c0_40] : memref<1x300xf32, #tpu.memory_space<vmem>>, vector<1x300xf32>
      %c0_41 = arith.constant 0 : index
      %c0_42 = arith.constant 0 : index
      %81 = vector.load %arg5[%c0_41, %c0_42] : memref<1x300xf32, #tpu.memory_space<vmem>>, vector<1x300xf32>
      %82 = arith.addf %80, %81 : vector<1x300xf32>
      %cst_43 = arith.constant 0.000000e+00 : f32
      %83 = vector.broadcast %cst_43 : f32 to vector<1x300xf32>
      %84 = arith.maximumf %82, %83 : vector<1x300xf32>
      %85 = arith.truncf %84 : vector<1x300xf32> to vector<1x300xbf16>
      %c0_44 = arith.constant 0 : index
      %c0_45 = arith.constant 0 : index
      %86 = vector.load %arg6[%c0_44, %c0_45] : memref<300x50xbf16, #tpu.memory_space<vmem>>, vector<300x50xbf16>
      %cst_46 = arith.constant dense<0.000000e+00> : vector<1x50xf32>
      %87 = tpu.matmul %85, %86, %cst_46 {dimension_numbers = #tpu.dot_dimension_numbers<[1], [0], [0], [1], [0, 0, 1, 1], [], []>} : vector<1x300xbf16>, vector<300x50xbf16>, vector<1x50xf32> -> vector<1x50xf32>
      %c0_47 = arith.constant 0 : index
      %c0_48 = arith.constant 0 : index
      %88 = vector.load %arg7[%c0_47, %c0_48] : memref<1x50xf32, #tpu.memory_space<vmem>>, vector<1x50xf32>
      %89 = arith.addf %87, %88 : vector<1x50xf32>
      %cst_49 = arith.constant 0.000000e+00 : f32
      %90 = vector.broadcast %cst_49 : f32 to vector<1x50xf32>
      %91 = arith.maximumf %89, %90 : vector<1x50xf32>
      %c0_50 = arith.constant 0 : index
      %c0_51 = arith.constant 0 : index
      %92 = vector.load %arg8[%c0_50, %c0_51] : memref<50x5xf32, #tpu.memory_space<vmem>>, vector<50x5xf32>
      %cst_52 = arith.constant dense<0.000000e+00> : vector<1x5xf32>
      %93 = tpu.matmul %91, %92, %cst_52 {dimension_numbers = #tpu.dot_dimension_numbers<[1], [0], [0], [1], [0, 0, 1, 1], [], []>} : vector<1x50xf32>, vector<50x5xf32>, vector<1x5xf32> -> vector<1x5xf32>
      %c0_53 = arith.constant 0 : index
      %c0_54 = arith.constant 0 : index
      %94 = vector.load %arg9[%c0_53, %c0_54] : memref<1x5xf32, #tpu.memory_space<vmem>>, vector<1x5xf32>
      %95 = arith.addf %93, %94 : vector<1x5xf32>
      %c0_55 = arith.constant 0 : index
      %c0_56 = arith.constant 0 : index
      %96 = vector.load %arg10[%c0_55, %c0_56] : memref<1x5xf32, #tpu.memory_space<vmem>>, vector<1x5xf32>
      tpu.vector_store %arg10[%c0_55, %c0_56], %95 {strides = array<i32>} : memref<1x5xf32, #tpu.memory_space<vmem>>, vector<1x5xf32>,
    } else {
    }
    return
  }
  func.func @transform_0(%arg0: i32) -> (i32, i32, i32) {
    %c0_i32 = arith.constant 0 : i32
    %c0_i32_0 = arith.constant 0 : i32
    %c0_i32_1 = arith.constant 0 : i32
    %c0_i32_2 = arith.constant 0 : i32
    return %c0_i32, %c0_i32_0, %c0_i32_1 : i32, i32, i32
  }
  func.func @transform_1(%arg0: i32) -> i32 {
    %c0_i32 = arith.constant 0 : i32
    %c0_i32_0 = arith.constant 0 : i32
    return %c0_i32 : i32
  }
  func.func @transform_2(%arg0: i32) -> i32 {
    %c0_i32 = arith.constant 0 : i32
    %c0_i32_0 = arith.constant 0 : i32
    return %c0_i32 : i32
  }
  func.func @transform_3(%arg0: i32) -> (i32, i32) {
    %c0_i32 = arith.constant 0 : i32
    %c0_i32_0 = arith.constant 0 : i32
    return %arg0, %c0_i32 : i32, i32
  }
  func.func @transform_4(%arg0: i32) -> (i32, i32) {
    %c0_i32 = arith.constant 0 : i32
    %c0_i32_0 = arith.constant 0 : i32
    %c0_i32_1 = arith.constant 0 : i32
    return %c0_i32, %c0_i32_0 : i32, i32
  }
  func.func @transform_5(%arg0: i32) -> (i32, i32) {
    %c0_i32 = arith.constant 0 : i32
    %c0_i32_0 = arith.constant 0 : i32
    %c0_i32_1 = arith.constant 0 : i32
    return %c0_i32, %c0_i32_0 : i32, i32
  }
  func.func @transform_6(%arg0: i32) -> (i32, i32) {
    %c0_i32 = arith.constant 0 : i32
    %c0_i32_0 = arith.constant 0 : i32
    %c0_i32_1 = arith.constant 0 : i32
    return %c0_i32, %c0_i32_0 : i32, i32
  }
  func.func @transform_7(%arg0: i32) -> (i32, i32) {
    %c0_i32 = arith.constant 0 : i32
    %c0_i32_0 = arith.constant 0 : i32
    %c0_i32_1 = arith.constant 0 : i32
    return %c0_i32, %c0_i32_0 : i32, i32
  }
  func.func @transform_8(%arg0: i32) -> (i32, i32) {
    %c0_i32 = arith.constant 0 : i32
    %c0_i32_0 = arith.constant 0 : i32
    %c0_i32_1 = arith.constant 0 : i32
    return %c0_i32, %c0_i32_0 : i32, i32
  }
  func.func @transform_9(%arg0: i32) -> (i32, i32) {
    %c0_i32 = arith.constant 0 : i32
    %c0_i32_0 = arith.constant 0 : i32
    %c0_i32_1 = arith.constant 0 : i32
    return %c0_i32, %c0_i32_0 : i32, i32
  }
}

</mosaic_0001>

<bundles_post_ra>
// kernel: convnet_forward.1
= control target key start
LH: loop header
LB: loop body
LE: loop exit
PB: predicated region body
PF: predicated region fallthrough
CT: control target
= control target key end

     0   :  { %s7769_s0 = inlined_call_operand.vmem [shape: f32[5,88,128], index: 0, kind: input, shape index: {}]   ;;  %s7770_s1 = inlined_call_operand.vmem [shape: f32[25], index: 1, kind: input, shape index: {}]   ;;  %s7771_s2 = inlined_call_operand.<no memory space> [shape: f32[1], index: 2, kind: input, shape index: {}]   ;;  %s7772_s3 = inlined_call_operand.vmem [shape: bf16[6400,300], index: 3, kind: input, shape index: {}]   ;;  %s7773_s4 = inlined_call_operand.vmem [shape: f32[1,300], index: 4, kind: input, shape index: {}]   ;;  %s7774_s5 = inlined_call_operand.vmem [shape: bf16[300,50], index: 5, kind: input, shape index: {}]   ;;  %s7775_s6 = inlined_call_operand.vmem [shape: f32[1,50], index: 6, kind: input, shape index: {}]   ;;  %s7776_s7 = inlined_call_operand.vmem [shape: f32[50,5], index: 7, kind: input, shape index: {}]   ;;  %s7777_s8 = inlined_call_operand.vmem [shape: f32[1,5], index: 8, kind: input, shape index: {}]   ;;  %s7778_s9 = inlined_call_operand.hbm [shape: f32[1,5], index: 9, kind: output, shape index: {}]  }
   0x1   :  { %14 = sst [smem:[#allocation4]] %s7771_s2 }
   0x2   :  { %15 = vsyncpa [#allocation7], 0 }
   0x3   :  { %16 = vsyncpa [#allocation6], 0  ;;  %s6104_s11 = smov 0  }
   0x4 LB: > { %s6110_s12 = sadd.s32 4294967295, %s6046_s11   ;;  %p4534_p0 = scmp.ge.s32.totalorder %s6046_s11, 1  ;;  %s6046_s11 = sphi %s6104_s11, %s22_s11  }
   0x5   : > { %p242_p1 = scmp.lt.s32.totalorder %s6046_s11, 6  ;;  %p4535_p2 = scmp.ne.s32.totalorder %s6110_s12, 0 }
   0x6   : > { %s257_s14 = sshll.u32 %s7770_s1, 4  ;;  %p5974_p4 = scmp.eq.s32.totalorder %s6110_s12, 0  ;;  %s258_s14 = int_to_ptr.vmem [resolvable:$true] %s257_s14 }
   0x7   : > { %p243_p3 = pnand %p4534_p0, %p242_p1  ;;  %s6048_s15 = smov [#allocation5]  }
   0x9   : > { %p5970_p5 = pneg %p243_p3  ;;  %298 = sbr.rel (%p243_p3) target bundleno = 971 (0x3cb), region = 56 }
   0xb   : > { %p5971_p6 = pnand %p5974_p4, %p5970_p5 }
   0xd   : > { %5973 = dma.vmem_to_smem (!%p5971_p6), %s258_s14, 16, %s6048_s15, [#allocation7]  }
   0xe   : > { %6037 = dma.done.wait (%p5974_p4), [#allocation7], 16  }
   0xf   : > { %6039 = vsyncadd (%p5974_p4), [#allocation7], 4294967280 }
  0x10   : > { %305 = sfence }
  0x11   : > { %s332_s16 = smul.u32 160, %s6110_s12  ;;  %s355_s21 = sld [smem:[#allocation5]] (!%p4535_p2) }
  0x12   : > { %s4541_s22 = sld [smem:[#allocation5 + $0x5]] (!%p4535_p2) }
  0x13   : > { %p333_p7 = scmp.lt.s32.totalorder %s332_s16, 799  ;;  %s4542_s23 = sld [smem:[#allocation5 + $0xa]] (!%p4535_p2) }
  0x14   : > { %343 = sbr.rel (%p4535_p2) target bundleno = 280 (0x118), region = 64  ;;  %s6228_s29 = sld [smem:[#allocation5 + $0x1]] (!%p4535_p2) }
  0x15   : > { %s7780_s16 = smov (!%p333_p7, %s332_s16), 799  ;;  %s6279_s30 = sld [smem:[#allocation5 + $0x6]] (!%p4535_p2) }
  0x16   : > { %s5961_s17 = smul.u32 12, %s7780_s16  ;;  %s6285_s10 = sld [smem:[#allocation5 + $0xb]] (!%p4535_p2) }
  0x17   : > { %s6299_s16 = sld [smem:[#allocation5 + $0x10]] (!%p4535_p2) }
  0x18   : > { %s6123_s20 = scalar_lea.vmem %s7772_s3, %s5961_s17  ;;  %s6316_s26 = sld [smem:[#allocation5 + $0x15]] (!%p4535_p2) }
  0x19   : > { %v6130_v0 = vld [vmem:[%s7769_s0] sm:$0xff]  ;;  %v6135_v1 = vld [vmem:[%s7769_s0 + $0x8] sm:$0xff]  ;;  %v6140_v2 = vld [vmem:[%s7769_s0 + $0x10] sm:$0xff]  ;;  %v356_v5 = vstv %s355_s21  ;;  %vm401_vm0 = vcmask 1046528   ;;  %vm467_vm1 = vcmask 1045504   ;;  %vm533_vm2 = vcmask 1044480  }
  0x1a   : > { %v6145_v3 = vld [vmem:[%s7769_s0 + $0x18] sm:$0xff]  ;;  %v6150_v4 = vld [vmem:[%s7769_s0 + $0x20] sm:$0xff]  ;;  %v6155_v6 = vld [vmem:[%s7769_s0 + $0x28] sm:$0xff]  ;;  %v357_v9 = vmul.f32 %v356_v5, %v6130_v0  ;;  %v358_v10 = vmul.f32 %v356_v5, %v6135_v1  ;;  %v359_v11 = vmul.f32 %v356_v5, %v6140_v2  ;;  %v378_v22 = vstv %s4541_s22  ;;  %s6219_s22 = sld [smem:[#allocation5 + $0xf]] }
  0x1b   : > { %v6160_v7 = vld [vmem:[%s7769_s0 + $0x30] sm:$0xff]  ;;  %v6165_v8 = vld [vmem:[%s7769_s0 + $0x38] sm:$0xff]  ;;  %v360_v12 = vmul.f32 %v356_v5, %v6145_v3  ;;  %v6174_v13 = vld [vmem:[%s7769_s0 + $0x40] sm:$0xff]  ;;  %v361_v15 = vmul.f32 %v356_v5, %v6150_v4  ;;  %v362_v16 = vmul.f32 %v356_v5, %v6155_v6  ;;  %v444_v23 = vstv %s4542_s23  ;;  %s6225_s23 = sld [smem:[#allocation5 + $0x14]] }
  0x1c   : > { %v6179_v14 = vld [vmem:[%s7769_s0 + $0x48] sm:$0xff]  ;;  %v363_v17 = vmul.f32 %v356_v5, %v6160_v7  ;;  %v364_v18 = vmul.f32 %v356_v5, %v6165_v8  ;;  %v6188_v19 = vld [vmem:[%s7769_s0 + $0x50] sm:$0xff]  ;;  %v365_v20 = vmul.f32 %v356_v5, %v6174_v13  ;;  %v379_v24 = vmul.f32 %v378_v22, %v6130_v0  ;;  %s6480_s21 = sld [smem:[#allocation5 + $0x11]] }
  0x1d   : > { %v366_v21 = vmul.f32 %v356_v5, %v6179_v14  ;;  %v380_v25 = vmul.f32 %v378_v22, %v6135_v1  ;;  %v381_v26 = vmul.f32 %v378_v22, %v6140_v2  ;;  %v382_v27 = vmul.f32 %v378_v22, %v6145_v3  ;;  %s6684_s2 = sld [smem:[#allocation5 + $0xd]] }
  0x1e   : > { %v383_v28 = vmul.f32 %v378_v22, %v6150_v4  ;;  %v384_v29 = vmul.f32 %v378_v22, %v6155_v6  ;;  %v385_v30 = vmul.f32 %v378_v22, %v6160_v7  ;;  %v386_v31 = vmul.f32 %v378_v22, %v6165_v8  ;;  %s6795_s17 = sld [smem:[#allocation5 + $0x4]] }
  0x1f   : > { %v387_v32 = vmul.f32 %v378_v22, %v6174_v13  ;;  %v388_v33 = vmul.f32 %v378_v22, %v6179_v14  ;;  %v389_v34 = vmul.f32 %v378_v22, %v6188_v19  ;;  %v402_v35 = vrot.slane %v379_v24, 1  ;;  %s6798_s18 = sld [smem:[#allocation5 + $0x9]] }
  0x20   : > { %v403_v36 = vrot.slane %v380_v25, 1  ;;  %v405_v37 = vrot.slane %v381_v26, 1  ;;  %v407_v38 = vrot.slane %v382_v27, 1  ;;  %v409_v39 = vrot.slane %v383_v28, 1  ;;  %s6959_s27 = sld [smem:[#allocation5 + $0x13]] }
  0x21   : > { %v411_v40 = vrot.slane %v384_v29, 1  ;;  %v413_v41 = vrot.slane %v385_v30, 1  ;;  %v415_v42 = vrot.slane %v386_v31, 1  ;;  %v417_v43 = vrot.slane %v387_v32, 1  ;;  %s7004_s28 = sld [smem:[#allocation5 + $0x18]] }
  0x22   : > { %v404_v44 = vsel %vm401_vm0, %v402_v35, %v403_v36  ;;  %v406_v45 = vsel %vm401_vm0, %v403_v36, %v405_v37  ;;  %v408_v46 = vsel %vm401_vm0, %v405_v37, %v407_v38  ;;  %v410_v47 = vsel %vm401_vm0, %v407_v38, %v409_v39 }
  0x23   : > { %v412_v48 = vsel %vm401_vm0, %v409_v39, %v411_v40  ;;  %v414_v49 = vsel %vm401_vm0, %v411_v40, %v413_v41  ;;  %v416_v50 = vsel %vm401_vm0, %v413_v41, %v415_v42  ;;  %v418_v51 = vsel %vm401_vm0, %v415_v42, %v417_v43 }
  0x24   : > { %v419_v52 = vrot.slane %v388_v33, 1  ;;  %v421_v53 = vrot.slane %v389_v34, 1  ;;  %v433_v54 = vadd.f32 %v404_v44, %v357_v9  ;;  %v434_v55 = vadd.f32 %v406_v45, %v358_v10 }
  0x25   : > { %v435_v56 = vadd.f32 %v408_v46, %v359_v11  ;;  %v436_v57 = vadd.f32 %v410_v47, %v360_v12  ;;  %v437_v58 = vadd.f32 %v412_v48, %v361_v15  ;;  %v438_v59 = vadd.f32 %v414_v49, %v362_v16 }
  0x26   : > { %v420_v60 = vsel %vm401_vm0, %v417_v43, %v419_v52  ;;  %v422_v61 = vsel %vm401_vm0, %v419_v52, %v421_v53  ;;  %v439_v62 = vadd.f32 %v416_v50, %v363_v17  ;;  %v440_v63 = vadd.f32 %v418_v51, %v364_v18 }
  0x27   : > { %v441_v5 = vadd.f32 %v420_v60, %v365_v20  ;;  %v442_v22 = vadd.f32 %v422_v61, %v366_v21  ;;  %v445_v24 = vmul.f32 %v444_v23, %v6130_v0  ;;  %v446_v25 = vmul.f32 %v444_v23, %v6135_v1 }
  0x28   : > { %v447_v26 = vmul.f32 %v444_v23, %v6140_v2  ;;  %v448_v9 = vmul.f32 %v444_v23, %v6145_v3  ;;  %v449_v10 = vmul.f32 %v444_v23, %v6150_v4  ;;  %v450_v11 = vmul.f32 %v444_v23, %v6155_v6 }
  0x29   : > { %v451_v12 = vmul.f32 %v444_v23, %v6160_v7  ;;  %v452_v15 = vmul.f32 %v444_v23, %v6165_v8  ;;  %v453_v16 = vmul.f32 %v444_v23, %v6174_v13  ;;  %v454_v17 = vmul.f32 %v444_v23, %v6179_v14 }
  0x2a   : > { %v455_v18 = vmul.f32 %v444_v23, %v6188_v19  ;;  %v468_v20 = vrot.slane %v445_v24, 2  ;;  %v469_v21 = vrot.slane %v446_v25, 2  ;;  %v471_v27 = vrot.slane %v447_v26, 2 }
  0x2b   : > { %v473_v28 = vrot.slane %v448_v9, 2  ;;  %v475_v29 = vrot.slane %v449_v10, 2  ;;  %v477_v30 = vrot.slane %v450_v11, 2  ;;  %v479_v31 = vrot.slane %v451_v12, 2 }
  0x2c   : > { %v470_v32 = vsel %vm467_vm1, %v468_v20, %v469_v21  ;;  %v472_v33 = vsel %vm467_vm1, %v469_v21, %v471_v27  ;;  %v481_v34 = vrot.slane %v452_v15, 2  ;;  %v483_v35 = vrot.slane %v453_v16, 2 }
  0x2d   : > { %v474_v36 = vsel %vm467_vm1, %v471_v27, %v473_v28  ;;  %v476_v37 = vsel %vm467_vm1, %v473_v28, %v475_v29  ;;  %v478_v23 = vsel %vm467_vm1, %v475_v29, %v477_v30  ;;  %v480_v38 = vsel %vm467_vm1, %v477_v30, %v479_v31 }
  0x2e   : > { %v482_v39 = vsel %vm467_vm1, %v479_v31, %v481_v34  ;;  %v484_v40 = vsel %vm467_vm1, %v481_v34, %v483_v35  ;;  %v485_v41 = vrot.slane %v454_v17, 2  ;;  %v487_v42 = vrot.slane %v455_v18, 2 }
  0x2f   : > { %v499_v43 = vadd.f32 %v470_v32, %v433_v54  ;;  %v500_v44 = vadd.f32 %v472_v33, %v434_v55  ;;  %v501_v45 = vadd.f32 %v474_v36, %v435_v56  ;;  %v502_v48 = vadd.f32 %v476_v37, %v436_v57 }
  0x30   : > { %v486_v46 = vsel %vm467_vm1, %v483_v35, %v485_v41  ;;  %v488_v47 = vsel %vm467_vm1, %v485_v41, %v487_v42  ;;  %v503_v49 = vadd.f32 %v478_v23, %v437_v58  ;;  %v504_v50 = vadd.f32 %v480_v38, %v438_v59 }
  0x31   : > { %v505_v51 = vadd.f32 %v482_v39, %v439_v62  ;;  %v506_v52 = vadd.f32 %v484_v40, %v440_v63  ;;  %v507_v53 = vadd.f32 %v486_v46, %v441_v5  ;;  %v508_v60 = vadd.f32 %v488_v47, %v442_v22 }
  0x32   : > { %v510_v61 = vstv %s6219_s22  ;;  %v576_v24 = vstv %s6225_s23  ;;  %v6243_v25 = vstv %s6228_s29  ;;  %vm599_vm3 = vcmask 1043456   ;;  %s6673_s22 = sld [smem:[#allocation5 + $0x8]] }
  0x33   : > { %v511_v54 = vmul.f32 %v510_v61, %v6130_v0  ;;  %v512_v55 = vmul.f32 %v510_v61, %v6135_v1  ;;  %v513_v56 = vmul.f32 %v510_v61, %v6140_v2  ;;  %v514_v26 = vmul.f32 %v510_v61, %v6145_v3 }
  0x34   : > { %v515_v57 = vmul.f32 %v510_v61, %v6150_v4  ;;  %v516_v58 = vmul.f32 %v510_v61, %v6155_v6  ;;  %v517_v59 = vmul.f32 %v510_v61, %v6160_v7  ;;  %v518_v62 = vmul.f32 %v510_v61, %v6165_v8 }
  0x35   : > { %v519_v63 = vmul.f32 %v510_v61, %v6174_v13  ;;  %v520_v5 = vmul.f32 %v510_v61, %v6179_v14  ;;  %v521_v22 = vmul.f32 %v510_v61, %v6188_v19  ;;  %v534_v9 = vrot.slane %v511_v54, 3 }
  0x36   : > { %v535_v10 = vrot.slane %v512_v55, 3  ;;  %v537_v11 = vrot.slane %v513_v56, 3  ;;  %v539_v12 = vrot.slane %v514_v26, 3  ;;  %v541_v15 = vrot.slane %v515_v57, 3 }
  0x37   : > { %v543_v16 = vrot.slane %v516_v58, 3  ;;  %v545_v17 = vrot.slane %v517_v59, 3  ;;  %v547_v18 = vrot.slane %v518_v62, 3  ;;  %v549_v20 = vrot.slane %v519_v63, 3 }
  0x38   : > { %v536_v21 = vsel %vm533_vm2, %v534_v9, %v535_v10  ;;  %v538_v27 = vsel %vm533_vm2, %v535_v10, %v537_v11  ;;  %v540_v28 = vsel %vm533_vm2, %v537_v11, %v539_v12  ;;  %v542_v29 = vsel %vm533_vm2, %v539_v12, %v541_v15 }
  0x39   : > { %v544_v30 = vsel %vm533_vm2, %v541_v15, %v543_v16  ;;  %v546_v31 = vsel %vm533_vm2, %v543_v16, %v545_v17  ;;  %v548_v32 = vsel %vm533_vm2, %v545_v17, %v547_v18  ;;  %v550_v33 = vsel %vm533_vm2, %v547_v18, %v549_v20  ;;  %v6304_v15 = vld [vmem:[%s7769_s0 + $0x68] sm:$0xff]  ;;  %v6309_v16 = vld [vmem:[%s7769_s0 + $0x70] sm:$0xff]  ;;  %v6314_v17 = vld [vmem:[%s7769_s0 + $0x78] sm:$0xff] }
  0x3a   : > { %v551_v34 = vrot.slane %v520_v5, 3  ;;  %v553_v35 = vrot.slane %v521_v22, 3  ;;  %v565_v36 = vadd.f32 %v536_v21, %v499_v43  ;;  %v566_v37 = vadd.f32 %v538_v27, %v500_v44  ;;  %v6292_v5 = vld [vmem:[%s7769_s0 + $0x58] sm:$0xff]  ;;  %v6297_v22 = vld [vmem:[%s7769_s0 + $0x60] sm:$0xff] }
  0x3b   : > { %v567_v23 = vadd.f32 %v540_v28, %v501_v45  ;;  %v568_v38 = vadd.f32 %v542_v29, %v502_v48  ;;  %v569_v39 = vadd.f32 %v544_v30, %v503_v49  ;;  %v570_v40 = vadd.f32 %v546_v31, %v504_v50  ;;  %v6323_v28 = vld [vmem:[%s7769_s0 + $0x80] sm:$0xff]  ;;  %v6328_v29 = vld [vmem:[%s7769_s0 + $0x88] sm:$0xff]  ;;  %v6333_v30 = vld [vmem:[%s7769_s0 + $0x90] sm:$0xff] }
  0x3c   : > { %v552_v41 = vsel %vm533_vm2, %v549_v20, %v551_v34  ;;  %v554_v42 = vsel %vm533_vm2, %v551_v34, %v553_v35  ;;  %v571_v46 = vadd.f32 %v548_v32, %v505_v51  ;;  %v572_v47 = vadd.f32 %v550_v33, %v506_v52  ;;  %v6338_v35 = vld [vmem:[%s7769_s0 + $0x98] sm:$0xff] }
  0x3d   : > { %v573_v61 = vadd.f32 %v552_v41, %v507_v53  ;;  %v574_v54 = vadd.f32 %v554_v42, %v508_v60  ;;  %v577_v55 = vmul.f32 %v576_v24, %v6130_v0  ;;  %v578_v56 = vmul.f32 %v576_v24, %v6135_v1 }
  0x3e   : > { %v579_v26 = vmul.f32 %v576_v24, %v6140_v2  ;;  %v580_v43 = vmul.f32 %v576_v24, %v6145_v3  ;;  %v581_v44 = vmul.f32 %v576_v24, %v6150_v4  ;;  %v582_v45 = vmul.f32 %v576_v24, %v6155_v6 }
  0x3f   : > { %v583_v48 = vmul.f32 %v576_v24, %v6160_v7  ;;  %v584_v49 = vmul.f32 %v576_v24, %v6165_v8  ;;  %v585_v50 = vmul.f32 %v576_v24, %v6174_v13  ;;  %v586_v51 = vmul.f32 %v576_v24, %v6179_v14 }
  0x40   : > { %v587_v0 = vmul.f32 %v576_v24, %v6188_v19  ;;  %v600_v52 = vrot.slane %v577_v55, 4  ;;  %v601_v1 = vrot.slane %v578_v56, 4  ;;  %v603_v53 = vrot.slane %v579_v26, 4 }
  0x41   : > { %v605_v2 = vrot.slane %v580_v43, 4  ;;  %v607_v60 = vrot.slane %v581_v44, 4  ;;  %v609_v3 = vrot.slane %v582_v45, 4  ;;  %v611_v57 = vrot.slane %v583_v48, 4  ;;  %v6368_v45 = vld [vmem:[%s7769_s0 + $0xa8] sm:$0xff] }
  0x42   : > { %v602_v4 = vsel %vm599_vm3, %v600_v52, %v601_v1  ;;  %v604_v6 = vsel %vm599_vm3, %v601_v1, %v603_v53  ;;  %v613_v7 = vrot.slane %v584_v49, 4  ;;  %v615_v58 = vrot.slane %v585_v50, 4 }
  0x43   : > { %v606_v8 = vsel %vm599_vm3, %v603_v53, %v605_v2  ;;  %v608_v13 = vsel %vm599_vm3, %v605_v2, %v607_v60  ;;  %v610_v14 = vsel %vm599_vm3, %v607_v60, %v609_v3  ;;  %v612_v19 = vsel %vm599_vm3, %v609_v3, %v611_v57 }
  0x44   : > { %v614_v24 = vsel %vm599_vm3, %v611_v57, %v613_v7  ;;  %v616_v59 = vsel %vm599_vm3, %v613_v7, %v615_v58  ;;  %v617_v62 = vrot.slane %v586_v51, 4  ;;  %v619_v63 = vrot.slane %v587_v0, 4 }
  0x45   : > { %v631_v9 = vadd.f32 %v602_v4, %v565_v36  ;;  %v632_v10 = vadd.f32 %v604_v6, %v566_v37  ;;  %v633_v11 = vadd.f32 %v606_v8, %v567_v23  ;;  %v634_v12 = vadd.f32 %v608_v13, %v568_v38  ;;  %v6343_v36 = vld [vmem:[%s7769_s0 + $0xa0] sm:$0xff] }
  0x46   : > { %v618_v18 = vsel %vm599_vm3, %v615_v58, %v617_v62  ;;  %v620_v20 = vsel %vm599_vm3, %v617_v62, %v619_v63  ;;  %v635_v21 = vadd.f32 %v610_v14, %v569_v39  ;;  %v636_v27 = vadd.f32 %v612_v19, %v570_v40 }
  0x47   : > { %v637_v31 = vadd.f32 %v614_v24, %v571_v46  ;;  %v638_v32 = vadd.f32 %v616_v59, %v572_v47  ;;  %v639_v33 = vadd.f32 %v618_v18, %v573_v61  ;;  %v640_v34 = vadd.f32 %v620_v20, %v574_v54 }
  0x48   : > { %v655_v37 = vmul.f32 %v6292_v5, %v6243_v25  ;;  %v656_v23 = vmul.f32 %v6297_v22, %v6243_v25  ;;  %v657_v38 = vmul.f32 %v6304_v15, %v6243_v25  ;;  %v658_v39 = vmul.f32 %v6309_v16, %v6243_v25 }
  0x49   : > { %v659_v40 = vmul.f32 %v6314_v17, %v6243_v25  ;;  %v660_v41 = vmul.f32 %v6323_v28, %v6243_v25  ;;  %v661_v42 = vmul.f32 %v6328_v29, %v6243_v25  ;;  %v662_v46 = vmul.f32 %v6333_v30, %v6243_v25 }
  0x4a   : > { %v663_v47 = vmul.f32 %v6338_v35, %v6243_v25  ;;  %v664_v61 = vmul.f32 %v6343_v36, %v6243_v25  ;;  %v665_v54 = vadd.f32 %v655_v37, %v631_v9  ;;  %v666_v55 = vadd.f32 %v656_v23, %v632_v10 }
  0x4b   : > { %v667_v56 = vadd.f32 %v657_v38, %v633_v11  ;;  %v668_v26 = vadd.f32 %v658_v39, %v634_v12  ;;  %v669_v43 = vadd.f32 %v659_v40, %v635_v21  ;;  %v670_v44 = vadd.f32 %v660_v41, %v636_v27 }
  0x4c   : > { %v671_v48 = vadd.f32 %v661_v42, %v637_v31  ;;  %v672_v49 = vadd.f32 %v662_v46, %v638_v32  ;;  %v673_v50 = vadd.f32 %v663_v47, %v639_v33  ;;  %v674_v51 = vadd.f32 %v664_v61, %v640_v34 }
  0x4d   : > { %v676_v0 = vstv %s6279_s30  ;;  %v741_v52 = vstv %s6285_s10  ;;  %v6373_v1 = vstv %s6299_s16  ;;  %v6376_v25 = vstv %s6316_s26  ;;  %s6456_s30 = sld [smem:[#allocation5 + $0x2]] }
  0x4e   : > { %v677_v53 = vmul.f32 %v6292_v5, %v676_v0  ;;  %v678_v2 = vmul.f32 %v6297_v22, %v676_v0  ;;  %v679_v60 = vmul.f32 %v6304_v15, %v676_v0  ;;  %v680_v3 = vmul.f32 %v6309_v16, %v676_v0  ;;  %s6466_s10 = sld [smem:[#allocation5 + $0x7]] }
  0x4f   : > { %v681_v57 = vmul.f32 %v6314_v17, %v676_v0  ;;  %v682_v4 = vmul.f32 %v6323_v28, %v676_v0  ;;  %v683_v6 = vmul.f32 %v6328_v29, %v676_v0  ;;  %v684_v7 = vmul.f32 %v6333_v30, %v676_v0  ;;  %s6476_s16 = sld [smem:[#allocation5 + $0xc]] }
  0x50   : > { %v685_v58 = vmul.f32 %v6338_v35, %v676_v0  ;;  %v686_v8 = vmul.f32 %v6343_v36, %v676_v0  ;;  %v687_v13 = vmul.f32 %v6368_v45, %v676_v0  ;;  %v699_v14 = vrot.slane %v677_v53, 1  ;;  %s6951_s26 = sld [smem:[#allocation5 + $0xe]] }
  0x51   : > { %v700_v19 = vrot.slane %v678_v2, 1  ;;  %v702_v24 = vrot.slane %v679_v60, 1  ;;  %v704_v59 = vrot.slane %v680_v3, 1  ;;  %v706_v62 = vrot.slane %v681_v57, 1 }
  0x52   : > { %v708_v63 = vrot.slane %v682_v4, 1  ;;  %v710_v9 = vrot.slane %v683_v6, 1  ;;  %v712_v10 = vrot.slane %v684_v7, 1  ;;  %v714_v11 = vrot.slane %v685_v58, 1 }
  0x53   : > { %v701_v12 = vsel %vm401_vm0, %v699_v14, %v700_v19  ;;  %v703_v18 = vsel %vm401_vm0, %v700_v19, %v702_v24  ;;  %v705_v20 = vsel %vm401_vm0, %v702_v24, %v704_v59  ;;  %v707_v21 = vsel %vm401_vm0, %v704_v59, %v706_v62 }
  0x54   : > { %v709_v27 = vsel %vm401_vm0, %v706_v62, %v708_v63  ;;  %v711_v31 = vsel %vm401_vm0, %v708_v63, %v710_v9  ;;  %v713_v32 = vsel %vm401_vm0, %v710_v9, %v712_v10  ;;  %v715_v33 = vsel %vm401_vm0, %v712_v10, %v714_v11 }
  0x55   : > { %v716_v34 = vrot.slane %v686_v8, 1  ;;  %v718_v37 = vrot.slane %v687_v13, 1  ;;  %v730_v23 = vadd.f32 %v701_v12, %v665_v54  ;;  %v731_v38 = vadd.f32 %v703_v18, %v666_v55 }
  0x56   : > { %v732_v39 = vadd.f32 %v705_v20, %v667_v56  ;;  %v733_v40 = vadd.f32 %v707_v21, %v668_v26  ;;  %v734_v41 = vadd.f32 %v709_v27, %v669_v43  ;;  %v735_v42 = vadd.f32 %v711_v31, %v670_v44 }
  0x57   : > { %v717_v46 = vsel %vm401_vm0, %v714_v11, %v716_v34  ;;  %v719_v47 = vsel %vm401_vm0, %v716_v34, %v718_v37  ;;  %v736_v61 = vadd.f32 %v713_v32, %v671_v48  ;;  %v737_v0 = vadd.f32 %v715_v33, %v672_v49 }
  0x58   : > { %v738_v53 = vadd.f32 %v717_v46, %v673_v50  ;;  %v739_v2 = vadd.f32 %v719_v47, %v674_v51  ;;  %v742_v60 = vmul.f32 %v6292_v5, %v741_v52  ;;  %v743_v3 = vmul.f32 %v6297_v22, %v741_v52 }
  0x59   : > { %v744_v57 = vmul.f32 %v6304_v15, %v741_v52  ;;  %v745_v54 = vmul.f32 %v6309_v16, %v741_v52  ;;  %v746_v55 = vmul.f32 %v6314_v17, %v741_v52  ;;  %v747_v56 = vmul.f32 %v6323_v28, %v741_v52 }
  0x5a   : > { %v748_v26 = vmul.f32 %v6328_v29, %v741_v52  ;;  %v749_v43 = vmul.f32 %v6333_v30, %v741_v52  ;;  %v750_v44 = vmul.f32 %v6338_v35, %v741_v52  ;;  %v751_v48 = vmul.f32 %v6343_v36, %v741_v52 }
  0x5b   : > { %v752_v49 = vmul.f32 %v6368_v45, %v741_v52  ;;  %v764_v50 = vrot.slane %v742_v60, 2  ;;  %v765_v51 = vrot.slane %v743_v3, 2  ;;  %v767_v4 = vrot.slane %v744_v57, 2 }
  0x5c   : > { %v769_v6 = vrot.slane %v745_v54, 2  ;;  %v771_v7 = vrot.slane %v746_v55, 2  ;;  %v773_v58 = vrot.slane %v747_v56, 2  ;;  %v775_v8 = vrot.slane %v748_v26, 2 }
  0x5d   : > { %v766_v13 = vsel %vm467_vm1, %v764_v50, %v765_v51  ;;  %v768_v14 = vsel %vm467_vm1, %v765_v51, %v767_v4  ;;  %v777_v19 = vrot.slane %v749_v43, 2  ;;  %v779_v24 = vrot.slane %v750_v44, 2 }
  0x5e   : > { %v770_v59 = vsel %vm467_vm1, %v767_v4, %v769_v6  ;;  %v772_v62 = vsel %vm467_vm1, %v769_v6, %v771_v7  ;;  %v774_v63 = vsel %vm467_vm1, %v771_v7, %v773_v58  ;;  %v776_v52 = vsel %vm467_vm1, %v773_v58, %v775_v8 }
  0x5f   : > { %v778_v9 = vsel %vm467_vm1, %v775_v8, %v777_v19  ;;  %v780_v10 = vsel %vm467_vm1, %v777_v19, %v779_v24  ;;  %v781_v11 = vrot.slane %v751_v48, 2  ;;  %v783_v12 = vrot.slane %v752_v49, 2 }
  0x60   : > { %v795_v18 = vadd.f32 %v766_v13, %v730_v23  ;;  %v796_v20 = vadd.f32 %v768_v14, %v731_v38  ;;  %v797_v21 = vadd.f32 %v770_v59, %v732_v39  ;;  %v798_v27 = vadd.f32 %v772_v62, %v733_v40 }
  0x61   : > { %v782_v31 = vsel %vm467_vm1, %v779_v24, %v781_v11  ;;  %v784_v32 = vsel %vm467_vm1, %v781_v11, %v783_v12  ;;  %v799_v33 = vadd.f32 %v774_v63, %v734_v41  ;;  %v800_v34 = vadd.f32 %v776_v52, %v735_v42 }
  0x62   : > { %v801_v37 = vadd.f32 %v778_v9, %v736_v61  ;;  %v802_v46 = vadd.f32 %v780_v10, %v737_v0  ;;  %v803_v47 = vadd.f32 %v782_v31, %v738_v53  ;;  %v804_v60 = vadd.f32 %v784_v32, %v739_v2 }
  0x63   : > { %v807_v3 = vmul.f32 %v6292_v5, %v6373_v1  ;;  %v808_v57 = vmul.f32 %v6297_v22, %v6373_v1  ;;  %v809_v23 = vmul.f32 %v6304_v15, %v6373_v1  ;;  %v810_v38 = vmul.f32 %v6309_v16, %v6373_v1 }
  0x64   : > { %v811_v39 = vmul.f32 %v6314_v17, %v6373_v1  ;;  %v812_v40 = vmul.f32 %v6323_v28, %v6373_v1  ;;  %v813_v41 = vmul.f32 %v6328_v29, %v6373_v1  ;;  %v814_v42 = vmul.f32 %v6333_v30, %v6373_v1 }
  0x65   : > { %v815_v61 = vmul.f32 %v6338_v35, %v6373_v1  ;;  %v816_v0 = vmul.f32 %v6343_v36, %v6373_v1  ;;  %v817_v53 = vmul.f32 %v6368_v45, %v6373_v1  ;;  %v829_v2 = vrot.slane %v807_v3, 3 }
  0x66   : > { %v830_v54 = vrot.slane %v808_v57, 3  ;;  %v832_v55 = vrot.slane %v809_v23, 3  ;;  %v834_v56 = vrot.slane %v810_v38, 3  ;;  %v836_v26 = vrot.slane %v811_v39, 3 }
  0x67   : > { %v838_v43 = vrot.slane %v812_v40, 3  ;;  %v840_v44 = vrot.slane %v813_v41, 3  ;;  %v842_v48 = vrot.slane %v814_v42, 3  ;;  %v844_v49 = vrot.slane %v815_v61, 3  ;;  %v6493_v61 = vld [vmem:[%s7769_s0 + $0xb0] sm:$0xff] }
  0x68   : > { %v831_v50 = vsel %vm533_vm2, %v829_v2, %v830_v54  ;;  %v833_v51 = vsel %vm533_vm2, %v830_v54, %v832_v55  ;;  %v835_v4 = vsel %vm533_vm2, %v832_v55, %v834_v56  ;;  %v837_v6 = vsel %vm533_vm2, %v834_v56, %v836_v26  ;;  %v6498_v55 = vld [vmem:[%s7769_s0 + $0xb8] sm:$0xff]  ;;  %v6503_v56 = vld [vmem:[%s7769_s0 + $0xc0] sm:$0xff] }
  0x69   : > { %v839_v7 = vsel %vm533_vm2, %v836_v26, %v838_v43  ;;  %v841_v1 = vsel %vm533_vm2, %v838_v43, %v840_v44  ;;  %v843_v58 = vsel %vm533_vm2, %v840_v44, %v842_v48  ;;  %v845_v8 = vsel %vm533_vm2, %v842_v48, %v844_v49  ;;  %v6508_v26 = vld [vmem:[%s7769_s0 + $0xc8] sm:$0xff] }
  0x6a   : > { %v846_v13 = vrot.slane %v816_v0, 3  ;;  %v848_v14 = vrot.slane %v817_v53, 3  ;;  %v860_v19 = vadd.f32 %v831_v50, %v795_v18  ;;  %v861_v24 = vadd.f32 %v833_v51, %v796_v20  ;;  %v6515_v50 = vld [vmem:[%s7769_s0 + $0xd0] sm:$0xff]  ;;  %v6520_v51 = vld [vmem:[%s7769_s0 + $0xd8] sm:$0xff] }
  0x6b   : > { %v862_v59 = vadd.f32 %v835_v4, %v797_v21  ;;  %v863_v62 = vadd.f32 %v837_v6, %v798_v27  ;;  %v864_v63 = vadd.f32 %v839_v7, %v799_v33  ;;  %v865_v52 = vadd.f32 %v841_v1, %v800_v34  ;;  %v6525_v4 = vld [vmem:[%s7769_s0 + $0xe0] sm:$0xff] }
  0x6c   : > { %v847_v9 = vsel %vm533_vm2, %v844_v49, %v846_v13  ;;  %v849_v10 = vsel %vm533_vm2, %v846_v13, %v848_v14  ;;  %v866_v11 = vadd.f32 %v843_v58, %v801_v37  ;;  %v867_v12 = vadd.f32 %v845_v8, %v802_v46  ;;  %v6530_v8 = vld [vmem:[%s7769_s0 + $0xe8] sm:$0xff]  ;;  %v6535_v13 = vld [vmem:[%s7769_s0 + $0xf0] sm:$0xff]  ;;  %v6540_v14 = vld [vmem:[%s7769_s0 + $0xf8] sm:$0xff] }
  0x6d   : > { %v868_v31 = vadd.f32 %v847_v9, %v803_v47  ;;  %v869_v32 = vadd.f32 %v849_v10, %v804_v60  ;;  %v872_v3 = vmul.f32 %v6292_v5, %v6376_v25  ;;  %v873_v57 = vmul.f32 %v6297_v22, %v6376_v25 }
  0x6e   : > { %v874_v18 = vmul.f32 %v6304_v15, %v6376_v25  ;;  %v875_v20 = vmul.f32 %v6309_v16, %v6376_v25  ;;  %v876_v21 = vmul.f32 %v6314_v17, %v6376_v25  ;;  %v877_v27 = vmul.f32 %v6323_v28, %v6376_v25 }
  0x6f   : > { %v878_v5 = vmul.f32 %v6328_v29, %v6376_v25  ;;  %v879_v22 = vmul.f32 %v6333_v30, %v6376_v25  ;;  %v880_v15 = vmul.f32 %v6338_v35, %v6376_v25  ;;  %v881_v16 = vmul.f32 %v6343_v36, %v6376_v25 }
  0x70   : > { %v882_v17 = vmul.f32 %v6368_v45, %v6376_v25  ;;  %v894_v28 = vrot.slane %v872_v3, 4  ;;  %v895_v33 = vrot.slane %v873_v57, 4  ;;  %v897_v34 = vrot.slane %v874_v18, 4 }
  0x71   : > { %v899_v29 = vrot.slane %v875_v20, 4  ;;  %v901_v37 = vrot.slane %v876_v21, 4  ;;  %v903_v46 = vrot.slane %v877_v27, 4  ;;  %v905_v30 = vrot.slane %v878_v5, 4 }
  0x72   : > { %v896_v47 = vsel %vm599_vm3, %v894_v28, %v895_v33  ;;  %v898_v35 = vsel %vm599_vm3, %v895_v33, %v897_v34  ;;  %v907_v60 = vrot.slane %v879_v22, 4  ;;  %v909_v36 = vrot.slane %v880_v15, 4  ;;  %v6563_v15 = vld [vmem:[%s7769_s0 + $0x100] sm:$0xff] }
  0x73   : > { %v900_v23 = vsel %vm599_vm3, %v897_v34, %v899_v29  ;;  %v902_v38 = vsel %vm599_vm3, %v899_v29, %v901_v37  ;;  %v904_v45 = vsel %vm599_vm3, %v901_v37, %v903_v46  ;;  %v906_v25 = vsel %vm599_vm3, %v903_v46, %v905_v30 }
  0x74   : > { %v908_v39 = vsel %vm599_vm3, %v905_v30, %v907_v60  ;;  %v910_v40 = vsel %vm599_vm3, %v907_v60, %v909_v36  ;;  %v911_v41 = vrot.slane %v881_v16, 4  ;;  %v913_v42 = vrot.slane %v882_v17, 4 }
  0x75   : > { %v925_v0 = vadd.f32 %v896_v47, %v860_v19  ;;  %v926_v53 = vadd.f32 %v898_v35, %v861_v24  ;;  %v927_v2 = vadd.f32 %v900_v23, %v862_v59  ;;  %v928_v54 = vadd.f32 %v902_v38, %v863_v62 }
  0x76   : > { %v912_v43 = vsel %vm599_vm3, %v909_v36, %v911_v41  ;;  %v914_v44 = vsel %vm599_vm3, %v911_v41, %v913_v42  ;;  %v929_v48 = vadd.f32 %v904_v45, %v864_v63  ;;  %v930_v49 = vadd.f32 %v906_v25, %v865_v52 }
  0x77   : > { %v931_v6 = vadd.f32 %v908_v39, %v866_v11  ;;  %v932_v7 = vadd.f32 %v910_v40, %v867_v12  ;;  %v933_v1 = vadd.f32 %v912_v43, %v868_v31  ;;  %v934_v58 = vadd.f32 %v914_v44, %v869_v32 }
  0x78   : > { %v948_v19 = vstv %s6456_s30  ;;  %v970_v24 = vstv %s6466_s10  ;;  %v6545_v59 = vstv %s6476_s16  ;;  %v6548_v62 = vstv %s6480_s21  ;;  %s6634_s16 = sld [smem:[#allocation5 + $0x16]] }
  0x79   : > { %v949_v63 = vmul.f32 %v6493_v61, %v948_v19  ;;  %v950_v52 = vmul.f32 %v6498_v55, %v948_v19  ;;  %v951_v9 = vmul.f32 %v6503_v56, %v948_v19  ;;  %v952_v10 = vmul.f32 %v6508_v26, %v948_v19  ;;  %s6642_s21 = sld [smem:[#allocation5 + $0x3]] }
  0x7a   : > { %v953_v11 = vmul.f32 %v6515_v50, %v948_v19  ;;  %v954_v12 = vmul.f32 %v6520_v51, %v948_v19  ;;  %v955_v31 = vmul.f32 %v6525_v4, %v948_v19  ;;  %v956_v32 = vmul.f32 %v6530_v8, %v948_v19  ;;  %s7007_s30 = sld [smem:[#allocation4]] }
  0x7b   : > { %v957_v3 = vmul.f32 %v6535_v13, %v948_v19  ;;  %v958_v57 = vmul.f32 %v6540_v14, %v948_v19  ;;  %v959_v18 = vadd.f32 %v949_v63, %v925_v0  ;;  %v960_v20 = vadd.f32 %v950_v52, %v926_v53 }
  0x7c   : > { %v961_v21 = vadd.f32 %v951_v9, %v927_v2  ;;  %v962_v27 = vadd.f32 %v952_v10, %v928_v54  ;;  %v963_v5 = vadd.f32 %v953_v11, %v929_v48  ;;  %v964_v22 = vadd.f32 %v954_v12, %v930_v49 }
  0x7d   : > { %v965_v16 = vadd.f32 %v955_v31, %v931_v6  ;;  %v966_v17 = vadd.f32 %v956_v32, %v932_v7  ;;  %v967_v28 = vadd.f32 %v957_v3, %v933_v1  ;;  %v968_v33 = vadd.f32 %v958_v57, %v934_v58 }
  0x7e   : > { %v971_v34 = vmul.f32 %v6493_v61, %v970_v24  ;;  %v972_v29 = vmul.f32 %v6498_v55, %v970_v24  ;;  %v973_v37 = vmul.f32 %v6503_v56, %v970_v24  ;;  %v974_v46 = vmul.f32 %v6508_v26, %v970_v24 }
  0x7f   : > { %v975_v30 = vmul.f32 %v6515_v50, %v970_v24  ;;  %v976_v47 = vmul.f32 %v6520_v51, %v970_v24  ;;  %v977_v35 = vmul.f32 %v6525_v4, %v970_v24  ;;  %v978_v60 = vmul.f32 %v6530_v8, %v970_v24 }
  0x80   : > { %v979_v36 = vmul.f32 %v6535_v13, %v970_v24  ;;  %v980_v23 = vmul.f32 %v6540_v14, %v970_v24  ;;  %v981_v38 = vmul.f32 %v6563_v15, %v970_v24  ;;  %v993_v45 = vrot.slane %v971_v34, 1 }
  0x81   : > { %v994_v25 = vrot.slane %v972_v29, 1  ;;  %v996_v39 = vrot.slane %v973_v37, 1  ;;  %v998_v40 = vrot.slane %v974_v46, 1  ;;  %v1000_v41 = vrot.slane %v975_v30, 1 }
  0x82   : > { %v1002_v42 = vrot.slane %v976_v47, 1  ;;  %v1004_v0 = vrot.slane %v977_v35, 1  ;;  %v1006_v53 = vrot.slane %v978_v60, 1  ;;  %v1008_v2 = vrot.slane %v979_v36, 1 }
  0x83   : > { %v995_v54 = vsel %vm401_vm0, %v993_v45, %v994_v25  ;;  %v997_v43 = vsel %vm401_vm0, %v994_v25, %v996_v39  ;;  %v999_v44 = vsel %vm401_vm0, %v996_v39, %v998_v40  ;;  %v1001_v48 = vsel %vm401_vm0, %v998_v40, %v1000_v41 }
  0x84   : > { %v1003_v49 = vsel %vm401_vm0, %v1000_v41, %v1002_v42  ;;  %v1005_v6 = vsel %vm401_vm0, %v1002_v42, %v1004_v0  ;;  %v1007_v7 = vsel %vm401_vm0, %v1004_v0, %v1006_v53  ;;  %v1009_v1 = vsel %vm401_vm0, %v1006_v53, %v1008_v2 }
  0x85   : > { %v1010_v58 = vrot.slane %v980_v23, 1  ;;  %v1012_v19 = vrot.slane %v981_v38, 1  ;;  %v1024_v24 = vadd.f32 %v995_v54, %v959_v18  ;;  %v1025_v63 = vadd.f32 %v997_v43, %v960_v20 }
  0x86   : > { %v1026_v52 = vadd.f32 %v999_v44, %v961_v21  ;;  %v1027_v9 = vadd.f32 %v1001_v48, %v962_v27  ;;  %v1028_v10 = vadd.f32 %v1003_v49, %v963_v5  ;;  %v1029_v11 = vadd.f32 %v1005_v6, %v964_v22 }
  0x87   : > { %v1011_v12 = vsel %vm401_vm0, %v1008_v2, %v1010_v58  ;;  %v1013_v31 = vsel %vm401_vm0, %v1010_v58, %v1012_v19  ;;  %v1030_v32 = vadd.f32 %v1007_v7, %v965_v16  ;;  %v1031_v3 = vadd.f32 %v1009_v1, %v966_v17 }
  0x88   : > { %v1032_v57 = vadd.f32 %v1011_v12, %v967_v28  ;;  %v1033_v34 = vadd.f32 %v1013_v31, %v968_v33  ;;  %v1036_v29 = vmul.f32 %v6493_v61, %v6545_v59  ;;  %v1037_v37 = vmul.f32 %v6498_v55, %v6545_v59 }
  0x89   : > { %v1038_v18 = vmul.f32 %v6503_v56, %v6545_v59  ;;  %v1039_v20 = vmul.f32 %v6508_v26, %v6545_v59  ;;  %v1040_v21 = vmul.f32 %v6515_v50, %v6545_v59  ;;  %v1041_v27 = vmul.f32 %v6520_v51, %v6545_v59 }
  0x8a   : > { %v1042_v5 = vmul.f32 %v6525_v4, %v6545_v59  ;;  %v1043_v22 = vmul.f32 %v6530_v8, %v6545_v59  ;;  %v1044_v16 = vmul.f32 %v6535_v13, %v6545_v59  ;;  %v1045_v17 = vmul.f32 %v6540_v14, %v6545_v59 }
  0x8b   : > { %v1046_v28 = vmul.f32 %v6563_v15, %v6545_v59  ;;  %v1058_v33 = vrot.slane %v1036_v29, 2  ;;  %v1059_v46 = vrot.slane %v1037_v37, 2  ;;  %v1061_v30 = vrot.slane %v1038_v18, 2 }
  0x8c   : > { %v1063_v47 = vrot.slane %v1039_v20, 2  ;;  %v1065_v35 = vrot.slane %v1040_v21, 2  ;;  %v1067_v60 = vrot.slane %v1041_v27, 2  ;;  %v1069_v36 = vrot.slane %v1042_v5, 2 }
  0x8d   : > { %v1060_v23 = vsel %vm467_vm1, %v1058_v33, %v1059_v46  ;;  %v1062_v38 = vsel %vm467_vm1, %v1059_v46, %v1061_v30  ;;  %v1071_v45 = vrot.slane %v1043_v22, 2  ;;  %v1073_v25 = vrot.slane %v1044_v16, 2 }
  0x8e   : > { %v1064_v39 = vsel %vm467_vm1, %v1061_v30, %v1063_v47  ;;  %v1066_v40 = vsel %vm467_vm1, %v1063_v47, %v1065_v35  ;;  %v1068_v41 = vsel %vm467_vm1, %v1065_v35, %v1067_v60  ;;  %v1070_v59 = vsel %vm467_vm1, %v1067_v60, %v1069_v36 }
  0x8f   : > { %v1072_v42 = vsel %vm467_vm1, %v1069_v36, %v1071_v45  ;;  %v1074_v0 = vsel %vm467_vm1, %v1071_v45, %v1073_v25  ;;  %v1075_v53 = vrot.slane %v1045_v17, 2  ;;  %v1077_v2 = vrot.slane %v1046_v28, 2 }
  0x90   : > { %v1089_v54 = vadd.f32 %v1060_v23, %v1024_v24  ;;  %v1090_v43 = vadd.f32 %v1062_v38, %v1025_v63  ;;  %v1091_v44 = vadd.f32 %v1064_v39, %v1026_v52  ;;  %v1092_v48 = vadd.f32 %v1066_v40, %v1027_v9 }
  0x91   : > { %v1076_v49 = vsel %vm467_vm1, %v1073_v25, %v1075_v53  ;;  %v1078_v6 = vsel %vm467_vm1, %v1075_v53, %v1077_v2  ;;  %v1093_v7 = vadd.f32 %v1068_v41, %v1028_v10  ;;  %v1094_v1 = vadd.f32 %v1070_v59, %v1029_v11 }
  0x92   : > { %v1095_v58 = vadd.f32 %v1072_v42, %v1030_v32  ;;  %v1096_v19 = vadd.f32 %v1074_v0, %v1031_v3  ;;  %v1097_v12 = vadd.f32 %v1076_v49, %v1032_v57  ;;  %v1098_v31 = vadd.f32 %v1078_v6, %v1033_v34 }
  0x93   : > { %v1101_v29 = vmul.f32 %v6493_v61, %v6548_v62  ;;  %v1102_v37 = vmul.f32 %v6498_v55, %v6548_v62  ;;  %v1103_v24 = vmul.f32 %v6503_v56, %v6548_v62  ;;  %v1104_v63 = vmul.f32 %v6508_v26, %v6548_v62 }
  0x94   : > { %v1105_v52 = vmul.f32 %v6515_v50, %v6548_v62  ;;  %v1106_v9 = vmul.f32 %v6520_v51, %v6548_v62  ;;  %v1107_v10 = vmul.f32 %v6525_v4, %v6548_v62  ;;  %v1108_v11 = vmul.f32 %v6530_v8, %v6548_v62 }
  0x95   : > { %v1109_v32 = vmul.f32 %v6535_v13, %v6548_v62  ;;  %v1110_v3 = vmul.f32 %v6540_v14, %v6548_v62  ;;  %v1111_v57 = vmul.f32 %v6563_v15, %v6548_v62  ;;  %v1123_v34 = vrot.slane %v1101_v29, 3 }
  0x96   : > { %v1124_v18 = vrot.slane %v1102_v37, 3  ;;  %v1126_v20 = vrot.slane %v1103_v24, 3  ;;  %v1128_v21 = vrot.slane %v1104_v63, 3  ;;  %v1130_v27 = vrot.slane %v1105_v52, 3 }
  0x97   : > { %v1132_v5 = vrot.slane %v1106_v9, 3  ;;  %v1134_v22 = vrot.slane %v1107_v10, 3  ;;  %v1136_v16 = vrot.slane %v1108_v11, 3  ;;  %v1138_v17 = vrot.slane %v1109_v32, 3  ;;  %v6682_v32 = vld [vmem:[%s7769_s0 + $0x108] sm:$0xff] }
  0x98   : > { %v1125_v28 = vsel %vm533_vm2, %v1123_v34, %v1124_v18  ;;  %v1127_v33 = vsel %vm533_vm2, %v1124_v18, %v1126_v20  ;;  %v1129_v46 = vsel %vm533_vm2, %v1126_v20, %v1128_v21  ;;  %v1131_v30 = vsel %vm533_vm2, %v1128_v21, %v1130_v27  ;;  %v6689_v20 = vld [vmem:[%s7769_s0 + $0x110] sm:$0xff]  ;;  %v6694_v21 = vld [vmem:[%s7769_s0 + $0x118] sm:$0xff] }
  0x99   : > { %v1133_v62 = vsel %vm533_vm2, %v1130_v27, %v1132_v5  ;;  %v1135_v47 = vsel %vm533_vm2, %v1132_v5, %v1134_v22  ;;  %v1137_v35 = vsel %vm533_vm2, %v1134_v22, %v1136_v16  ;;  %v1139_v60 = vsel %vm533_vm2, %v1136_v16, %v1138_v17  ;;  %v6699_v27 = vld [vmem:[%s7769_s0 + $0x120] sm:$0xff] }
  0x9a   : > { %v1140_v36 = vrot.slane %v1110_v3, 3  ;;  %v1142_v23 = vrot.slane %v1111_v57, 3  ;;  %v1154_v38 = vadd.f32 %v1125_v28, %v1089_v54  ;;  %v1155_v45 = vadd.f32 %v1127_v33, %v1090_v43  ;;  %v6704_v28 = vld [vmem:[%s7769_s0 + $0x128] sm:$0xff]  ;;  %v6709_v33 = vld [vmem:[%s7769_s0 + $0x130] sm:$0xff] }
  0x9b   : > { %v1156_v25 = vadd.f32 %v1129_v46, %v1091_v44  ;;  %v1157_v39 = vadd.f32 %v1131_v30, %v1092_v48  ;;  %v1158_v40 = vadd.f32 %v1133_v62, %v1093_v7  ;;  %v1159_v41 = vadd.f32 %v1135_v47, %v1094_v1  ;;  %v6714_v46 = vld [vmem:[%s7769_s0 + $0x138] sm:$0xff] }
  0x9c   : > { %v1141_v59 = vsel %vm533_vm2, %v1138_v17, %v1140_v36  ;;  %v1143_v42 = vsel %vm533_vm2, %v1140_v36, %v1142_v23  ;;  %v1160_v0 = vadd.f32 %v1137_v35, %v1095_v58  ;;  %v1161_v53 = vadd.f32 %v1139_v60, %v1096_v19  ;;  %v6721_v60 = vld [vmem:[%s7769_s0 + $0x140] sm:$0xff]  ;;  %v6726_v36 = vld [vmem:[%s7769_s0 + $0x148] sm:$0xff]  ;;  %v6731_v23 = vld [vmem:[%s7769_s0 + $0x150] sm:$0xff] }
  0x9d   : > { %v1162_v2 = vadd.f32 %v1141_v59, %v1097_v12  ;;  %v1163_v49 = vadd.f32 %v1143_v42, %v1098_v31  ;;  %v1165_v6 = vstv %s6634_s16  ;;  %v6656_v29 = vstv %s6642_s21 }
  0x9e   : > { %v1166_v37 = vmul.f32 %v6493_v61, %v1165_v6  ;;  %v1167_v54 = vmul.f32 %v6498_v55, %v1165_v6  ;;  %v1168_v43 = vmul.f32 %v6503_v56, %v1165_v6  ;;  %v1169_v44 = vmul.f32 %v6508_v26, %v1165_v6 }
  0x9f   : > { %v1170_v48 = vmul.f32 %v6515_v50, %v1165_v6  ;;  %v1171_v7 = vmul.f32 %v6520_v51, %v1165_v6  ;;  %v1172_v1 = vmul.f32 %v6525_v4, %v1165_v6  ;;  %v1173_v58 = vmul.f32 %v6530_v8, %v1165_v6 }
  0xa0   : > { %v1174_v19 = vmul.f32 %v6535_v13, %v1165_v6  ;;  %v1175_v12 = vmul.f32 %v6540_v14, %v1165_v6  ;;  %v1176_v61 = vmul.f32 %v6563_v15, %v1165_v6  ;;  %v1188_v31 = vrot.slane %v1166_v37, 4 }
  0xa1   : > { %v1189_v55 = vrot.slane %v1167_v54, 4  ;;  %v1191_v24 = vrot.slane %v1168_v43, 4  ;;  %v1193_v56 = vrot.slane %v1169_v44, 4  ;;  %v1195_v63 = vrot.slane %v1170_v48, 4 }
  0xa2   : > { %v1197_v26 = vrot.slane %v1171_v7, 4  ;;  %v1199_v52 = vrot.slane %v1172_v1, 4  ;;  %v1201_v50 = vrot.slane %v1173_v58, 4  ;;  %v1203_v9 = vrot.slane %v1174_v19, 4  ;;  %v6756_v58 = vld [vmem:[%s7769_s0 + $0x158] sm:$0xff] }
  0xa3   : > { %v1190_v51 = vsel %vm599_vm3, %v1188_v31, %v1189_v55  ;;  %v1192_v4 = vsel %vm599_vm3, %v1189_v55, %v1191_v24  ;;  %v1194_v8 = vsel %vm599_vm3, %v1191_v24, %v1193_v56  ;;  %v1196_v13 = vsel %vm599_vm3, %v1193_v56, %v1195_v63 }
  0xa4   : > { %v1198_v14 = vsel %vm599_vm3, %v1195_v63, %v1197_v26  ;;  %v1200_v15 = vsel %vm599_vm3, %v1197_v26, %v1199_v52  ;;  %v1202_v10 = vsel %vm599_vm3, %v1199_v52, %v1201_v50  ;;  %v1204_v11 = vsel %vm599_vm3, %v1201_v50, %v1203_v9 }
  0xa5   : > { %v1205_v3 = vrot.slane %v1175_v12, 4  ;;  %v1207_v57 = vrot.slane %v1176_v61, 4  ;;  %v1219_v34 = vadd.f32 %v1190_v51, %v1154_v38  ;;  %v1220_v18 = vadd.f32 %v1192_v4, %v1155_v45 }
  0xa6   : > { %v1221_v5 = vadd.f32 %v1194_v8, %v1156_v25  ;;  %v1222_v22 = vadd.f32 %v1196_v13, %v1157_v39  ;;  %v1223_v16 = vadd.f32 %v1198_v14, %v1158_v40  ;;  %v1224_v17 = vadd.f32 %v1200_v15, %v1159_v41 }
  0xa7   : > { %v1206_v30 = vsel %vm599_vm3, %v1203_v9, %v1205_v3  ;;  %v1208_v62 = vsel %vm599_vm3, %v1205_v3, %v1207_v57  ;;  %v1225_v47 = vadd.f32 %v1202_v10, %v1160_v0  ;;  %v1226_v35 = vadd.f32 %v1204_v11, %v1161_v53 }
  0xa8   : > { %v1227_v38 = vadd.f32 %v1206_v30, %v1162_v2  ;;  %v1228_v45 = vadd.f32 %v1208_v62, %v1163_v49  ;;  %v1243_v25 = vmul.f32 %v6682_v32, %v6656_v29  ;;  %v1244_v39 = vmul.f32 %v6689_v20, %v6656_v29 }
  0xa9   : > { %v1245_v40 = vmul.f32 %v6694_v21, %v6656_v29  ;;  %v1246_v41 = vmul.f32 %v6699_v27, %v6656_v29  ;;  %v1247_v59 = vmul.f32 %v6704_v28, %v6656_v29  ;;  %v1248_v42 = vmul.f32 %v6709_v33, %v6656_v29 }
  0xaa   : > { %v1249_v0 = vmul.f32 %v6714_v46, %v6656_v29  ;;  %v1250_v53 = vmul.f32 %v6721_v60, %v6656_v29  ;;  %v1251_v2 = vmul.f32 %v6726_v36, %v6656_v29  ;;  %v1252_v49 = vmul.f32 %v6731_v23, %v6656_v29 }
  0xab   : > { %v1253_v6 = vadd.f32 %v1243_v25, %v1219_v34  ;;  %v1254_v37 = vadd.f32 %v1244_v39, %v1220_v18  ;;  %v1255_v54 = vadd.f32 %v1245_v40, %v1221_v5  ;;  %v1256_v43 = vadd.f32 %v1246_v41, %v1222_v22 }
  0xac   : > { %v1257_v44 = vadd.f32 %v1247_v59, %v1223_v16  ;;  %v1258_v48 = vadd.f32 %v1248_v42, %v1224_v17  ;;  %v1259_v7 = vadd.f32 %v1249_v0, %v1225_v47  ;;  %v1260_v1 = vadd.f32 %v1250_v53, %v1226_v35 }
  0xad   : > { %v1261_v19 = vadd.f32 %v1251_v2, %v1227_v38  ;;  %v1262_v12 = vadd.f32 %v1252_v49, %v1228_v45  ;;  %v1264_v61 = vstv %s6673_s22  ;;  %v1329_v31 = vstv %s6684_s2  ;;  %s6783_s22 = sld [smem:[#allocation5 + $0x12]] }
  0xae   : > { %v1265_v55 = vmul.f32 %v6682_v32, %v1264_v61  ;;  %v1266_v29 = vmul.f32 %v6689_v20, %v1264_v61  ;;  %v1267_v24 = vmul.f32 %v6694_v21, %v1264_v61  ;;  %v1268_v56 = vmul.f32 %v6699_v27, %v1264_v61  ;;  %s6789_s2 = sld [smem:[#allocation5 + $0x17]] }
  0xaf   : > { %v1269_v63 = vmul.f32 %v6704_v28, %v1264_v61  ;;  %v1270_v26 = vmul.f32 %v6709_v33, %v1264_v61  ;;  %v1271_v52 = vmul.f32 %v6714_v46, %v1264_v61  ;;  %v1272_v50 = vmul.f32 %v6721_v60, %v1264_v61 }
  0xb0   : > { %v1273_v9 = vmul.f32 %v6726_v36, %v1264_v61  ;;  %v1274_v51 = vmul.f32 %v6731_v23, %v1264_v61  ;;  %v1275_v4 = vmul.f32 %v6756_v58, %v1264_v61  ;;  %v1287_v8 = vrot.slane %v1265_v55, 1 }
  0xb1   : > { %v1288_v13 = vrot.slane %v1266_v29, 1  ;;  %v1290_v14 = vrot.slane %v1267_v24, 1  ;;  %v1292_v15 = vrot.slane %v1268_v56, 1  ;;  %v1294_v10 = vrot.slane %v1269_v63, 1 }
  0xb2   : > { %v1296_v11 = vrot.slane %v1270_v26, 1  ;;  %v1298_v3 = vrot.slane %v1271_v52, 1  ;;  %v1300_v57 = vrot.slane %v1272_v50, 1  ;;  %v1302_v34 = vrot.slane %v1273_v9, 1 }
  0xb3   : > { %v1289_v18 = vsel %vm401_vm0, %v1287_v8, %v1288_v13  ;;  %v1291_v5 = vsel %vm401_vm0, %v1288_v13, %v1290_v14  ;;  %v1293_v22 = vsel %vm401_vm0, %v1290_v14, %v1292_v15  ;;  %v1295_v16 = vsel %vm401_vm0, %v1292_v15, %v1294_v10 }
  0xb4   : > { %v1297_v17 = vsel %vm401_vm0, %v1294_v10, %v1296_v11  ;;  %v1299_v30 = vsel %vm401_vm0, %v1296_v11, %v1298_v3  ;;  %v1301_v62 = vsel %vm401_vm0, %v1298_v3, %v1300_v57  ;;  %v1303_v47 = vsel %vm401_vm0, %v1300_v57, %v1302_v34 }
  0xb5   : > { %v1304_v35 = vrot.slane %v1274_v51, 1  ;;  %v1306_v38 = vrot.slane %v1275_v4, 1  ;;  %v1318_v45 = vadd.f32 %v1289_v18, %v1253_v6  ;;  %v1319_v25 = vadd.f32 %v1291_v5, %v1254_v37 }
  0xb6   : > { %v1320_v39 = vadd.f32 %v1293_v22, %v1255_v54  ;;  %v1321_v40 = vadd.f32 %v1295_v16, %v1256_v43  ;;  %v1322_v41 = vadd.f32 %v1297_v17, %v1257_v44  ;;  %v1323_v59 = vadd.f32 %v1299_v30, %v1258_v48 }
  0xb7   : > { %v1305_v42 = vsel %vm401_vm0, %v1302_v34, %v1304_v35  ;;  %v1307_v0 = vsel %vm401_vm0, %v1304_v35, %v1306_v38  ;;  %v1324_v53 = vadd.f32 %v1301_v62, %v1259_v7  ;;  %v1325_v2 = vadd.f32 %v1303_v47, %v1260_v1 }
  0xb8   : > { %v1326_v49 = vadd.f32 %v1305_v42, %v1261_v19  ;;  %v1327_v61 = vadd.f32 %v1307_v0, %v1262_v12  ;;  %v1330_v55 = vmul.f32 %v6682_v32, %v1329_v31  ;;  %v1331_v29 = vmul.f32 %v6689_v20, %v1329_v31 }
  0xb9   : > { %v1332_v6 = vmul.f32 %v6694_v21, %v1329_v31  ;;  %v1333_v37 = vmul.f32 %v6699_v27, %v1329_v31  ;;  %v1334_v54 = vmul.f32 %v6704_v28, %v1329_v31  ;;  %v1335_v43 = vmul.f32 %v6709_v33, %v1329_v31 }
  0xba   : > { %v1336_v44 = vmul.f32 %v6714_v46, %v1329_v31  ;;  %v1337_v48 = vmul.f32 %v6721_v60, %v1329_v31  ;;  %v1338_v7 = vmul.f32 %v6726_v36, %v1329_v31  ;;  %v1339_v1 = vmul.f32 %v6731_v23, %v1329_v31 }
  0xbb   : > { %v1340_v19 = vmul.f32 %v6756_v58, %v1329_v31  ;;  %v1352_v12 = vrot.slane %v1330_v55, 2  ;;  %v1353_v24 = vrot.slane %v1331_v29, 2  ;;  %v1355_v56 = vrot.slane %v1332_v6, 2 }
  0xbc   : > { %v1357_v63 = vrot.slane %v1333_v37, 2  ;;  %v1359_v26 = vrot.slane %v1334_v54, 2  ;;  %v1361_v52 = vrot.slane %v1335_v43, 2  ;;  %v1363_v50 = vrot.slane %v1336_v44, 2 }
  0xbd   : > { %v1354_v9 = vsel %vm467_vm1, %v1352_v12, %v1353_v24  ;;  %v1356_v51 = vsel %vm467_vm1, %v1353_v24, %v1355_v56  ;;  %v1365_v4 = vrot.slane %v1337_v48, 2  ;;  %v1367_v8 = vrot.slane %v1338_v7, 2 }
  0xbe   : > { %v1358_v13 = vsel %vm467_vm1, %v1355_v56, %v1357_v63  ;;  %v1360_v14 = vsel %vm467_vm1, %v1357_v63, %v1359_v26  ;;  %v1362_v31 = vsel %vm467_vm1, %v1359_v26, %v1361_v52  ;;  %v1364_v15 = vsel %vm467_vm1, %v1361_v52, %v1363_v50 }
  0xbf   : > { %v1366_v10 = vsel %vm467_vm1, %v1363_v50, %v1365_v4  ;;  %v1368_v11 = vsel %vm467_vm1, %v1365_v4, %v1367_v8  ;;  %v1369_v3 = vrot.slane %v1339_v1, 2  ;;  %v1371_v57 = vrot.slane %v1340_v19, 2 }
  0xc0   : > { %v1383_v34 = vadd.f32 %v1354_v9, %v1318_v45  ;;  %v1384_v18 = vadd.f32 %v1356_v51, %v1319_v25  ;;  %v1385_v5 = vadd.f32 %v1358_v13, %v1320_v39  ;;  %v1386_v22 = vadd.f32 %v1360_v14, %v1321_v40 }
  0xc1   : > { %v1370_v16 = vsel %vm467_vm1, %v1367_v8, %v1369_v3  ;;  %v1372_v17 = vsel %vm467_vm1, %v1369_v3, %v1371_v57  ;;  %v1387_v30 = vadd.f32 %v1362_v31, %v1322_v41  ;;  %v1388_v62 = vadd.f32 %v1364_v15, %v1323_v59 }
  0xc2   : > { %v1389_v47 = vadd.f32 %v1366_v10, %v1324_v53  ;;  %v1390_v35 = vadd.f32 %v1368_v11, %v1325_v2  ;;  %v1391_v38 = vadd.f32 %v1370_v16, %v1326_v49  ;;  %v1392_v42 = vadd.f32 %v1372_v17, %v1327_v61 }
  0xc3   : > { %v1394_v0 = vstv %s6783_s22  ;;  %v1459_v55 = vstv %s6789_s2  ;;  %v6813_v29 = vstv %s6795_s17  ;;  %v6816_v6 = vstv %s6798_s18 }
  0xc4   : > { %v1395_v45 = vmul.f32 %v6682_v32, %v1394_v0  ;;  %v1396_v25 = vmul.f32 %v6689_v20, %v1394_v0  ;;  %v1397_v39 = vmul.f32 %v6694_v21, %v1394_v0  ;;  %v1398_v40 = vmul.f32 %v6699_v27, %v1394_v0 }
  0xc5   : > { %v1399_v41 = vmul.f32 %v6704_v28, %v1394_v0  ;;  %v1400_v59 = vmul.f32 %v6709_v33, %v1394_v0  ;;  %v1401_v53 = vmul.f32 %v6714_v46, %v1394_v0  ;;  %v1402_v2 = vmul.f32 %v6721_v60, %v1394_v0 }
  0xc6   : > { %v1403_v49 = vmul.f32 %v6726_v36, %v1394_v0  ;;  %v1404_v61 = vmul.f32 %v6731_v23, %v1394_v0  ;;  %v1405_v37 = vmul.f32 %v6756_v58, %v1394_v0  ;;  %v1417_v54 = vrot.slane %v1395_v45, 3 }
  0xc7   : > { %v1418_v43 = vrot.slane %v1396_v25, 3  ;;  %v1420_v44 = vrot.slane %v1397_v39, 3  ;;  %v1422_v48 = vrot.slane %v1398_v40, 3  ;;  %v1424_v7 = vrot.slane %v1399_v41, 3 }
  0xc8   : > { %v1426_v1 = vrot.slane %v1400_v59, 3  ;;  %v1428_v19 = vrot.slane %v1401_v53, 3  ;;  %v1430_v12 = vrot.slane %v1402_v2, 3  ;;  %v1432_v24 = vrot.slane %v1403_v49, 3 }
  0xc9   : > { %v1419_v56 = vsel %vm533_vm2, %v1417_v54, %v1418_v43  ;;  %v1421_v63 = vsel %vm533_vm2, %v1418_v43, %v1420_v44  ;;  %v1423_v26 = vsel %vm533_vm2, %v1420_v44, %v1422_v48  ;;  %v1425_v52 = vsel %vm533_vm2, %v1422_v48, %v1424_v7  ;;  %v6866_v54 = vld [vmem:[%s7769_s0 + $0x168] sm:$0xff] }
  0xca   : > { %v1427_v50 = vsel %vm533_vm2, %v1424_v7, %v1426_v1  ;;  %v1429_v9 = vsel %vm533_vm2, %v1426_v1, %v1428_v19  ;;  %v1431_v51 = vsel %vm533_vm2, %v1428_v19, %v1430_v12  ;;  %v1433_v4 = vsel %vm533_vm2, %v1430_v12, %v1432_v24  ;;  %v6871_v1 = vld [vmem:[%s7769_s0 + $0x170] sm:$0xff]  ;;  %v6876_v19 = vld [vmem:[%s7769_s0 + $0x178] sm:$0xff]  ;;  %v6881_v12 = vld [vmem:[%s7769_s0 + $0x180] sm:$0xff] }
  0xcb   : > { %v1434_v8 = vrot.slane %v1404_v61, 3  ;;  %v1436_v13 = vrot.slane %v1405_v37, 3  ;;  %v1448_v14 = vadd.f32 %v1419_v56, %v1383_v34  ;;  %v1449_v31 = vadd.f32 %v1421_v63, %v1384_v18  ;;  %v6861_v37 = vld [vmem:[%s7769_s0 + $0x160] sm:$0xff] }
  0xcc   : > { %v1450_v15 = vadd.f32 %v1423_v26, %v1385_v5  ;;  %v1451_v10 = vadd.f32 %v1425_v52, %v1386_v22  ;;  %v1452_v11 = vadd.f32 %v1427_v50, %v1387_v30  ;;  %v1453_v3 = vadd.f32 %v1429_v9, %v1388_v62  ;;  %v6888_v52 = vld [vmem:[%s7769_s0 + $0x188] sm:$0xff]  ;;  %v6893_v50 = vld [vmem:[%s7769_s0 + $0x190] sm:$0xff]  ;;  %v6898_v9 = vld [vmem:[%s7769_s0 + $0x198] sm:$0xff] }
  0xcd   : > { %v1435_v57 = vsel %vm533_vm2, %v1432_v24, %v1434_v8  ;;  %v1437_v16 = vsel %vm533_vm2, %v1434_v8, %v1436_v13  ;;  %v1454_v17 = vadd.f32 %v1431_v51, %v1389_v47  ;;  %v1455_v0 = vadd.f32 %v1433_v4, %v1390_v35 }
  0xce   : > { %v1456_v45 = vadd.f32 %v1435_v57, %v1391_v38  ;;  %v1457_v25 = vadd.f32 %v1437_v16, %v1392_v42  ;;  %v1460_v39 = vmul.f32 %v6682_v32, %v1459_v55  ;;  %v1461_v40 = vmul.f32 %v6689_v20, %v1459_v55 }
  0xcf   : > { %v1462_v41 = vmul.f32 %v6694_v21, %v1459_v55  ;;  %v1463_v34 = vmul.f32 %v6699_v27, %v1459_v55  ;;  %v1464_v18 = vmul.f32 %v6704_v28, %v1459_v55  ;;  %v1465_v5 = vmul.f32 %v6709_v33, %v1459_v55 }
  0xd0   : > { %v1466_v22 = vmul.f32 %v6714_v46, %v1459_v55  ;;  %v1467_v30 = vmul.f32 %v6721_v60, %v1459_v55  ;;  %v1468_v62 = vmul.f32 %v6726_v36, %v1459_v55  ;;  %v1469_v47 = vmul.f32 %v6731_v23, %v1459_v55 }
  0xd1   : > { %v1470_v32 = vmul.f32 %v6756_v58, %v1459_v55  ;;  %v1482_v35 = vrot.slane %v1460_v39, 4  ;;  %v1483_v20 = vrot.slane %v1461_v40, 4  ;;  %v1485_v38 = vrot.slane %v1462_v41, 4 }
  0xd2   : > { %v1487_v21 = vrot.slane %v1463_v34, 4  ;;  %v1489_v42 = vrot.slane %v1464_v18, 4  ;;  %v1491_v27 = vrot.slane %v1465_v5, 4  ;;  %v1493_v59 = vrot.slane %v1466_v22, 4  ;;  %v6933_v22 = vld [vmem:[%s7769_s0 + $0x1b0] sm:$0xff] }
  0xd3   : > { %v1484_v28 = vsel %vm599_vm3, %v1482_v35, %v1483_v20  ;;  %v1486_v33 = vsel %vm599_vm3, %v1483_v20, %v1485_v38  ;;  %v1495_v46 = vrot.slane %v1467_v30, 4  ;;  %v1497_v53 = vrot.slane %v1468_v62, 4 }
  0xd4   : > { %v1488_v60 = vsel %vm599_vm3, %v1485_v38, %v1487_v21  ;;  %v1490_v36 = vsel %vm599_vm3, %v1487_v21, %v1489_v42  ;;  %v1492_v23 = vsel %vm599_vm3, %v1489_v42, %v1491_v27  ;;  %v1494_v58 = vsel %vm599_vm3, %v1491_v27, %v1493_v59 }
  0xd5   : > { %v1496_v55 = vsel %vm599_vm3, %v1493_v59, %v1495_v46  ;;  %v1498_v2 = vsel %vm599_vm3, %v1495_v46, %v1497_v53  ;;  %v1499_v49 = vrot.slane %v1469_v47, 4  ;;  %v1501_v61 = vrot.slane %v1470_v32, 4 }
  0xd6   : > { %v1513_v43 = vadd.f32 %v1484_v28, %v1448_v14  ;;  %v1514_v44 = vadd.f32 %v1486_v33, %v1449_v31  ;;  %v1515_v48 = vadd.f32 %v1488_v60, %v1450_v15  ;;  %v1516_v7 = vadd.f32 %v1490_v36, %v1451_v10  ;;  %v6903_v14 = vld [vmem:[%s7769_s0 + $0x1a0] sm:$0xff]  ;;  %v6908_v31 = vld [vmem:[%s7769_s0 + $0x1a8] sm:$0xff] }
  0xd7   : > { %v1500_v24 = vsel %vm599_vm3, %v1497_v53, %v1499_v49  ;;  %v1502_v56 = vsel %vm599_vm3, %v1499_v49, %v1501_v61  ;;  %v1517_v63 = vadd.f32 %v1492_v23, %v1452_v11  ;;  %v1518_v26 = vadd.f32 %v1494_v58, %v1453_v3 }
  0xd8   : > { %v1519_v51 = vadd.f32 %v1496_v55, %v1454_v17  ;;  %v1520_v4 = vadd.f32 %v1498_v2, %v1455_v0  ;;  %v1521_v8 = vadd.f32 %v1500_v24, %v1456_v45  ;;  %v1522_v13 = vadd.f32 %v1502_v56, %v1457_v25 }
  0xd9   : > { %v1537_v15 = vmul.f32 %v6861_v37, %v6813_v29  ;;  %v1538_v10 = vmul.f32 %v6866_v54, %v6813_v29  ;;  %v1539_v11 = vmul.f32 %v6871_v1, %v6813_v29  ;;  %v1540_v3 = vmul.f32 %v6876_v19, %v6813_v29 }
  0xda   : > { %v1541_v57 = vmul.f32 %v6881_v12, %v6813_v29  ;;  %v1542_v16 = vmul.f32 %v6888_v52, %v6813_v29  ;;  %v1543_v17 = vmul.f32 %v6893_v50, %v6813_v29  ;;  %v1544_v0 = vmul.f32 %v6898_v9, %v6813_v29 }
  0xdb   : > { %v1545_v45 = vmul.f32 %v6903_v14, %v6813_v29  ;;  %v1546_v25 = vmul.f32 %v6908_v31, %v6813_v29  ;;  %v1547_v39 = vadd.f32 %v1537_v15, %v1513_v43  ;;  %v1548_v40 = vadd.f32 %v1538_v10, %v1514_v44 }
  0xdc   : > { %v1549_v41 = vadd.f32 %v1539_v11, %v1515_v48  ;;  %v1550_v34 = vadd.f32 %v1540_v3, %v1516_v7  ;;  %v1551_v18 = vadd.f32 %v1541_v57, %v1517_v63  ;;  %v1552_v5 = vadd.f32 %v1542_v16, %v1518_v26 }
  0xdd   : > { %v1553_v30 = vadd.f32 %v1543_v17, %v1519_v51  ;;  %v1554_v62 = vadd.f32 %v1544_v0, %v1520_v4  ;;  %v1555_v47 = vadd.f32 %v1545_v45, %v1521_v8  ;;  %v1556_v32 = vadd.f32 %v1546_v25, %v1522_v13 }
  0xde   : > { %v1559_v35 = vmul.f32 %v6861_v37, %v6816_v6  ;;  %v1560_v29 = vmul.f32 %v6866_v54, %v6816_v6  ;;  %v1561_v20 = vmul.f32 %v6871_v1, %v6816_v6  ;;  %v1562_v38 = vmul.f32 %v6876_v19, %v6816_v6 }
  0xdf   : > { %v1563_v21 = vmul.f32 %v6881_v12, %v6816_v6  ;;  %v1564_v42 = vmul.f32 %v6888_v52, %v6816_v6  ;;  %v1565_v27 = vmul.f32 %v6893_v50, %v6816_v6  ;;  %v1566_v59 = vmul.f32 %v6898_v9, %v6816_v6 }
  0xe0   : > { %v1567_v28 = vmul.f32 %v6903_v14, %v6816_v6  ;;  %v1568_v33 = vmul.f32 %v6908_v31, %v6816_v6  ;;  %v1569_v46 = vmul.f32 %v6933_v22, %v6816_v6  ;;  %v1581_v53 = vrot.slane %v1559_v35, 1 }
  0xe1   : > { %v1582_v60 = vrot.slane %v1560_v29, 1  ;;  %v1584_v36 = vrot.slane %v1561_v20, 1  ;;  %v1586_v23 = vrot.slane %v1562_v38, 1  ;;  %v1588_v58 = vrot.slane %v1563_v21, 1 }
  0xe2   : > { %v1590_v55 = vrot.slane %v1564_v42, 1  ;;  %v1592_v2 = vrot.slane %v1565_v27, 1  ;;  %v1594_v49 = vrot.slane %v1566_v59, 1  ;;  %v1596_v61 = vrot.slane %v1567_v28, 1 }
  0xe3   : > { %v1583_v43 = vsel %vm401_vm0, %v1581_v53, %v1582_v60  ;;  %v1585_v44 = vsel %vm401_vm0, %v1582_v60, %v1584_v36  ;;  %v1587_v48 = vsel %vm401_vm0, %v1584_v36, %v1586_v23  ;;  %v1589_v7 = vsel %vm401_vm0, %v1586_v23, %v1588_v58 }
  0xe4   : > { %v1591_v6 = vsel %vm401_vm0, %v1588_v58, %v1590_v55  ;;  %v1593_v24 = vsel %vm401_vm0, %v1590_v55, %v1592_v2  ;;  %v1595_v56 = vsel %vm401_vm0, %v1592_v2, %v1594_v49  ;;  %v1597_v63 = vsel %vm401_vm0, %v1594_v49, %v1596_v61 }
  0xe5   : > { %v1598_v26 = vrot.slane %v1568_v33, 1  ;;  %v1600_v51 = vrot.slane %v1569_v46, 1  ;;  %v1612_v4 = vadd.f32 %v1583_v43, %v1547_v39  ;;  %v1613_v8 = vadd.f32 %v1585_v44, %v1548_v40 }
  0xe6   : > { %v1614_v13 = vadd.f32 %v1587_v48, %v1549_v41  ;;  %v1615_v15 = vadd.f32 %v1589_v7, %v1550_v34  ;;  %v1616_v10 = vadd.f32 %v1591_v6, %v1551_v18  ;;  %v1617_v11 = vadd.f32 %v1593_v24, %v1552_v5 }
  0xe7   : > { %v1599_v3 = vsel %vm401_vm0, %v1596_v61, %v1598_v26  ;;  %v1601_v57 = vsel %vm401_vm0, %v1598_v26, %v1600_v51  ;;  %v1618_v16 = vadd.f32 %v1595_v56, %v1553_v30  ;;  %v1619_v17 = vadd.f32 %v1597_v63, %v1554_v62 }
  0xe8   : > { %v1620_v0 = vadd.f32 %v1599_v3, %v1555_v47  ;;  %v1621_v45 = vadd.f32 %v1601_v57, %v1556_v32  ;;  %v1623_v25 = vstv %s6951_s26  ;;  %v1688_v35 = vstv %s6959_s27 }
  0xe9   : > { %v1624_v29 = vmul.f32 %v6861_v37, %v1623_v25  ;;  %v1625_v20 = vmul.f32 %v6866_v54, %v1623_v25  ;;  %v1626_v39 = vmul.f32 %v6871_v1, %v1623_v25  ;;  %v1627_v40 = vmul.f32 %v6876_v19, %v1623_v25 }
  0xea   : > { %v1628_v41 = vmul.f32 %v6881_v12, %v1623_v25  ;;  %v1629_v34 = vmul.f32 %v6888_v52, %v1623_v25  ;;  %v1630_v18 = vmul.f32 %v6893_v50, %v1623_v25  ;;  %v1631_v5 = vmul.f32 %v6898_v9, %v1623_v25 }
  0xeb   : > { %v1632_v30 = vmul.f32 %v6903_v14, %v1623_v25  ;;  %v1633_v62 = vmul.f32 %v6908_v31, %v1623_v25  ;;  %v1634_v47 = vmul.f32 %v6933_v22, %v1623_v25  ;;  %v1646_v32 = vrot.slane %v1624_v29, 2 }
  0xec   : > { %v1647_v38 = vrot.slane %v1625_v20, 2  ;;  %v1649_v21 = vrot.slane %v1626_v39, 2  ;;  %v1651_v42 = vrot.slane %v1627_v40, 2  ;;  %v1653_v27 = vrot.slane %v1628_v41, 2 }
  0xed   : > { %v1655_v59 = vrot.slane %v1629_v34, 2  ;;  %v1657_v28 = vrot.slane %v1630_v18, 2  ;;  %v1659_v33 = vrot.slane %v1631_v5, 2  ;;  %v1661_v46 = vrot.slane %v1632_v30, 2 }
  0xee   : > { %v1648_v53 = vsel %vm467_vm1, %v1646_v32, %v1647_v38  ;;  %v1650_v60 = vsel %vm467_vm1, %v1647_v38, %v1649_v21  ;;  %v1652_v36 = vsel %vm467_vm1, %v1649_v21, %v1651_v42  ;;  %v1654_v23 = vsel %vm467_vm1, %v1651_v42, %v1653_v27 }
  0xef   : > { %v1656_v58 = vsel %vm467_vm1, %v1653_v27, %v1655_v59  ;;  %v1658_v55 = vsel %vm467_vm1, %v1655_v59, %v1657_v28  ;;  %v1660_v2 = vsel %vm467_vm1, %v1657_v28, %v1659_v33  ;;  %v1662_v49 = vsel %vm467_vm1, %v1659_v33, %v1661_v46 }
  0xf0   : > { %v1663_v61 = vrot.slane %v1633_v62, 2  ;;  %v1665_v43 = vrot.slane %v1634_v47, 2  ;;  %v1677_v44 = vadd.f32 %v1648_v53, %v1612_v4  ;;  %v1678_v48 = vadd.f32 %v1650_v60, %v1613_v8 }
  0xf1   : > { %v1679_v7 = vadd.f32 %v1652_v36, %v1614_v13  ;;  %v1680_v6 = vadd.f32 %v1654_v23, %v1615_v15  ;;  %v1681_v24 = vadd.f32 %v1656_v58, %v1616_v10  ;;  %v1682_v56 = vadd.f32 %v1658_v55, %v1617_v11 }
  0xf2   : > { %v1664_v63 = vsel %vm467_vm1, %v1661_v46, %v1663_v61  ;;  %v1666_v26 = vsel %vm467_vm1, %v1663_v61, %v1665_v43  ;;  %v1683_v51 = vadd.f32 %v1660_v2, %v1618_v16  ;;  %v1684_v3 = vadd.f32 %v1662_v49, %v1619_v17 }
  0xf3   : > { %v1685_v57 = vadd.f32 %v1664_v63, %v1620_v0  ;;  %v1686_v25 = vadd.f32 %v1666_v26, %v1621_v45  ;;  %v1689_v29 = vmul.f32 %v6861_v37, %v1688_v35  ;;  %v1690_v20 = vmul.f32 %v6866_v54, %v1688_v35 }
  0xf4   : > { %v1691_v39 = vmul.f32 %v6871_v1, %v1688_v35  ;;  %v1692_v4 = vmul.f32 %v6876_v19, %v1688_v35  ;;  %v1693_v8 = vmul.f32 %v6881_v12, %v1688_v35  ;;  %v1694_v13 = vmul.f32 %v6888_v52, %v1688_v35 }
  0xf5   : > { %v1695_v15 = vmul.f32 %v6893_v50, %v1688_v35  ;;  %v1696_v10 = vmul.f32 %v6898_v9, %v1688_v35  ;;  %v1697_v11 = vmul.f32 %v6903_v14, %v1688_v35  ;;  %v1698_v16 = vmul.f32 %v6908_v31, %v1688_v35 }
  0xf6   : > { %v1699_v17 = vmul.f32 %v6933_v22, %v1688_v35  ;;  %v1711_v0 = vrot.slane %v1689_v29, 3  ;;  %v1712_v45 = vrot.slane %v1690_v20, 3  ;;  %v1714_v40 = vrot.slane %v1691_v39, 3 }
  0xf7   : > { %v1716_v41 = vrot.slane %v1692_v4, 3  ;;  %v1718_v34 = vrot.slane %v1693_v8, 3  ;;  %v1720_v18 = vrot.slane %v1694_v13, 3  ;;  %v1722_v5 = vrot.slane %v1695_v15, 3 }
  0xf8   : > { %v1713_v30 = vsel %vm533_vm2, %v1711_v0, %v1712_v45  ;;  %v1715_v62 = vsel %vm533_vm2, %v1712_v45, %v1714_v40  ;;  %v1724_v47 = vrot.slane %v1696_v10, 3  ;;  %v1726_v32 = vrot.slane %v1697_v11, 3 }
  0xf9   : > { %v1717_v38 = vsel %vm533_vm2, %v1714_v40, %v1716_v41  ;;  %v1719_v21 = vsel %vm533_vm2, %v1716_v41, %v1718_v34  ;;  %v1721_v35 = vsel %vm533_vm2, %v1718_v34, %v1720_v18  ;;  %v1723_v42 = vsel %vm533_vm2, %v1720_v18, %v1722_v5 }
  0xfa   : > { %v1725_v27 = vsel %vm533_vm2, %v1722_v5, %v1724_v47  ;;  %v1727_v59 = vsel %vm533_vm2, %v1724_v47, %v1726_v32  ;;  %v1728_v28 = vrot.slane %v1698_v16, 3  ;;  %v1730_v33 = vrot.slane %v1699_v17, 3 }
  0xfb   : > { %v1742_v46 = vadd.f32 %v1713_v30, %v1677_v44  ;;  %v1743_v53 = vadd.f32 %v1715_v62, %v1678_v48  ;;  %v1744_v23 = vadd.f32 %v1717_v38, %v1679_v7  ;;  %v1745_v58 = vadd.f32 %v1719_v21, %v1680_v6 }
  0xfc   : > { %v1729_v60 = vsel %vm533_vm2, %v1726_v32, %v1728_v28  ;;  %v1731_v36 = vsel %vm533_vm2, %v1728_v28, %v1730_v33  ;;  %v1746_v55 = vadd.f32 %v1721_v35, %v1681_v24  ;;  %v1747_v2 = vadd.f32 %v1723_v42, %v1682_v56 }
  0xfd   : > { %v1748_v49 = vadd.f32 %v1725_v27, %v1683_v51  ;;  %v1749_v61 = vadd.f32 %v1727_v59, %v1684_v3  ;;  %v1750_v43 = vadd.f32 %v1729_v60, %v1685_v57  ;;  %v1751_v63 = vadd.f32 %v1731_v36, %v1686_v25 }
  0xfe   : > { %v1753_v26 = vstv %s7004_s28  ;;  %v1818_v29 = vstv %s7007_s30 }
  0xff   : > { %v1754_v20 = vmul.f32 %v6861_v37, %v1753_v26  ;;  %v1755_v39 = vmul.f32 %v6866_v54, %v1753_v26  ;;  %v1756_v44 = vmul.f32 %v6871_v1, %v1753_v26  ;;  %v1757_v48 = vmul.f32 %v6876_v19, %v1753_v26 }
 0x100   : > { %v1758_v4 = vmul.f32 %v6881_v12, %v1753_v26  ;;  %v1759_v7 = vmul.f32 %v6888_v52, %v1753_v26  ;;  %v1760_v6 = vmul.f32 %v6893_v50, %v1753_v26  ;;  %v1761_v24 = vmul.f32 %v6898_v9, %v1753_v26 }
 0x101   : > { %v1762_v56 = vmul.f32 %v6903_v14, %v1753_v26  ;;  %v1763_v51 = vmul.f32 %v6908_v31, %v1753_v26  ;;  %v1764_v37 = vmul.f32 %v6933_v22, %v1753_v26  ;;  %v1776_v3 = vrot.slane %v1754_v20, 4 }
 0x102   : > { %v1777_v54 = vrot.slane %v1755_v39, 4  ;;  %v1779_v57 = vrot.slane %v1756_v44, 4  ;;  %v1781_v1 = vrot.slane %v1757_v48, 4  ;;  %v1783_v25 = vrot.slane %v1758_v4, 4 }
 0x103   : > { %v1785_v19 = vrot.slane %v1759_v7, 4  ;;  %v1787_v8 = vrot.slane %v1760_v6, 4  ;;  %v1789_v12 = vrot.slane %v1761_v24, 4  ;;  %v1791_v13 = vrot.slane %v1762_v56, 4 }
 0x104   : > { %v1778_v52 = vsel %vm599_vm3, %v1776_v3, %v1777_v54  ;;  %v1780_v50 = vsel %vm599_vm3, %v1777_v54, %v1779_v57  ;;  %v1782_v9 = vsel %vm599_vm3, %v1779_v57, %v1781_v1  ;;  %v1784_v14 = vsel %vm599_vm3, %v1781_v1, %v1783_v25 }
 0x105   : > { %v1786_v31 = vsel %vm599_vm3, %v1783_v25, %v1785_v19  ;;  %v1788_v22 = vsel %vm599_vm3, %v1785_v19, %v1787_v8  ;;  %v1790_v15 = vsel %vm599_vm3, %v1787_v8, %v1789_v12  ;;  %v1792_v10 = vsel %vm599_vm3, %v1789_v12, %v1791_v13 }
 0x106   : > { %v1793_v11 = vrot.slane %v1763_v51, 4  ;;  %v1795_v16 = vrot.slane %v1764_v37, 4  ;;  %v1807_v17 = vadd.f32 %v1778_v52, %v1742_v46  ;;  %v1808_v0 = vadd.f32 %v1780_v50, %v1743_v53 }
 0x107   : > { %v1809_v45 = vadd.f32 %v1782_v9, %v1744_v23  ;;  %v1810_v40 = vadd.f32 %v1784_v14, %v1745_v58  ;;  %v1811_v41 = vadd.f32 %v1786_v31, %v1746_v55  ;;  %v1812_v34 = vadd.f32 %v1788_v22, %v1747_v2 }
 0x108   : > { %v1794_v18 = vsel %vm599_vm3, %v1791_v13, %v1793_v11  ;;  %v1796_v5 = vsel %vm599_vm3, %v1793_v11, %v1795_v16  ;;  %v1813_v30 = vadd.f32 %v1790_v15, %v1748_v49  ;;  %v1814_v62 = vadd.f32 %v1792_v10, %v1749_v61 }
 0x109   : > { %v1819_v47 = vadd.f32 %v1818_v29, %v1807_v17  ;;  %v1820_v32 = vadd.f32 %v1818_v29, %v1808_v0  ;;  %v1815_v38 = vadd.f32 %v1794_v18, %v1750_v43  ;;  %v1821_v21 = vadd.f32 %v1818_v29, %v1809_v45 }
 0x10a   : > { %v1822_v35 = vadd.f32 %v1818_v29, %v1810_v40  ;;  %v1823_v42 = vadd.f32 %v1818_v29, %v1811_v41  ;;  %v1816_v27 = vadd.f32 %v1796_v5, %v1751_v63  ;;  %v1824_v59 = vadd.f32 %v1818_v29, %v1812_v34 }
 0x10b   : > { %v1825_v28 = vadd.f32 %v1818_v29, %v1813_v30  ;;  %v1829_v33 = vmax.f32 %v1819_v47, 0.0  ;;  %v1830_v46 = vmax.f32 %v1820_v32, 0.0  ;;  %v1831_v53 = vmax.f32 %v1821_v21, 0.0 }
 0x10c   : > { %v1826_v60 = vadd.f32 %v1818_v29, %v1814_v62  ;;  %v1832_v36 = vmax.f32 %v1822_v35, 0.0  ;;  %v1827_v23 = vadd.f32 %v1818_v29, %v1815_v38  ;;  %v1833_v58 = vmax.f32 %v1823_v42, 0.0 }
 0x10d   : > { %1839 = vst [vmem:[#allocation2] sm:$0xff] %v1829_v33  ;;  %v1828_v55 = vadd.f32 %v1818_v29, %v1816_v27  ;;  %v1834_v2 = vmax.f32 %v1824_v59, 0.0  ;;  %v1835_v49 = vmax.f32 %v1825_v28, 0.0  ;;  %v1849_v43 = vlaneseq }
 0x10e   : > { %1840 = vst [vmem:[#allocation2 + $0x8] sm:$0xff] %v1830_v46  ;;  %v1836_v61 = vmax.f32 %v1826_v60, 0.0  ;;  %v1837_v26 = vmax.f32 %v1827_v23, 0.0  ;;  %v6049_v20 = vmov 0.0  }
 0x10f   : > { %1841 = vst [vmem:[#allocation2 + $0x10] sm:$0xff] %v1831_v53  ;;  %v1838_v63 = vmax.f32 %v1828_v55, 0.0  ;;  %vm1851_vm4 = vcmp.lt.s32.totalorder %v1849_v43, 300 }
 0x110   : > { %1842 = vst [vmem:[#allocation2 + $0x18] sm:$0xff] %v1832_v36 }
 0x111   : > { %1843 = vst [vmem:[#allocation2 + $0x20] sm:$0xff] %v1833_v58 }
 0x112   : > { %1844 = vst [vmem:[#allocation2 + $0x28] sm:$0xff] %v1834_v2 }
 0x113   : > { %1845 = vst [vmem:[#allocation2 + $0x30] sm:$0xff] %v1835_v49 }
 0x114   : > { %1846 = vst [vmem:[#allocation2 + $0x38] sm:$0xff] %v1836_v61 }
 0x115   : > { %1847 = vst [vmem:[#allocation2 + $0x40] sm:$0xff] %v1837_v26 }
 0x116   : > { %1848 = vst [vmem:[#allocation2 + $0x48] sm:$0xff] %v1838_v63 }
 0x117   : > { %1853 = vst.msk [vmem:[#allocation3] sm:$0x7] %vm1851_vm4, %v6049_v20 }
 0x118 PF: > { %v4660_v29 = vld [vmem:[%s6123_s20 + $0xd8] sm:$0xf]  ;;  %v5730_v39 = vld [vmem:[%s6123_s20 + $0xe0] sm:$0xf0]  ;;  %v5729_v44 = vld [vmem:[%s6123_s20 + $0xdc] sm:$0xf] }
 0x119   : > { %v4661_v48 = vor.u32 %v5730_v39, %v4660_v29  ;;  %v4662_v4 = vld [vmem:[%s6123_s20 + $0xe4] sm:$0xf0]  ;;  %v4668_v7 = vld [vmem:[%s6123_s20 + $0xe0] sm:$0xf]  ;;  %v5731_v6 = vld [vmem:[%s6123_s20 + $0xe8] sm:$0xf0] }
 0x11a   : > { %v4665_v24 = vor.u32 %v5729_v44, %v4662_v4  ;;  %v4669_v56 = vor.u32 %v5731_v6, %v4668_v7  ;;  %v4723_v51 = vld [vmem:[%s6123_s20 + $0x60] sm:$0xf]  ;;  %v5715_v37 = vld [vmem:[%s6123_s20 + $0x68] sm:$0xf0]  ;;  %v5726_v1 = vld [vmem:[%s6123_s20 + $0xc4] sm:$0xf] }
 0x11b   : > { %v4648_v3 = vld [vmem:[%s6123_s20 + $0xc0] sm:$0xf]  ;;  %1993 = vmatpush.bf16.msra.mxu0 %v4661_v48  ;;  %v4724_v54 = vor.u32 %v5715_v37, %v4723_v51  ;;  %v5727_v57 = vld [vmem:[%s6123_s20 + $0xc8] sm:$0xf0]  ;;  %v4650_v25 = vld [vmem:[%s6123_s20 + $0xcc] sm:$0xf0] }
 0x11c   : > { %2006 = vmatpush.bf16.msra.mxu1 %v4665_v24  ;;  %2019 = vmatpush.bf16.msra.mxu2 %v4669_v56  ;;  %v4649_v19 = vor.u32 %v5727_v57, %v4648_v3  ;;  %v4653_v8 = vor.u32 %v5726_v1, %v4650_v25  ;;  %v4656_v12 = vld [vmem:[%s6123_s20 + $0xc8] sm:$0xf]  ;;  %v5728_v13 = vld [vmem:[%s6123_s20 + $0xd0] sm:$0xf0]  ;;  %v5723_v15 = vld [vmem:[%s6123_s20 + $0xac] sm:$0xf] }
 0x11d   : > { %v4711_v52 = vld [vmem:[%s6123_s20 + $0x48] sm:$0xf]  ;;  %2115 = vmatpush.bf16.msra.mxu3 %v4724_v54  ;;  %v4657_v50 = vor.u32 %v5728_v13, %v4656_v12  ;;  %v5712_v9 = vld [vmem:[%s6123_s20 + $0x50] sm:$0xf0]  ;;  %v4638_v10 = vld [vmem:[%s6123_s20 + $0xb4] sm:$0xf0] }
 0x11e   : > { %v4636_v14 = vld [vmem:[%s6123_s20 + $0xa8] sm:$0xf]  ;;  %v5724_v31 = vld [vmem:[%s6123_s20 + $0xb0] sm:$0xf0]  ;;  %v4712_v22 = vor.u32 %v5712_v9, %v4711_v52  ;;  %v4644_v11 = vld [vmem:[%s6123_s20 + $0xb0] sm:$0xf]  ;;  %v4641_v40 = vor.u32 %v5723_v15, %v4638_v10 }
 0x11f   : > { %1994 = vmatpush.bf16.msra.mxu0 %v4649_v19  ;;  %v4637_v16 = vor.u32 %v5724_v31, %v4636_v14  ;;  %v5725_v17 = vld [vmem:[%s6123_s20 + $0xb8] sm:$0xf0]  ;;  %v4699_v0 = vld [vmem:[%s6123_s20 + $0x30] sm:$0xf]  ;;  %v5720_v5 = vld [vmem:[%s6123_s20 + $0x94] sm:$0xf] }
 0x120   : > { %v5709_v45 = vld [vmem:[%s6123_s20 + $0x38] sm:$0xf0]  ;;  %2007 = vmatpush.bf16.msra.mxu1 %v4653_v8  ;;  %2020 = vmatpush.bf16.msra.mxu2 %v4657_v50  ;;  %v4645_v41 = vor.u32 %v5725_v17, %v4644_v11  ;;  %v4624_v34 = vld [vmem:[%s6123_s20 + $0x90] sm:$0xf]  ;;  %v4626_v62 = vld [vmem:[%s6123_s20 + $0x9c] sm:$0xf0] }
 0x121   : > { %v5721_v18 = vld [vmem:[%s6123_s20 + $0x98] sm:$0xf0]  ;;  %2116 = vmatpush.bf16.msra.mxu3 %v4712_v22  ;;  %v4700_v30 = vor.u32 %v5709_v45, %v4699_v0  ;;  %v4632_v47 = vld [vmem:[%s6123_s20 + $0x98] sm:$0xf]  ;;  %v5722_v32 = vld [vmem:[%s6123_s20 + $0xa0] sm:$0xf0]  ;;  %v4629_v59 = vor.u32 %v5720_v5, %v4626_v62 }
 0x122   : > { %v4687_v38 = vld [vmem:[%s6123_s20 + $0x18] sm:$0xf]  ;;  %v5706_v21 = vld [vmem:[%s6123_s20 + $0x20] sm:$0xf0]  ;;  %v4625_v35 = vor.u32 %v5721_v18, %v4624_v34  ;;  %v4633_v28 = vor.u32 %v5722_v32, %v4632_v47  ;;  %v5717_v33 = vld [vmem:[%s6123_s20 + $0x7c] sm:$0xf] }
 0x123   : > { %1995 = vmatpush.bf16.msra.mxu0 %v4637_v16  ;;  %v4612_v42 = vld [vmem:[%s6123_s20 + $0x78] sm:$0xf]  ;;  %v5718_v27 = vld [vmem:[%s6123_s20 + $0x80] sm:$0xf0]  ;;  %v4614_v46 = vld [vmem:[%s6123_s20 + $0x84] sm:$0xf0]  ;;  %v4688_v60 = vor.u32 %v5706_v21, %v4687_v38 }
 0x124   : > { %2008 = vmatpush.bf16.msra.mxu1 %v4641_v40  ;;  %2021 = vmatpush.bf16.msra.mxu2 %v4645_v41  ;;  %v4620_v53 = vld [vmem:[%s6123_s20 + $0x80] sm:$0xf]  ;;  %v5719_v36 = vld [vmem:[%s6123_s20 + $0x88] sm:$0xf0]  ;;  %v5714_v55 = vld [vmem:[%s6123_s20 + $0x64] sm:$0xf]  ;;  %v4613_v61 = vor.u32 %v5718_v27, %v4612_v42  ;;  %v4617_v20 = vor.u32 %v5717_v33, %v4614_v46 }
 0x125   : > { %2117 = vmatpush.bf16.msra.mxu3 %v4700_v30  ;;  %v4675_v23 = vld [vmem:[%s6123_s20] sm:$0xf]  ;;  %v5703_v58 = vld [vmem:[%s6123_s20 + $0x8] sm:$0xf0]  ;;  %v4725_v2 = vld [vmem:[%s6123_s20 + $0x6c] sm:$0xf0]  ;;  %v4621_v29 = vor.u32 %v5719_v36, %v4620_v53 }
 0x126   : > { %v4731_v49 = vld [vmem:[%s6123_s20 + $0x68] sm:$0xf]  ;;  %v5716_v43 = vld [vmem:[%s6123_s20 + $0x70] sm:$0xf0]  ;;  %v4786_v26 = vld [vmem:[%s6123_s20 + $0x150] sm:$0xf]  ;;  %v4676_v48 = vor.u32 %v5703_v58, %v4675_v23  ;;  %v4728_v4 = vor.u32 %v5714_v55, %v4725_v2 }
 0x127   : > { %1996 = vmatpush.bf16.msra.mxu0 %v4625_v35  ;;  %v5745_v63 = vld [vmem:[%s6123_s20 + $0x158] sm:$0xf0]  ;;  %v5744_v39 = vld [vmem:[%s6123_s20 + $0x154] sm:$0xf]  ;;  %v4788_v44 = vld [vmem:[%s6123_s20 + $0x15c] sm:$0xf0]  ;;  %v4732_v6 = vor.u32 %v5716_v43, %v4731_v49 }
 0x128   : > { %2009 = vmatpush.bf16.msra.mxu1 %v4629_v59  ;;  %2022 = vmatpush.bf16.msra.mxu2 %v4633_v28  ;;  %s4609_s10 = sshll.u32 %s6110_s12, 4  ;;  %v5711_v7 = vld [vmem:[%s6123_s20 + $0x4c] sm:$0xf]  ;;  %v4787_v24 = vor.u32 %v5745_v63, %v4786_v26  ;;  %v4713_v51 = vld [vmem:[%s6123_s20 + $0x54] sm:$0xf0]  ;;  %v4791_v3 = vor.u32 %v5744_v39, %v4788_v44  ;;  %vm1986_vm5 = vcmask 654336  }
 0x129   : > { %2118 = vmatpush.bf16.msra.mxu3 %v4688_v60  ;;  %s7092_s16 = scalar_lea.vmem [#allocation2], %s4609_s10  ;;  %v4719_v37 = vld [vmem:[%s6123_s20 + $0x50] sm:$0xf]  ;;  %v5713_v57 = vld [vmem:[%s6123_s20 + $0x58] sm:$0xf0]  ;;  %v4716_v8 = vor.u32 %v5711_v7, %v4713_v51  ;;  %vm4205_vm6 = vcmask 1040384  }
 0x12a   : > { %v1856_v56 = vld [vmem:[%s7092_s16] sm:$0xff]  ;;  %v4774_v1 = vld [vmem:[%s6123_s20 + $0x138] sm:$0xf]  ;;  %v5741_v12 = vld [vmem:[%s6123_s20 + $0x13c] sm:$0xf]  ;;  %v4720_v52 = vor.u32 %v5713_v57, %v4719_v37  ;;  %vm4207_vm7 = vcmask 1041408  }
 0x12b   : > { %1997 = vmatpush.bf16.msra.mxu0 %v4613_v61  ;;  %v7097_v54 = vpack.c.bf16 %v1856_v56, %v1856_v56  ;;  %v5742_v25 = vld [vmem:[%s6123_s20 + $0x140] sm:$0xf0]  ;;  %v4776_v13 = vld [vmem:[%s6123_s20 + $0x144] sm:$0xf0]  ;;  %v5708_v9 = vld [vmem:[%s6123_s20 + $0x34] sm:$0xf] }
 0x12c   : > { %2010 = vmatpush.bf16.msra.mxu1 %v4617_v20  ;;  %2023 = vmatpush.bf16.msra.mxu2 %v4621_v29  ;;  %v4775_v50 = vor.u32 %v5742_v25, %v4774_v1  ;;  %v4701_v14 = vld [vmem:[%s6123_s20 + $0x3c] sm:$0xf0]  ;;  %v4707_v31 = vld [vmem:[%s6123_s20 + $0x38] sm:$0xf]  ;;  %v5710_v15 = vld [vmem:[%s6123_s20 + $0x40] sm:$0xf0]  ;;  %v4779_v16 = vor.u32 %v5741_v12, %v4776_v13 }
 0x12d   : > { %2119 = vmatpush.bf16.msra.mxu3 %v4676_v48  ;;  %v1901_v19 = vunpack.c.l.b16 %v7097_v54  ;;  %v4762_v10 = vld [vmem:[%s6123_s20 + $0x120] sm:$0xf]  ;;  %v5739_v11 = vld [vmem:[%s6123_s20 + $0x128] sm:$0xf0]  ;;  %v4704_v0 = vor.u32 %v5708_v9, %v4701_v14  ;;  %v5738_v45 = vld [vmem:[%s6123_s20 + $0x124] sm:$0xf]  ;;  %v4708_v41 = vor.u32 %v5710_v15, %v4707_v31 }
 0x12e   : > { %v4764_v40 = vld [vmem:[%s6123_s20 + $0x12c] sm:$0xf0]  ;;  %v4763_v34 = vor.u32 %v5739_v11, %v4762_v10  ;;  %v5705_v18 = vld [vmem:[%s6123_s20 + $0x1c] sm:$0xf]  ;;  %v4689_v5 = vld [vmem:[%s6123_s20 + $0x24] sm:$0xf0] }
 0x12f   : > { %2128 = vmatpush.bf16.msrb.mxu0 %v4728_v4  ;;  %v7108_v22 = vpack.c.b16 %v1901_v19, %v1901_v19  ;;  %v4695_v30 = vld [vmem:[%s6123_s20 + $0x20] sm:$0xf]  ;;  %v5707_v62 = vld [vmem:[%s6123_s20 + $0x28] sm:$0xf0]  ;;  %v4750_v47 = vld [vmem:[%s6123_s20 + $0x108] sm:$0xf]  ;;  %v4767_v38 = vor.u32 %v5738_v45, %v4764_v40  ;;  %v4692_v35 = vor.u32 %v5705_v18, %v4689_v5 }
 0x130   : > { %2141 = vmatpush.bf16.msrb.mxu1 %v4732_v6  ;;  %2258 = vmatpush.bf16.msrb.mxu2 %v4787_v24  ;;  %v5736_v32 = vld [vmem:[%s6123_s20 + $0x110] sm:$0xf0]  ;;  %v5735_v21 = vld [vmem:[%s6123_s20 + $0x10c] sm:$0xf]  ;;  %v4752_v42 = vld [vmem:[%s6123_s20 + $0x114] sm:$0xf0]  ;;  %v4696_v28 = vor.u32 %v5707_v62, %v4695_v30 }
 0x131   : > { %2271 = vmatpush.bf16.msrb.mxu3 %v4791_v3  ;;  %v7116_v17 = vshrl.u32 %v7108_v22, 16  ;;  %v5702_v27 = vld [vmem:[%s6123_s20 + $0x4] sm:$0xf]  ;;  %v4677_v59 = vld [vmem:[%s6123_s20 + $0xc] sm:$0xf0]  ;;  %v4751_v33 = vor.u32 %v5736_v32, %v4750_v47  ;;  %v4755_v55 = vor.u32 %v5735_v21, %v4752_v42  ;;  %v7151_v51 = vrot.slane %v7108_v22, 1 }
 0x132   : > { %4733 = vmatmul.msk.bf16.vlgmr.msra.gmra.mxu3 %vm1986_vm5, %v7097_v54  ;;  %v4683_v46 = vld [vmem:[%s6123_s20 + $0x8] sm:$0xf]  ;;  %v5704_v53 = vld [vmem:[%s6123_s20 + $0x10] sm:$0xf0]  ;;  %v4738_v60 = vld [vmem:[%s6123_s20 + $0xf0] sm:$0xf]  ;;  %v4680_v43 = vor.u32 %v5702_v27, %v4677_v59 }
 0x133   : > { %2129 = vmatpush.bf16.msrb.mxu0 %v4716_v8  ;;  %4671 = vmatmul.msk.bf16.vlgmr.msra.gmra.mxu1 %vm1986_vm5, %v7116_v17  ;;  %v5733_v36 = vld [vmem:[%s6123_s20 + $0xf8] sm:$0xf0]  ;;  %v5732_v23 = vld [vmem:[%s6123_s20 + $0xf4] sm:$0xf]  ;;  %v4794_v58 = vld [vmem:[%s6123_s20 + $0x158] sm:$0xf]  ;;  %v4684_v29 = vor.u32 %v5704_v53, %v4683_v46 }
 0x134   : > { %2142 = vmatpush.bf16.msrb.mxu1 %v4720_v52  ;;  %2259 = vmatpush.bf16.msrb.mxu2 %v4775_v50  ;;  %v5746_v2 = vld [vmem:[%s6123_s20 + $0x160] sm:$0xf0]  ;;  %v4849_v49 = vld [vmem:[%s6123_s20 + $0x1c8] sm:$0xf]  ;;  %v5760_v61 = vld [vmem:[%s6123_s20 + $0x1d0] sm:$0xf0]  ;;  %v4739_v39 = vor.u32 %v5733_v36, %v4738_v60 }
 0x135   : > { %4672 = vmatmul.msk.bf16.vlgmr.msra.gmra.mxu2 %vm1986_vm5, %v7116_v17  ;;  %4670 = vmatmul.msk.bf16.vlgmr.msra.gmra.mxu0 %vm1986_vm5, %v7116_v17  ;;  %v4740_v26 = vld [vmem:[%s6123_s20 + $0xfc] sm:$0xf0]  ;;  %v5759_v63 = vld [vmem:[%s6123_s20 + $0x1cc] sm:$0xf]  ;;  %v4851_v20 = vld [vmem:[%s6123_s20 + $0x1d4] sm:$0xf0]  ;;  %v4795_v4 = vor.u32 %v5746_v2, %v4794_v58  ;;  %v4850_v7 = vor.u32 %v5760_v61, %v4849_v49 }
 0x136   : > { %2272 = vmatpush.bf16.msrb.mxu3 %v4779_v16  ;;  %v4857_v44 = vld [vmem:[%s6123_s20 + $0x1d0] sm:$0xf]  ;;  %v5761_v48 = vld [vmem:[%s6123_s20 + $0x1d8] sm:$0xf0]  ;;  %v4743_v6 = vor.u32 %v5732_v23, %v4740_v26  ;;  %v4854_v24 = vor.u32 %v5759_v63, %v4851_v20  ;;  %v4782_v37 = vld [vmem:[%s6123_s20 + $0x140] sm:$0xf] }
 0x137   : > { %2130 = vmatpush.bf16.msrb.mxu0 %v4704_v0  ;;  %v4858_v56 = vor.u32 %v5761_v48, %v4857_v44  ;;  %v5743_v3 = vld [vmem:[%s6123_s20 + $0x148] sm:$0xf0]  ;;  %v4837_v57 = vld [vmem:[%s6123_s20 + $0x1b0] sm:$0xf]  ;;  %v5757_v1 = vld [vmem:[%s6123_s20 + $0x1b8] sm:$0xf0] }
 0x138   : > { %2143 = vmatpush.bf16.msrb.mxu1 %v4708_v41  ;;  %2260 = vmatpush.bf16.msrb.mxu2 %v4763_v34  ;;  %v5756_v25 = vld [vmem:[%s6123_s20 + $0x1b4] sm:$0xf]  ;;  %v4839_v19 = vld [vmem:[%s6123_s20 + $0x1bc] sm:$0xf0]  ;;  %v4845_v8 = vld [vmem:[%s6123_s20 + $0x1b8] sm:$0xf]  ;;  %v4783_v13 = vor.u32 %v5743_v3, %v4782_v37  ;;  %v4838_v52 = vor.u32 %v5757_v1, %v4837_v57 }
 0x139   : > { %v5758_v12 = vld [vmem:[%s6123_s20 + $0x1c0] sm:$0xf0]  ;;  %v4770_v50 = vld [vmem:[%s6123_s20 + $0x128] sm:$0xf]  ;;  %v5740_v9 = vld [vmem:[%s6123_s20 + $0x130] sm:$0xf0]  ;;  %v4842_v14 = vor.u32 %v5756_v25, %v4839_v19 }
 0x13a   : > { %2273 = vmatpush.bf16.msrb.mxu3 %v4767_v38  ;;  %v4846_v31 = vor.u32 %v5758_v12, %v4845_v8  ;;  %v4825_v15 = vld [vmem:[%s6123_s20 + $0x198] sm:$0xf]  ;;  %v5754_v10 = vld [vmem:[%s6123_s20 + $0x1a0] sm:$0xf0]  ;;  %v5753_v11 = vld [vmem:[%s6123_s20 + $0x19c] sm:$0xf]  ;;  %v4771_v40 = vor.u32 %v5740_v9, %v4770_v50 }
 0x13b   : > { %2131 = vmatpush.bf16.msrb.mxu0 %v4692_v35  ;;  %v4827_v16 = vld [vmem:[%s6123_s20 + $0x1a4] sm:$0xf0]  ;;  %v4833_v0 = vld [vmem:[%s6123_s20 + $0x1a0] sm:$0xf]  ;;  %v5755_v45 = vld [vmem:[%s6123_s20 + $0x1a8] sm:$0xf0]  ;;  %v4826_v41 = vor.u32 %v5754_v10, %v4825_v15 }
 0x13c   : > { %2144 = vmatpush.bf16.msrb.mxu1 %v4696_v28  ;;  %2261 = vmatpush.bf16.msrb.mxu2 %v4751_v33  ;;  %v4758_v34 = vld [vmem:[%s6123_s20 + $0x110] sm:$0xf]  ;;  %v5737_v18 = vld [vmem:[%s6123_s20 + $0x118] sm:$0xf0]  ;;  %v4830_v5 = vor.u32 %v5753_v11, %v4827_v16  ;;  %v4834_v30 = vor.u32 %v5755_v45, %v4833_v0  ;;  %v4813_v62 = vld [vmem:[%s6123_s20 + $0x180] sm:$0xf] }
 0x13d   : > { %v5751_v47 = vld [vmem:[%s6123_s20 + $0x188] sm:$0xf0]  ;;  %v5750_v32 = vld [vmem:[%s6123_s20 + $0x184] sm:$0xf]  ;;  %v4821_v38 = vld [vmem:[%s6123_s20 + $0x188] sm:$0xf]  ;;  %v4759_v42 = vor.u32 %v5737_v18, %v4758_v34 }
 0x13e   : > { %2274 = vmatpush.bf16.msrb.mxu3 %v4755_v55  ;;  %v5752_v21 = vld [vmem:[%s6123_s20 + $0x190] sm:$0xf0]  ;;  %v4746_v35 = vld [vmem:[%s6123_s20 + $0xf8] sm:$0xf]  ;;  %v4814_v27 = vor.u32 %v5751_v47, %v4813_v62  ;;  %v5734_v59 = vld [vmem:[%s6123_s20 + $0x100] sm:$0xf0] }
 0x13f   : > { %2132 = vmatpush.bf16.msrb.mxu0 %v4680_v43  ;;  %v4801_v28 = vld [vmem:[%s6123_s20 + $0x168] sm:$0xf]  ;;  %v5748_v33 = vld [vmem:[%s6123_s20 + $0x170] sm:$0xf0]  ;;  %v4822_v53 = vor.u32 %v5752_v21, %v4821_v38  ;;  %v5747_v60 = vld [vmem:[%s6123_s20 + $0x16c] sm:$0xf]  ;;  %v4747_v26 = vor.u32 %v5734_v59, %v4746_v35 }
 0x140   : > { %2145 = vmatpush.bf16.msrb.mxu1 %v4684_v29  ;;  %2262 = vmatpush.bf16.msrb.mxu2 %v4739_v39  ;;  %v4803_v36 = vld [vmem:[%s6123_s20 + $0x174] sm:$0xf0]  ;;  %v4809_v23 = vld [vmem:[%s6123_s20 + $0x170] sm:$0xf]  ;;  %v5749_v58 = vld [vmem:[%s6123_s20 + $0x178] sm:$0xf0]  ;;  %v4802_v63 = vor.u32 %v5748_v33, %v4801_v28 }
 0x141   : > { %v4912_v55 = vld [vmem:[%s6123_s20 + $0x240] sm:$0xf]  ;;  %v5775_v2 = vld [vmem:[%s6123_s20 + $0x248] sm:$0xf0]  ;;  %v5774_v49 = vld [vmem:[%s6123_s20 + $0x244] sm:$0xf]  ;;  %v4806_v44 = vor.u32 %v5747_v60, %v4803_v36  ;;  %v4810_v48 = vor.u32 %v5749_v58, %v4809_v23 }
 0x142   : > { %2275 = vmatpush.bf16.msrb.mxu3 %v4743_v6  ;;  %v4914_v61 = vld [vmem:[%s6123_s20 + $0x24c] sm:$0xf0]  ;;  %v4920_v43 = vld [vmem:[%s6123_s20 + $0x248] sm:$0xf]  ;;  %v5776_v20 = vld [vmem:[%s6123_s20 + $0x250] sm:$0xf0] }
 0x143   : > { %2284 = vmatpush.bf16.msra.mxu0 %v4795_v4  ;;  %4735 = vmatmul.msk.bf16.vlgmr.msrb.gmra.mxu1 %vm1986_vm5, %v7097_v54  ;;  %v4975_v29 = vld [vmem:[%s6123_s20 + $0x2b8] sm:$0xf]  ;;  %v5790_v39 = vld [vmem:[%s6123_s20 + $0x2c0] sm:$0xf0]  ;;  %v4913_v4 = vor.u32 %v5775_v2, %v4912_v55  ;;  %v2317_v6 = vrot.slane %v7116_v17, 1  ;;  %v4921_v37 = vor.u32 %v5776_v20, %v4920_v43  ;;  %p5618_p8 = scmp.ne.s32.totalorder %s6110_s12, 4 }
 0x144   : > { %2404 = vmatpush.bf16.msra.mxu1 %v4850_v7  ;;  %2417 = vmatpush.bf16.msra.mxu2 %v4854_v24  ;;  %v4917_v7 = vor.u32 %v5774_v49, %v4914_v61  ;;  %v4900_v24 = vld [vmem:[%s6123_s20 + $0x228] sm:$0xf]  ;;  %v4976_v3 = vor.u32 %v5790_v39, %v4975_v29  ;;  %v5771_v57 = vld [vmem:[%s6123_s20 + $0x22c] sm:$0xf]  ;;  %v4902_v1 = vld [vmem:[%s6123_s20 + $0x234] sm:$0xf0] }
 0x145   : > { %4796 = vmatmul.msk.bf16.vlgmr.msrb.gmra.mxu2 %vm1986_vm5, %v7151_v51  ;;  %4797 = vmatmul.msk.bf16.vlgmr.msrb.gmra.mxu3 %vm1986_vm5, %v7151_v51  ;;  %v4908_v25 = vld [vmem:[%s6123_s20 + $0x230] sm:$0xf]  ;;  %v5773_v19 = vld [vmem:[%s6123_s20 + $0x238] sm:$0xf0]  ;;  %v4963_v8 = vld [vmem:[%s6123_s20 + $0x2a0] sm:$0xf] }
 0x146   : > { %2430 = vmatpush.bf16.msra.mxu3 %v4858_v56  ;;  %4734 = vmatmul.msk.bf16.vlgmr.msrb.gmra.mxu0 %vm1986_vm5, %v7097_v54  ;;  %v4815_v54 = vld [vmem:[%s6123_s20 + $0x18c] sm:$0xf0]  ;;  %v5772_v56 = vld [vmem:[%s6123_s20 + $0x230] sm:$0xf0]  ;;  %v5787_v12 = vld [vmem:[%s6123_s20 + $0x2a8] sm:$0xf0] }
 0x147   : > { %2285 = vmatpush.bf16.msra.mxu0 %v4783_v13  ;;  %v4818_v46 = vor.u32 %v5750_v32, %v4815_v54  ;;  %v4901_v13 = vor.u32 %v5772_v56, %v4900_v24  ;;  %v4888_v50 = vld [vmem:[%s6123_s20 + $0x210] sm:$0xf]  ;;  %v5769_v9 = vld [vmem:[%s6123_s20 + $0x218] sm:$0xf0]  ;;  %v5768_v15 = vld [vmem:[%s6123_s20 + $0x214] sm:$0xf] }
 0x148   : > { %2405 = vmatpush.bf16.msra.mxu1 %v4838_v52  ;;  %2418 = vmatpush.bf16.msra.mxu2 %v4842_v14  ;;  %v4905_v52 = vor.u32 %v5771_v57, %v4902_v1  ;;  %v4909_v14 = vor.u32 %v5773_v19, %v4908_v25  ;;  %v4890_v10 = vld [vmem:[%s6123_s20 + $0x21c] sm:$0xf0]  ;;  %v4896_v11 = vld [vmem:[%s6123_s20 + $0x218] sm:$0xf]  ;;  %v5770_v16 = vld [vmem:[%s6123_s20 + $0x220] sm:$0xf0] }
 0x149   : > { %v4951_v0 = vld [vmem:[%s6123_s20 + $0x288] sm:$0xf]  ;;  %v5784_v45 = vld [vmem:[%s6123_s20 + $0x290] sm:$0xf0]  ;;  %v5766_v34 = vld [vmem:[%s6123_s20 + $0x200] sm:$0xf0]  ;;  %v4897_v18 = vor.u32 %v5770_v16, %v4896_v11 }
 0x14a   : > { %2431 = vmatpush.bf16.msra.mxu3 %v4846_v31  ;;  %v4964_v31 = vor.u32 %v5787_v12, %v4963_v8  ;;  %v4878_v62 = vld [vmem:[%s6123_s20 + $0x204] sm:$0xf0]  ;;  %v4884_v47 = vld [vmem:[%s6123_s20 + $0x200] sm:$0xf]  ;;  %v5767_v32 = vld [vmem:[%s6123_s20 + $0x208] sm:$0xf0] }
 0x14b   : > { %2286 = vmatpush.bf16.msra.mxu0 %v4771_v40  ;;  %v4889_v40 = vor.u32 %v5769_v9, %v4888_v50  ;;  %v4939_v54 = vld [vmem:[%s6123_s20 + $0x270] sm:$0xf]  ;;  %v5781_v38 = vld [vmem:[%s6123_s20 + $0x278] sm:$0xf0]  ;;  %v4864_v21 = vld [vmem:[%s6123_s20 + $0x1e0] sm:$0xf]  ;;  %v4885_v33 = vor.u32 %v5767_v32, %v4884_v47 }
 0x14c   : > { %2406 = vmatpush.bf16.msra.mxu1 %v4826_v41  ;;  %2419 = vmatpush.bf16.msra.mxu2 %v4830_v5  ;;  %v4876_v41 = vld [vmem:[%s6123_s20 + $0x1f8] sm:$0xf]  ;;  %v4952_v5 = vor.u32 %v5784_v45, %v4951_v0  ;;  %v5762_v59 = vld [vmem:[%s6123_s20 + $0x1e4] sm:$0xf]  ;;  %v4866_v28 = vld [vmem:[%s6123_s20 + $0x1ec] sm:$0xf0] }
 0x14d   : > { %v4877_v35 = vor.u32 %v5766_v34, %v4876_v41  ;;  %v5764_v60 = vld [vmem:[%s6123_s20 + $0x1f0] sm:$0xf0]  ;;  %v4927_v36 = vld [vmem:[%s6123_s20 + $0x258] sm:$0xf]  ;;  %v5778_v23 = vld [vmem:[%s6123_s20 + $0x260] sm:$0xf0] }
 0x14e   : > { %2432 = vmatpush.bf16.msra.mxu3 %v4834_v30  ;;  %v5765_v30 = vld [vmem:[%s6123_s20 + $0x1fc] sm:$0xf]  ;;  %v4977_v55 = vld [vmem:[%s6123_s20 + $0x2c4] sm:$0xf0]  ;;  %v4983_v2 = vld [vmem:[%s6123_s20 + $0x2c0] sm:$0xf] }
 0x14f   : > { %2287 = vmatpush.bf16.msra.mxu0 %v4759_v42  ;;  %v4881_v42 = vor.u32 %v5765_v30, %v4878_v62  ;;  %v5789_v58 = vld [vmem:[%s6123_s20 + $0x2bc] sm:$0xf]  ;;  %v5791_v49 = vld [vmem:[%s6123_s20 + $0x2c8] sm:$0xf0]  ;;  %v5038_v61 = vld [vmem:[%s6123_s20 + $0x330] sm:$0xf] }
 0x150   : > { %2407 = vmatpush.bf16.msra.mxu1 %v4814_v27  ;;  %2420 = vmatpush.bf16.msra.mxu2 %v4818_v46  ;;  %v5763_v27 = vld [vmem:[%s6123_s20 + $0x1e8] sm:$0xf0]  ;;  %v4940_v46 = vor.u32 %v5781_v38, %v4939_v54  ;;  %v5804_v20 = vld [vmem:[%s6123_s20 + $0x334] sm:$0xf]  ;;  %v5040_v29 = vld [vmem:[%s6123_s20 + $0x33c] sm:$0xf0] }
 0x151   : > { %v4865_v43 = vor.u32 %v5763_v27, %v4864_v21  ;;  %v4965_v24 = vld [vmem:[%s6123_s20 + $0x2ac] sm:$0xf0]  ;;  %v5788_v57 = vld [vmem:[%s6123_s20 + $0x2b0] sm:$0xf0]  ;;  %v5026_v1 = vld [vmem:[%s6123_s20 + $0x318] sm:$0xf] }
 0x152   : > { %2433 = vmatpush.bf16.msra.mxu3 %v4822_v53  ;;  %v4872_v53 = vld [vmem:[%s6123_s20 + $0x1e8] sm:$0xf]  ;;  %v5802_v25 = vld [vmem:[%s6123_s20 + $0x320] sm:$0xf0]  ;;  %v5801_v19 = vld [vmem:[%s6123_s20 + $0x31c] sm:$0xf] }
 0x153   : > { %2288 = vmatpush.bf16.msra.mxu0 %v4747_v26  ;;  %v4869_v26 = vor.u32 %v5762_v59, %v4866_v28  ;;  %v4873_v39 = vor.u32 %v5764_v60, %v4872_v53  ;;  %v5028_v8 = vld [vmem:[%s6123_s20 + $0x324] sm:$0xf0]  ;;  %v7257_v12 = vrot.slane %v7116_v17, 2  ;;  %v5783_v50 = vld [vmem:[%s6123_s20 + $0x28c] sm:$0xf] }
 0x154   : > { %2408 = vmatpush.bf16.msra.mxu1 %v4802_v63  ;;  %2421 = vmatpush.bf16.msra.mxu2 %v4806_v44  ;;  %v5805_v63 = vld [vmem:[%s6123_s20 + $0x338] sm:$0xf0]  ;;  %v4928_v44 = vor.u32 %v5778_v23, %v4927_v36  ;;  %v4953_v9 = vld [vmem:[%s6123_s20 + $0x294] sm:$0xf0]  ;;  %v5014_v11 = vld [vmem:[%s6123_s20 + $0x300] sm:$0xf] }
 0x155   : > { %v5039_v56 = vor.u32 %v5805_v63, %v5038_v61  ;;  %v5799_v16 = vld [vmem:[%s6123_s20 + $0x308] sm:$0xf0]  ;;  %v5798_v0 = vld [vmem:[%s6123_s20 + $0x304] sm:$0xf]  ;;  %v5016_v45 = vld [vmem:[%s6123_s20 + $0x30c] sm:$0xf0] }
 0x156   : > { %2434 = vmatpush.bf16.msra.mxu3 %v4810_v48  ;;  %4798 = vmatmul.msk.bf16.vlgmr.msra.gmra.mxu0 %vm1986_vm5, %v7151_v51  ;;  %v4893_v51 = vor.u32 %v5768_v15, %v4890_v10  ;;  %v4980_v48 = vor.u32 %v5789_v58, %v4977_v55  ;;  %v4959_v15 = vld [vmem:[%s6123_s20 + $0x290] sm:$0xf]  ;;  %v5785_v10 = vld [vmem:[%s6123_s20 + $0x298] sm:$0xf0]  ;;  %v5780_v41 = vld [vmem:[%s6123_s20 + $0x274] sm:$0xf] }
 0x157   : > { %2550 = vmatpush.bf16.msrb.mxu0 %v4913_v4  ;;  %4859 = vmatmul.msk.bf16.vlgmr.msra.gmra.mxu1 %vm1986_vm5, %v2317_v6  ;;  %v4984_v4 = vor.u32 %v5791_v49, %v4983_v2  ;;  %v4941_v34 = vld [vmem:[%s6123_s20 + $0x27c] sm:$0xf0]  ;;  %v4947_v30 = vld [vmem:[%s6123_s20 + $0x278] sm:$0xf]  ;;  %v5782_v62 = vld [vmem:[%s6123_s20 + $0x280] sm:$0xf0] }
 0x158   : > { %2563 = vmatpush.bf16.msrb.mxu1 %v4917_v7  ;;  %2576 = vmatpush.bf16.msrb.mxu2 %v4921_v37  ;;  %v2463_v7 = vrot.slane %v7108_v22, 2  ;;  %v5043_v37 = vor.u32 %v5804_v20, %v5040_v29  ;;  %v5002_v47 = vld [vmem:[%s6123_s20 + $0x2e8] sm:$0xf]  ;;  %v5796_v32 = vld [vmem:[%s6123_s20 + $0x2f0] sm:$0xf0] }
 0x159   : > { %4860 = vmatmul.msk.bf16.vlgmr.msra.gmra.mxu2 %vm1986_vm5, %v2317_v6  ;;  %4861 = vmatmul.msk.bf16.vlgmr.msra.gmra.mxu3 %vm1986_vm5, %v2317_v6  ;;  %v5786_v6 = vld [vmem:[%s6123_s20 + $0x2a4] sm:$0xf]  ;;  %v5795_v54 = vld [vmem:[%s6123_s20 + $0x2ec] sm:$0xf]  ;;  %v5004_v38 = vld [vmem:[%s6123_s20 + $0x2f4] sm:$0xf0] }
 0x15a   : > { %2696 = vmatpush.bf16.msrb.mxu3 %v4976_v3  ;;  %v4971_v3 = vld [vmem:[%s6123_s20 + $0x2a8] sm:$0xf]  ;;  %v5777_v21 = vld [vmem:[%s6123_s20 + $0x25c] sm:$0xf]  ;;  %v4935_v59 = vld [vmem:[%s6123_s20 + $0x260] sm:$0xf] }
 0x15b   : > { %2551 = vmatpush.bf16.msrb.mxu0 %v4901_v13  ;;  %v4968_v13 = vor.u32 %v5786_v6, %v4965_v24  ;;  %v4929_v27 = vld [vmem:[%s6123_s20 + $0x264] sm:$0xf0]  ;;  %v5779_v28 = vld [vmem:[%s6123_s20 + $0x268] sm:$0xf0]  ;;  %v4990_v53 = vld [vmem:[%s6123_s20 + $0x2d0] sm:$0xf] }
 0x15c   : > { %2564 = vmatpush.bf16.msrb.mxu1 %v4905_v52  ;;  %2577 = vmatpush.bf16.msrb.mxu2 %v4909_v14  ;;  %v4972_v52 = vor.u32 %v5788_v57, %v4971_v3  ;;  %v5027_v14 = vor.u32 %v5802_v25, %v5026_v1  ;;  %v5793_v60 = vld [vmem:[%s6123_s20 + $0x2d8] sm:$0xf0]  ;;  %v5792_v36 = vld [vmem:[%s6123_s20 + $0x2d4] sm:$0xf]  ;;  %v4992_v23 = vld [vmem:[%s6123_s20 + $0x2dc] sm:$0xf0] }
 0x15d   : > { %v5046_v58 = vld [vmem:[%s6123_s20 + $0x338] sm:$0xf]  ;;  %v5806_v55 = vld [vmem:[%s6123_s20 + $0x340] sm:$0xf0]  ;;  %v5101_v2 = vld [vmem:[%s6123_s20 + $0x3a8] sm:$0xf] }
 0x15e   : > { %2697 = vmatpush.bf16.msrb.mxu3 %v4964_v31  ;;  %v5031_v31 = vor.u32 %v5801_v19, %v5028_v8  ;;  %v5820_v49 = vld [vmem:[%s6123_s20 + $0x3b0] sm:$0xf0]  ;;  %v5819_v61 = vld [vmem:[%s6123_s20 + $0x3ac] sm:$0xf]  ;;  %v5103_v63 = vld [vmem:[%s6123_s20 + $0x3b4] sm:$0xf0] }
 0x15f   : > { %2552 = vmatpush.bf16.msrb.mxu0 %v4889_v40  ;;  %v4956_v40 = vor.u32 %v5783_v50, %v4953_v9  ;;  %v5109_v20 = vld [vmem:[%s6123_s20 + $0x3b0] sm:$0xf]  ;;  %v5821_v29 = vld [vmem:[%s6123_s20 + $0x3b8] sm:$0xf0]  ;;  %v5803_v6 = vld [vmem:[%s6123_s20 + $0x328] sm:$0xf0]  ;;  %v5106_v24 = vor.u32 %v5819_v61, %v5103_v63 }
 0x160   : > { %2565 = vmatpush.bf16.msrb.mxu1 %v4893_v51  ;;  %2578 = vmatpush.bf16.msrb.mxu2 %v4897_v18  ;;  %v4960_v51 = vor.u32 %v5785_v10, %v4959_v15  ;;  %v5015_v18 = vor.u32 %v5799_v16, %v5014_v11  ;;  %v5817_v3 = vld [vmem:[%s6123_s20 + $0x398] sm:$0xf0]  ;;  %v5816_v57 = vld [vmem:[%s6123_s20 + $0x394] sm:$0xf]  ;;  %v5091_v1 = vld [vmem:[%s6123_s20 + $0x39c] sm:$0xf0] }
 0x161   : > { %v5097_v25 = vld [vmem:[%s6123_s20 + $0x398] sm:$0xf]  ;;  %v5818_v19 = vld [vmem:[%s6123_s20 + $0x3a0] sm:$0xf0]  ;;  %v7305_v8 = vrot.slane %v7108_v22, 3 }
 0x162   : > { %2698 = vmatpush.bf16.msrb.mxu3 %v4952_v5  ;;  %v5019_v5 = vor.u32 %v5798_v0, %v5016_v45  ;;  %v5022_v50 = vld [vmem:[%s6123_s20 + $0x308] sm:$0xf]  ;;  %v5800_v9 = vld [vmem:[%s6123_s20 + $0x310] sm:$0xf0]  ;;  %v5077_v15 = vld [vmem:[%s6123_s20 + $0x378] sm:$0xf] }
 0x163   : > { %2553 = vmatpush.bf16.msrb.mxu0 %v4877_v35  ;;  %v4944_v35 = vor.u32 %v5780_v41, %v4941_v34  ;;  %v5814_v10 = vld [vmem:[%s6123_s20 + $0x380] sm:$0xf0]  ;;  %v5813_v11 = vld [vmem:[%s6123_s20 + $0x37c] sm:$0xf]  ;;  %v5079_v22 = vld [vmem:[%s6123_s20 + $0x384] sm:$0xf0]  ;;  %v5023_v45 = vor.u32 %v5800_v9, %v5022_v50 }
 0x164   : > { %2566 = vmatpush.bf16.msrb.mxu1 %v4881_v42  ;;  %2579 = vmatpush.bf16.msrb.mxu2 %v4885_v33  ;;  %v4948_v42 = vor.u32 %v5782_v62, %v4947_v30  ;;  %v5003_v33 = vor.u32 %v5796_v32, %v5002_v47  ;;  %v5085_v16 = vld [vmem:[%s6123_s20 + $0x380] sm:$0xf]  ;;  %v5815_v0 = vld [vmem:[%s6123_s20 + $0x388] sm:$0xf0]  ;;  %v5082_v41 = vor.u32 %v5813_v11, %v5079_v22  ;;  %v5810_v30 = vld [vmem:[%s6123_s20 + $0x364] sm:$0xf] }
 0x165   : > { %v5086_v34 = vor.u32 %v5815_v0, %v5085_v16  ;;  %v5067_v62 = vld [vmem:[%s6123_s20 + $0x36c] sm:$0xf0]  ;;  %v5073_v47 = vld [vmem:[%s6123_s20 + $0x368] sm:$0xf]  ;;  %v5812_v32 = vld [vmem:[%s6123_s20 + $0x370] sm:$0xf0] }
 0x166   : > { %2699 = vmatpush.bf16.msrb.mxu3 %v4940_v46  ;;  %v5007_v46 = vor.u32 %v5795_v54, %v5004_v38  ;;  %v4998_v54 = vld [vmem:[%s6123_s20 + $0x2d8] sm:$0xf]  ;;  %v5850_v63 = vld [vmem:[%s6123_s20 + $0x4a0] sm:$0xf0]  ;;  %v5828_v50 = vld [vmem:[%s6123_s20 + $0x3f4] sm:$0xf] }
 0x167   : > { %2554 = vmatpush.bf16.msrb.mxu0 %v4865_v43  ;;  %v4932_v43 = vor.u32 %v5777_v21, %v4929_v27  ;;  %v5808_v27 = vld [vmem:[%s6123_s20 + $0x350] sm:$0xf0]  ;;  %v5203_v11 = vld [vmem:[%s6123_s20 + $0x468] sm:$0xf] }
 0x168   : > { %2567 = vmatpush.bf16.msrb.mxu1 %v4869_v26  ;;  %2580 = vmatpush.bf16.msrb.mxu2 %v4873_v39  ;;  %v4936_v26 = vor.u32 %v5779_v28, %v4935_v59  ;;  %v4991_v39 = vor.u32 %v5793_v60, %v4990_v53  ;;  %v5070_v59 = vor.u32 %v5810_v30, %v5067_v62  ;;  %v5061_v53 = vld [vmem:[%s6123_s20 + $0x350] sm:$0xf]  ;;  %v5809_v60 = vld [vmem:[%s6123_s20 + $0x358] sm:$0xf0]  ;;  %v5844_v22 = vld [vmem:[%s6123_s20 + $0x470] sm:$0xf0] }
 0x169   : > { %v5074_v28 = vor.u32 %v5812_v32, %v5073_v47  ;;  %v1857_v16 = vld [vmem:[%s7092_s16 + $0x8] sm:$0xff]  ;;  %v5191_v62 = vld [vmem:[%s6123_s20 + $0x450] sm:$0xf]  ;;  %v5841_v47 = vld [vmem:[%s6123_s20 + $0x458] sm:$0xf0] }
 0x16a   : > { %2700 = vmatpush.bf16.msrb.mxu3 %v4928_v44  ;;  %4922 = vmatmul.msk.bf16.vlgmr.msrb.gmra.mxu0 %vm1986_vm5, %v2463_v7  ;;  %v4995_v44 = vor.u32 %v5792_v36, %v4992_v23  ;;  %v5164_v36 = vld [vmem:[%s6123_s20 + $0x420] sm:$0xf]  ;;  %v5835_v23 = vld [vmem:[%s6123_s20 + $0x428] sm:$0xf0] }
 0x16b   : > { %2709 = vmatpush.bf16.msra.mxu0 %v4980_v48  ;;  %4923 = vmatmul.msk.bf16.vlgmr.msrb.gmra.mxu1 %vm1986_vm5, %v2463_v7  ;;  %v5047_v48 = vor.u32 %v5806_v55, %v5046_v58  ;;  %v5834_v58 = vld [vmem:[%s6123_s20 + $0x424] sm:$0xf]  ;;  %v5166_v55 = vld [vmem:[%s6123_s20 + $0x42c] sm:$0xf0]  ;;  %v5827_v30 = vld [vmem:[%s6123_s20 + $0x3e8] sm:$0xf0] }
 0x16c   : > { %2722 = vmatpush.bf16.msra.mxu1 %v4984_v4  ;;  %2842 = vmatpush.bf16.msra.mxu2 %v5039_v56  ;;  %v5102_v4 = vor.u32 %v5820_v49, %v5101_v2  ;;  %v5110_v56 = vor.u32 %v5821_v29, %v5109_v20  ;;  %v5172_v2 = vld [vmem:[%s6123_s20 + $0x428] sm:$0xf]  ;;  %v5062_v29 = vor.u32 %v5809_v60, %v5061_v53  ;;  %v5116_v32 = vld [vmem:[%s6123_s20 + $0x3c0] sm:$0xf]  ;;  %v5838_v60 = vld [vmem:[%s6123_s20 + $0x440] sm:$0xf0] }
 0x16d   : > { %4924 = vmatmul.msk.bf16.vlgmr.msrb.gmra.mxu2 %vm1986_vm5, %v2463_v7  ;;  %4985 = vmatmul.msk.bf16.vlgmr.msrb.gmra.mxu3 %vm1986_vm5, %v7257_v12  ;;  %v5034_v7 = vld [vmem:[%s6123_s20 + $0x320] sm:$0xf] }
 0x16e   : > { %2855 = vmatpush.bf16.msra.mxu3 %v5043_v37  ;;  %v5089_v37 = vld [vmem:[%s6123_s20 + $0x390] sm:$0xf] }
 0x16f   : > { %2710 = vmatpush.bf16.msra.mxu0 %v4968_v13  ;;  %v5035_v13 = vor.u32 %v5803_v6, %v5034_v7  ;;  %v5832_v7 = vld [vmem:[%s6123_s20 + $0x410] sm:$0xf0] }
 0x170   : > { %2723 = vmatpush.bf16.msra.mxu1 %v4972_v52  ;;  %2843 = vmatpush.bf16.msra.mxu2 %v5027_v14  ;;  %v5090_v52 = vor.u32 %v5817_v3, %v5089_v37  ;;  %v5094_v14 = vor.u32 %v5816_v57, %v5091_v1  ;;  %v5154_v37 = vld [vmem:[%s6123_s20 + $0x414] sm:$0xf0]  ;;  %v5160_v3 = vld [vmem:[%s6123_s20 + $0x410] sm:$0xf]  ;;  %v5833_v57 = vld [vmem:[%s6123_s20 + $0x418] sm:$0xf0] }
 0x171   : > { %v5215_v1 = vld [vmem:[%s6123_s20 + $0x480] sm:$0xf]  ;;  %v5161_v9 = vor.u32 %v5833_v57, %v5160_v3  ;;  %v5278_v3 = vld [vmem:[%s6123_s20 + $0x4f8] sm:$0xf]  ;;  %v5862_v57 = vld [vmem:[%s6123_s20 + $0x500] sm:$0xf0] }
 0x172   : > { %2856 = vmatpush.bf16.msra.mxu3 %v5031_v31  ;;  %v5098_v31 = vor.u32 %v5818_v19, %v5097_v25  ;;  %v5847_v25 = vld [vmem:[%s6123_s20 + $0x488] sm:$0xf0] }
 0x173   : > { %2711 = vmatpush.bf16.msra.mxu0 %v4956_v40  ;;  %v5010_v40 = vld [vmem:[%s6123_s20 + $0x2f0] sm:$0xf] }
 0x174   : > { %2724 = vmatpush.bf16.msra.mxu1 %v4960_v51  ;;  %2844 = vmatpush.bf16.msra.mxu2 %v5015_v18  ;;  %v5797_v51 = vld [vmem:[%s6123_s20 + $0x2f8] sm:$0xf0]  ;;  %v5065_v18 = vld [vmem:[%s6123_s20 + $0x360] sm:$0xf] }
 0x175   : > { %v5011_v38 = vor.u32 %v5797_v51, %v5010_v40  ;;  %v5204_v51 = vor.u32 %v5844_v22, %v5203_v11  ;;  %v5859_v11 = vld [vmem:[%s6123_s20 + $0x4e8] sm:$0xf0]  ;;  %v5858_v22 = vld [vmem:[%s6123_s20 + $0x4e4] sm:$0xf] }
 0x176   : > { %2857 = vmatpush.bf16.msra.mxu3 %v5019_v5  ;;  %v5811_v5 = vld [vmem:[%s6123_s20 + $0x368] sm:$0xf0] }
 0x177   : > { %2712 = vmatpush.bf16.msra.mxu0 %v4944_v35  ;;  %v5066_v21 = vor.u32 %v5811_v5, %v5065_v18  ;;  %v5794_v35 = vld [vmem:[%s6123_s20 + $0x2e0] sm:$0xf0]  ;;  %v5136_v18 = vld [vmem:[%s6123_s20 + $0x3e0] sm:$0xf]  ;;  %v7375_v5 = vpack.c.bf16 %v1857_v16, %v1857_v16  ;;  %v5268_v16 = vld [vmem:[%s6123_s20 + $0x4ec] sm:$0xf0] }
 0x178   : > { %2725 = vmatpush.bf16.msra.mxu1 %v4948_v42  ;;  %2845 = vmatpush.bf16.msra.mxu2 %v5003_v33  ;;  %v5053_v42 = vld [vmem:[%s6123_s20 + $0x348] sm:$0xf]  ;;  %v5807_v33 = vld [vmem:[%s6123_s20 + $0x34c] sm:$0xf]  ;;  %v4999_v49 = vor.u32 %v5794_v35, %v4998_v54  ;;  %v5822_v35 = vld [vmem:[%s6123_s20 + $0x3c4] sm:$0xf] }
 0x179   : > { %v5054_v61 = vor.u32 %v5808_v27, %v5053_v42  ;;  %v5118_v42 = vld [vmem:[%s6123_s20 + $0x3cc] sm:$0xf0]  ;;  %v5137_v27 = vor.u32 %v5827_v30, %v5136_v18  ;;  %v3193_v53 = vunpack.c.l.b16 %v7375_v5  ;;  %v5254_v18 = vld [vmem:[%s6123_s20 + $0x4c8] sm:$0xf]  ;;  %v5855_v30 = vld [vmem:[%s6123_s20 + $0x4cc] sm:$0xf] }
 0x17a   : > { %2858 = vmatpush.bf16.msra.mxu3 %v5007_v46  ;;  %v5055_v46 = vld [vmem:[%s6123_s20 + $0x354] sm:$0xf0] }
 0x17b   : > { %2713 = vmatpush.bf16.msra.mxu0 %v4932_v43  ;;  %v5836_v43 = vld [vmem:[%s6123_s20 + $0x430] sm:$0xf0]  ;;  %v5058_v20 = vor.u32 %v5807_v33, %v5055_v46  ;;  %v5179_v46 = vld [vmem:[%s6123_s20 + $0x438] sm:$0xf] }
 0x17c   : > { %2726 = vmatpush.bf16.msra.mxu1 %v4936_v26  ;;  %2846 = vmatpush.bf16.msra.mxu2 %v4991_v39  ;;  %v5227_v26 = vld [vmem:[%s6123_s20 + $0x498] sm:$0xf]  ;;  %v5165_v39 = vor.u32 %v5835_v23, %v5164_v36  ;;  %v5173_v6 = vor.u32 %v5836_v43, %v5172_v2  ;;  %v5824_v33 = vld [vmem:[%s6123_s20 + $0x3d0] sm:$0xf0]  ;;  %v5849_v36 = vld [vmem:[%s6123_s20 + $0x49c] sm:$0xf] }
 0x17d   : > { %v5229_v23 = vld [vmem:[%s6123_s20 + $0x4a4] sm:$0xf0]  ;;  %v5290_v2 = vld [vmem:[%s6123_s20 + $0x510] sm:$0xf]  ;;  %v5865_v43 = vld [vmem:[%s6123_s20 + $0x518] sm:$0xf0] }
 0x17e   : > { %2859 = vmatpush.bf16.msra.mxu3 %v4995_v44  ;;  %4986 = vmatmul.msk.bf16.vlgmr.msra.gmra.mxu0 %vm1986_vm5, %v7257_v12  ;;  %v5169_v44 = vor.u32 %v5834_v58, %v5166_v55  ;;  %v5235_v58 = vld [vmem:[%s6123_s20 + $0x4a0] sm:$0xf]  ;;  %v5851_v55 = vld [vmem:[%s6123_s20 + $0x4a8] sm:$0xf0] }
 0x17f   : > { %2868 = vmatpush.bf16.msrb.mxu0 %v5047_v48  ;;  %4987 = vmatmul.msk.bf16.vlgmr.msra.gmra.mxu1 %vm1986_vm5, %v7257_v12  ;;  %v5078_v12 = vor.u32 %v5814_v10, %v5077_v15  ;;  %v2901_v48 = vrot.slane %v7116_v17, 3  ;;  %v5148_v15 = vld [vmem:[%s6123_s20 + $0x3f8] sm:$0xf]  ;;  %v5830_v10 = vld [vmem:[%s6123_s20 + $0x400] sm:$0xf0] }
 0x180   : > { %2988 = vmatpush.bf16.msrb.mxu1 %v5102_v4  ;;  %3001 = vmatpush.bf16.msrb.mxu2 %v5106_v24  ;;  %v5152_v4 = vld [vmem:[%s6123_s20 + $0x408] sm:$0xf]  ;;  %v5228_v24 = vor.u32 %v5850_v63, %v5227_v26  ;;  %v5149_v40 = vor.u32 %v5830_v10, %v5148_v15  ;;  %v5864_v26 = vld [vmem:[%s6123_s20 + $0x514] sm:$0xf]  ;;  %v5292_v63 = vld [vmem:[%s6123_s20 + $0x51c] sm:$0xf0] }
 0x181   : > { %5048 = vmatmul.msk.bf16.vlgmr.msra.gmra.mxu2 %vm1986_vm5, %v7305_v8  ;;  %5049 = vmatmul.msk.bf16.vlgmr.msra.gmra.mxu3 %vm1986_vm5, %v7305_v8  ;;  %v5153_v17 = vor.u32 %v5832_v7, %v5152_v4  ;;  %v5846_v4 = vld [vmem:[%s6123_s20 + $0x484] sm:$0xf]  ;;  %v5217_v7 = vld [vmem:[%s6123_s20 + $0x48c] sm:$0xf0]  ;;  %v5845_v15 = vld [vmem:[%s6123_s20 + $0x478] sm:$0xf0] }
 0x182   : > { %3014 = vmatpush.bf16.msrb.mxu3 %v5110_v56  ;;  %v5831_v56 = vld [vmem:[%s6123_s20 + $0x40c] sm:$0xf]  ;;  %v5266_v10 = vld [vmem:[%s6123_s20 + $0x4e0] sm:$0xf] }
 0x183   : > { %2869 = vmatpush.bf16.msrb.mxu0 %v5035_v13  ;;  %v5157_v19 = vor.u32 %v5831_v56, %v5154_v37  ;;  %v5140_v13 = vld [vmem:[%s6123_s20 + $0x3f0] sm:$0xf]  ;;  %v5223_v56 = vld [vmem:[%s6123_s20 + $0x488] sm:$0xf]  ;;  %v5848_v37 = vld [vmem:[%s6123_s20 + $0x490] sm:$0xf0] }
 0x184   : > { %2989 = vmatpush.bf16.msrb.mxu1 %v5090_v52  ;;  %3002 = vmatpush.bf16.msrb.mxu2 %v5094_v14  ;;  %v5829_v52 = vld [vmem:[%s6123_s20 + $0x3f8] sm:$0xf0]  ;;  %v5216_v14 = vor.u32 %v5847_v25, %v5215_v1  ;;  %v5280_v25 = vld [vmem:[%s6123_s20 + $0x504] sm:$0xf0] }
 0x185   : > { %v5141_v0 = vor.u32 %v5829_v52, %v5140_v13  ;;  %v5861_v1 = vld [vmem:[%s6123_s20 + $0x4fc] sm:$0xf]  ;;  %v5224_v13 = vor.u32 %v5848_v37, %v5223_v56  ;;  %v5843_v52 = vld [vmem:[%s6123_s20 + $0x46c] sm:$0xf]  ;;  %v5876_v56 = vld [vmem:[%s6123_s20 + $0x574] sm:$0xf] }
 0x186   : > { %3015 = vmatpush.bf16.msrb.mxu3 %v5098_v31  ;;  %v5142_v31 = vld [vmem:[%s6123_s20 + $0x3fc] sm:$0xf0] }
 0x187   : > { %2870 = vmatpush.bf16.msrb.mxu0 %v5023_v45  ;;  %v5128_v45 = vld [vmem:[%s6123_s20 + $0x3d8] sm:$0xf]  ;;  %v5343_v37 = vld [vmem:[%s6123_s20 + $0x57c] sm:$0xf0] }
 0x188   : > { %2990 = vmatpush.bf16.msrb.mxu1 %v5078_v12  ;;  %3003 = vmatpush.bf16.msrb.mxu2 %v5082_v41  ;;  %v5826_v12 = vld [vmem:[%s6123_s20 + $0x3e0] sm:$0xf0]  ;;  %v5825_v41 = vld [vmem:[%s6123_s20 + $0x3dc] sm:$0xf] }
 0x189   : > { %v5129_v54 = vor.u32 %v5826_v12, %v5128_v45  ;;  %v5840_v45 = vld [vmem:[%s6123_s20 + $0x454] sm:$0xf]  ;;  %v5193_v12 = vld [vmem:[%s6123_s20 + $0x45c] sm:$0xf0] }
 0x18a   : > { %3016 = vmatpush.bf16.msrb.mxu3 %v5086_v34  ;;  %v5130_v34 = vld [vmem:[%s6123_s20 + $0x3e4] sm:$0xf0] }
 0x18b   : > { %2871 = vmatpush.bf16.msrb.mxu0 %v5011_v38  ;;  %v5133_v38 = vor.u32 %v5825_v41, %v5130_v34  ;;  %v5199_v41 = vld [vmem:[%s6123_s20 + $0x458] sm:$0xf]  ;;  %v5842_v34 = vld [vmem:[%s6123_s20 + $0x460] sm:$0xf0] }
 0x18c   : > { %2991 = vmatpush.bf16.msrb.mxu1 %v5066_v21  ;;  %3004 = vmatpush.bf16.msrb.mxu2 %v5070_v59  ;;  %v5823_v21 = vld [vmem:[%s6123_s20 + $0x3c8] sm:$0xf0]  ;;  %v5192_v59 = vor.u32 %v5841_v47, %v5191_v62  ;;  %v5256_v62 = vld [vmem:[%s6123_s20 + $0x4d4] sm:$0xf0]  ;;  %v5837_v47 = vld [vmem:[%s6123_s20 + $0x43c] sm:$0xf] }
 0x18e   : > { %3017 = vmatpush.bf16.msrb.mxu3 %v5074_v28  ;;  %v5124_v28 = vld [vmem:[%s6123_s20 + $0x3c8] sm:$0xf] }
 0x18f   : > { %2872 = vmatpush.bf16.msrb.mxu0 %v4999_v49  ;;  %v5117_v49 = vor.u32 %v5823_v21, %v5116_v32  ;;  %v5196_v32 = vor.u32 %v5840_v45, %v5193_v12  ;;  %v5187_v21 = vld [vmem:[%s6123_s20 + $0x440] sm:$0xf]  ;;  %v5262_v12 = vld [vmem:[%s6123_s20 + $0x4d0] sm:$0xf] }
 0x190   : > { %2992 = vmatpush.bf16.msrb.mxu1 %v5054_v61  ;;  %3005 = vmatpush.bf16.msrb.mxu2 %v5058_v20  ;;  %v5121_v61 = vor.u32 %v5822_v35, %v5118_v42  ;;  %v5125_v20 = vor.u32 %v5824_v33, %v5124_v28  ;;  %v5839_v35 = vld [vmem:[%s6123_s20 + $0x448] sm:$0xf0]  ;;  %v5853_v28 = vld [vmem:[%s6123_s20 + $0x4b8] sm:$0xf0]  ;;  %v5852_v33 = vld [vmem:[%s6123_s20 + $0x4b4] sm:$0xf] }
 0x192   : > { %3018 = vmatpush.bf16.msrb.mxu3 %v5062_v29  ;;  %5050 = vmatmul.msk.bf16.vlgmr.msrb.gmra.mxu0 %vm1986_vm5, %v7305_v8  ;;  %v5145_v8 = vor.u32 %v5828_v50, %v5142_v31  ;;  %v5180_v29 = vor.u32 %v5838_v60, %v5179_v46  ;;  %v5205_v50 = vld [vmem:[%s6123_s20 + $0x474] sm:$0xf0]  ;;  %v5211_v31 = vld [vmem:[%s6123_s20 + $0x470] sm:$0xf]  ;;  %v5244_v46 = vld [vmem:[%s6123_s20 + $0x4bc] sm:$0xf0] }
 0x193   : > { %3133 = vmatpush.bf16.msra.mxu0 %v5165_v39  ;;  %5111 = vmatmul.msk.bf16.vlgmr.msrb.gmra.mxu1 %vm1986_vm5, %v2901_v48  ;;  %v7397_v39 = vpack.c.b16 %v3193_v53, %v3193_v53  ;;  %v5298_v53 = vld [vmem:[%s6123_s20 + $0x518] sm:$0xf]  ;;  %v5866_v60 = vld [vmem:[%s6123_s20 + $0x520] sm:$0xf0] }
 0x194   : > { %3146 = vmatpush.bf16.msra.mxu1 %v5169_v44  ;;  %3159 = vmatpush.bf16.msra.mxu2 %v5173_v6  ;;  %v5232_v44 = vor.u32 %v5849_v36, %v5229_v23  ;;  %v5291_v6 = vor.u32 %v5865_v43, %v5290_v2  ;;  %v5353_v36 = vld [vmem:[%s6123_s20 + $0x588] sm:$0xf]  ;;  %v5880_v23 = vld [vmem:[%s6123_s20 + $0x590] sm:$0xf0]  ;;  %v5188_v2 = vor.u32 %v5839_v35, %v5187_v21  ;;  %v5881_v43 = vld [vmem:[%s6123_s20 + $0x598] sm:$0xf0] }
 0x195   : > { %5112 = vmatmul.msk.bf16.vlgmr.msrb.gmra.mxu2 %vm1986_vm5, %v2901_v48  ;;  %5113 = vmatmul.msk.bf16.vlgmr.msrb.gmra.mxu3 %vm1986_vm5, %v2901_v48  ;;  %v5236_v48 = vor.u32 %v5851_v55, %v5235_v58  ;;  %v5879_v58 = vld [vmem:[%s6123_s20 + $0x58c] sm:$0xf] }
 0x196   : > { %3284 = vmatpush.bf16.msra.mxu3 %v5228_v24  ;;  %v5295_v24 = vor.u32 %v5864_v26, %v5292_v63  ;;  %v5247_v63 = vor.u32 %v5852_v33, %v5244_v46 }
 0x197   : > { %3134 = vmatpush.bf16.msra.mxu0 %v5153_v17  ;;  %v7408_v17 = vshrl.u32 %v7397_v39, 16 }
 0x198   : > { %3147 = vmatpush.bf16.msra.mxu1 %v5157_v19  ;;  %3160 = vmatpush.bf16.msra.mxu2 %v5161_v9  ;;  %v5220_v19 = vor.u32 %v5846_v4, %v5217_v7  ;;  %v5279_v9 = vor.u32 %v5862_v57, %v5278_v3  ;;  %v5349_v3 = vld [vmem:[%s6123_s20 + $0x578] sm:$0xf]  ;;  %v5878_v57 = vld [vmem:[%s6123_s20 + $0x580] sm:$0xf0] }
 0x19a   : > { %3285 = vmatpush.bf16.msra.mxu3 %v5216_v14  ;;  %v5283_v14 = vor.u32 %v5861_v1, %v5280_v25  ;;  %v7459_v1 = vrot.slane %v7397_v39, 1 }
 0x19b   : > { %3135 = vmatpush.bf16.msra.mxu0 %v5141_v0  ;;  %v5208_v0 = vor.u32 %v5843_v52, %v5205_v50  ;;  %v5860_v52 = vld [vmem:[%s6123_s20 + $0x4f0] sm:$0xf0]  ;;  %v5346_v50 = vor.u32 %v5876_v56, %v5343_v37  ;;  %v3489_v56 = vrot.slane %v7408_v17, 1  ;;  %v5404_v37 = vld [vmem:[%s6123_s20 + $0x5e8] sm:$0xf] }
 0x19c   : > { %3148 = vmatpush.bf16.msra.mxu1 %v5145_v8  ;;  %3161 = vmatpush.bf16.msra.mxu2 %v5149_v40  ;;  %v5212_v8 = vor.u32 %v5845_v15, %v5211_v31  ;;  %v5267_v40 = vor.u32 %v5859_v11, %v5266_v10  ;;  %v5874_v31 = vld [vmem:[%s6123_s20 + $0x560] sm:$0xf0]  ;;  %v5873_v15 = vld [vmem:[%s6123_s20 + $0x55c] sm:$0xf]  ;;  %v5331_v10 = vld [vmem:[%s6123_s20 + $0x564] sm:$0xf0] }
 0x19d   : > { %v5337_v11 = vld [vmem:[%s6123_s20 + $0x560] sm:$0xf] }
 0x19e   : > { %3286 = vmatpush.bf16.msra.mxu3 %v5204_v51  ;;  %v5271_v51 = vor.u32 %v5858_v22, %v5268_v16  ;;  %v5875_v22 = vld [vmem:[%s6123_s20 + $0x568] sm:$0xf0] }
 0x19f   : > { %3136 = vmatpush.bf16.msra.mxu0 %v5129_v54  ;;  %v5200_v54 = vor.u32 %v5842_v34, %v5199_v41  ;;  %v5338_v41 = vor.u32 %v5875_v22, %v5337_v11  ;;  %v5317_v34 = vld [vmem:[%s6123_s20 + $0x540] sm:$0xf]  ;;  %v5392_v22 = vld [vmem:[%s6123_s20 + $0x5d0] sm:$0xf] }
 0x1a0   : > { %3149 = vmatpush.bf16.msra.mxu1 %v5133_v38  ;;  %3162 = vmatpush.bf16.msra.mxu2 %v5137_v27  ;;  %v5181_v38 = vld [vmem:[%s6123_s20 + $0x444] sm:$0xf0]  ;;  %v5259_v27 = vor.u32 %v5855_v30, %v5256_v62  ;;  %v5319_v30 = vld [vmem:[%s6123_s20 + $0x54c] sm:$0xf0] }
 0x1a1   : > { %v5184_v55 = vor.u32 %v5837_v47, %v5181_v38  ;;  %v5325_v62 = vld [vmem:[%s6123_s20 + $0x548] sm:$0xf]  ;;  %v5872_v47 = vld [vmem:[%s6123_s20 + $0x550] sm:$0xf0]  ;;  %v5250_v38 = vld [vmem:[%s6123_s20 + $0x4b8] sm:$0xf] }
 0x1a2   : > { %3287 = vmatpush.bf16.msra.mxu3 %v5192_v59  ;;  %v5242_v59 = vld [vmem:[%s6123_s20 + $0x4b0] sm:$0xf]  ;;  %v5326_v33 = vor.u32 %v5872_v47, %v5325_v62 }
 0x1a3   : > { %3137 = vmatpush.bf16.msra.mxu0 %v5117_v49  ;;  %v5355_v49 = vld [vmem:[%s6123_s20 + $0x594] sm:$0xf0]  ;;  %v5243_v26 = vor.u32 %v5853_v28, %v5242_v59  ;;  %v5868_v59 = vld [vmem:[%s6123_s20 + $0x530] sm:$0xf0] }
 0x1a4   : > { %3150 = vmatpush.bf16.msra.mxu1 %v5121_v61  ;;  %3163 = vmatpush.bf16.msra.mxu2 %v5125_v20  ;;  %v5361_v61 = vld [vmem:[%s6123_s20 + $0x590] sm:$0xf]  ;;  %v5299_v20 = vor.u32 %v5866_v60, %v5298_v53  ;;  %v5358_v4 = vor.u32 %v5879_v58, %v5355_v49  ;;  %v5867_v53 = vld [vmem:[%s6123_s20 + $0x52c] sm:$0xf]  ;;  %v5307_v60 = vld [vmem:[%s6123_s20 + $0x534] sm:$0xf0] }
 0x1a5   : > { %v5362_v7 = vor.u32 %v5881_v43, %v5361_v61  ;;  %v5416_v58 = vld [vmem:[%s6123_s20 + $0x600] sm:$0xf]  ;;  %v5894_v49 = vld [vmem:[%s6123_s20 + $0x604] sm:$0xf]  ;;  %v5418_v61 = vld [vmem:[%s6123_s20 + $0x60c] sm:$0xf0] }
 0x1a6   : > { %3288 = vmatpush.bf16.msra.mxu3 %v5180_v29  ;;  %5174 = vmatmul.msk.bf16.vlgmr.msra.gmra.mxu0 %vm1986_vm5, %v7375_v5  ;;  %v5354_v29 = vor.u32 %v5880_v23, %v5353_v36  ;;  %v5313_v36 = vld [vmem:[%s6123_s20 + $0x530] sm:$0xf]  ;;  %v5869_v23 = vld [vmem:[%s6123_s20 + $0x538] sm:$0xf0]  ;;  %v5424_v43 = vld [vmem:[%s6123_s20 + $0x608] sm:$0xf] }
 0x1a7   : > { %3297 = vmatpush.bf16.msrb.mxu0 %v5232_v44  ;;  %5175 = vmatmul.msk.bf16.vlgmr.msra.gmra.mxu1 %vm1986_vm5, %v7375_v5  ;;  %v5286_v44 = vld [vmem:[%s6123_s20 + $0x500] sm:$0xf] }
 0x1a8   : > { %3310 = vmatpush.bf16.msrb.mxu1 %v5236_v48  ;;  %3430 = vmatpush.bf16.msrb.mxu2 %v5291_v6  ;;  %v5863_v48 = vld [vmem:[%s6123_s20 + $0x508] sm:$0xf0]  ;;  %v5341_v6 = vld [vmem:[%s6123_s20 + $0x570] sm:$0xf] }
 0x1a9   : > { %5176 = vmatmul.msk.bf16.vlgmr.msra.gmra.mxu2 %vm1986_vm5, %v7375_v5  ;;  %5237 = vmatmul.msk.bf16.vlgmr.msra.gmra.mxu3 %vm1986_vm5, %v7408_v17  ;;  %v5856_v5 = vld [vmem:[%s6123_s20 + $0x4d0] sm:$0xf0]  ;;  %v5287_v25 = vor.u32 %v5863_v48, %v5286_v44  ;;  %v5910_v44 = vld [vmem:[%s6123_s20 + $0x680] sm:$0xf0] }
 0x1aa   : > { %3443 = vmatpush.bf16.msrb.mxu3 %v5295_v24  ;;  %v5255_v42 = vor.u32 %v5856_v5, %v5254_v18  ;;  %v5877_v24 = vld [vmem:[%s6123_s20 + $0x578] sm:$0xf0]  ;;  %v5871_v18 = vld [vmem:[%s6123_s20 + $0x548] sm:$0xf0]  ;;  %v5870_v5 = vld [vmem:[%s6123_s20 + $0x544] sm:$0xf] }
 0x1ab   : > { %3298 = vmatpush.bf16.msrb.mxu0 %v5220_v19  ;;  %v5342_v19 = vor.u32 %v5877_v24, %v5341_v6  ;;  %v5318_v35 = vor.u32 %v5871_v18, %v5317_v34  ;;  %v5322_v28 = vor.u32 %v5870_v5, %v5319_v30  ;;  %v5421_v24 = vor.u32 %v5894_v49, %v5418_v61  ;;  %v5890_v18 = vld [vmem:[%s6123_s20 + $0x5e0] sm:$0xf0]  ;;  %v5455_v5 = vld [vmem:[%s6123_s20 + $0x648] sm:$0xf]  ;;  %v5904_v30 = vld [vmem:[%s6123_s20 + $0x650] sm:$0xf0] }
 0x1ac   : > { %3311 = vmatpush.bf16.msrb.mxu1 %v5224_v13  ;;  %3431 = vmatpush.bf16.msrb.mxu2 %v5279_v9  ;;  %v5274_v13 = vld [vmem:[%s6123_s20 + $0x4e8] sm:$0xf]  ;;  %v5350_v9 = vor.u32 %v5878_v57, %v5349_v3  ;;  %v5892_v3 = vld [vmem:[%s6123_s20 + $0x5f0] sm:$0xf0]  ;;  %v5882_v49 = vld [vmem:[%s6123_s20 + $0x5a4] sm:$0xf] }
 0x1ad   : > { %v5370_v61 = vld [vmem:[%s6123_s20 + $0x5ac] sm:$0xf0] }
 0x1ae   : > { %3444 = vmatpush.bf16.msrb.mxu3 %v5283_v14  ;;  %v5329_v14 = vld [vmem:[%s6123_s20 + $0x558] sm:$0xf] }
 0x1af   : > { %3299 = vmatpush.bf16.msrb.mxu0 %v5208_v0  ;;  %v5275_v0 = vor.u32 %v5860_v52, %v5274_v13  ;;  %v5891_v13 = vld [vmem:[%s6123_s20 + $0x5ec] sm:$0xf]  ;;  %v5406_v52 = vld [vmem:[%s6123_s20 + $0x5f4] sm:$0xf0] }
 0x1b0   : > { %3312 = vmatpush.bf16.msrb.mxu1 %v5212_v8  ;;  %3432 = vmatpush.bf16.msrb.mxu2 %v5267_v40  ;;  %v7477_v16 = vpop.f32.mrf.mxu1  ;;  %v5330_v8 = vor.u32 %v5874_v31, %v5329_v14  ;;  %v5857_v40 = vld [vmem:[%s6123_s20 + $0x4d8] sm:$0xf0]  ;;  %v5467_v14 = vld [vmem:[%s6123_s20 + $0x660] sm:$0xf]  ;;  %v5907_v31 = vld [vmem:[%s6123_s20 + $0x668] sm:$0xf0]  ;;  %v5409_v11 = vor.u32 %v5891_v13, %v5406_v52 }
 0x1b1   : > { %v5263_v21 = vor.u32 %v5857_v40, %v5262_v12  ;;  %v5888_v40 = vld [vmem:[%s6123_s20 + $0x5d4] sm:$0xf]  ;;  %v5544_v13 = vld [vmem:[%s6123_s20 + $0x6fc] sm:$0xf0] }
 0x1b2   : > { %3445 = vmatpush.bf16.msrb.mxu3 %v5271_v51  ;;  %v1999_v45 = vpop.f32.mrf.mxu0  ;;  %v5334_v51 = vor.u32 %v5873_v15, %v5331_v10  ;;  %v5405_v10 = vor.u32 %v5892_v3, %v5404_v37  ;;  %v5542_v37 = vld [vmem:[%s6123_s20 + $0x6f0] sm:$0xf] }
 0x1b3   : > { %3300 = vmatpush.bf16.msrb.mxu0 %v5196_v32 }
 0x1b4   : > { %3313 = vmatpush.bf16.msrb.mxu1 %v5200_v54  ;;  %3433 = vmatpush.bf16.msrb.mxu2 %v5255_v42  ;;  %v5854_v42 = vld [vmem:[%s6123_s20 + $0x4c0] sm:$0xf0] }
 0x1b5   : > { %v2121_v32 = vpop.f32.mrf.mxu3 }
 0x1b6   : > { %3446 = vmatpush.bf16.msrb.mxu3 %v5259_v27  ;;  %v7487_v54 = vadd.f32 %v2121_v32, %v1999_v45  ;;  %v5305_v27 = vld [vmem:[%s6123_s20 + $0x528] sm:$0xf]  ;;  %v5468_v45 = vor.u32 %v5907_v31, %v5467_v14  ;;  %v3635_v31 = vrot.slane %v7397_v39, 2 }
 0x1b7   : > { %3301 = vmatpush.bf16.msrb.mxu0 %v5184_v55  ;;  %v5895_v55 = vld [vmem:[%s6123_s20 + $0x608] sm:$0xf0] }
 0x1b8   : > { %3314 = vmatpush.bf16.msrb.mxu1 %v5188_v2  ;;  %3434 = vmatpush.bf16.msrb.mxu2 %v5243_v26  ;;  %v2025_v46 = vpop.f32.mrf.mxu2  ;;  %v2014_v2 = vpop.f32.mrf.mxu1  ;;  %v5251_v26 = vor.u32 %v5854_v42, %v5250_v38  ;;  %v5417_v6 = vor.u32 %v5895_v55, %v5416_v58  ;;  %v5380_v38 = vld [vmem:[%s6123_s20 + $0x5b8] sm:$0xf]  ;;  %v5456_v42 = vor.u32 %v5904_v30, %v5455_v5  ;;  %v7569_v5 = vrot.slane %v7408_v17, 2 }
 0x1b9   : > { %v5883_v2 = vld [vmem:[%s6123_s20 + $0x5a8] sm:$0xf0] }
 0x1ba   : > { %3447 = vmatpush.bf16.msrb.mxu3 %v5247_v63  ;;  %5238 = vmatmul.msk.bf16.vlgmr.msrb.gmra.mxu0 %vm1986_vm5, %v7408_v17  ;;  %v5306_v63 = vor.u32 %v5868_v59, %v5305_v27  ;;  %v2001_v48 = vpop.f32.mrf.mxu0  ;;  %v5885_v27 = vld [vmem:[%s6123_s20 + $0x5bc] sm:$0xf]  ;;  %v5382_v59 = vld [vmem:[%s6123_s20 + $0x5c4] sm:$0xf0] }
 0x1bb   : > { %3456 = vmatpush.bf16.msra.mxu0 %v5299_v20  ;;  %5239 = vmatmul.msk.bf16.vlgmr.msrb.gmra.mxu1 %vm1986_vm5, %v7408_v17  ;;  %v5896_v20 = vld [vmem:[%s6123_s20 + $0x610] sm:$0xf0]  ;;  %v5898_v48 = vld [vmem:[%s6123_s20 + $0x620] sm:$0xf0] }
 0x1bc   : > { %3576 = vmatpush.bf16.msra.mxu1 %v5354_v29  ;;  %3589 = vmatpush.bf16.msra.mxu2 %v5358_v4  ;;  %v5479_v29 = vld [vmem:[%s6123_s20 + $0x678] sm:$0xf]  ;;  %v5310_v4 = vor.u32 %v5867_v53, %v5307_v60  ;;  %v5368_v60 = vld [vmem:[%s6123_s20 + $0x5a0] sm:$0xf] }
 0x1bd   : > { %5300 = vmatmul.msk.bf16.vlgmr.msrb.gmra.mxu2 %vm1986_vm5, %v7459_v1  ;;  %5301 = vmatmul.msk.bf16.vlgmr.msrb.gmra.mxu3 %vm1986_vm5, %v7459_v1  ;;  %v2123_v57 = vpop.f32.mrf.mxu3  ;;  %v5369_v3 = vor.u32 %v5883_v2, %v5368_v60 }
 0x1be   : > { %3602 = vmatpush.bf16.msra.mxu3 %v5362_v7  ;;  %v5314_v7 = vor.u32 %v5869_v23, %v5313_v36  ;;  %v5385_v23 = vor.u32 %v5885_v27, %v5382_v59  ;;  %v5373_v57 = vor.u32 %v5882_v49, %v5370_v61  ;;  %v5905_v27 = vld [vmem:[%s6123_s20 + $0x658] sm:$0xf0]  ;;  %v5518_v59 = vld [vmem:[%s6123_s20 + $0x6c0] sm:$0xf]  ;;  %v5902_v49 = vld [vmem:[%s6123_s20 + $0x640] sm:$0xf0] }
 0x1bf   : > { %3457 = vmatpush.bf16.msra.mxu0 %v5287_v25  ;;  %v5425_v25 = vor.u32 %v5896_v20, %v5424_v43  ;;  %v5376_v20 = vld [vmem:[%s6123_s20 + $0x5a8] sm:$0xf] }
 0x1c0   : > { %3577 = vmatpush.bf16.msra.mxu1 %v5342_v19  ;;  %3590 = vmatpush.bf16.msra.mxu2 %v5346_v50  ;;  %v5480_v19 = vor.u32 %v5910_v44, %v5479_v29  ;;  %v5412_v50 = vld [vmem:[%s6123_s20 + $0x5f0] sm:$0xf]  ;;  %v2027_v15 = vpop.f32.mrf.mxu2  ;;  %v2147_v12 = vpop.f32.mrf.mxu1  ;;  %v5431_v29 = vld [vmem:[%s6123_s20 + $0x618] sm:$0xf]  ;;  %v5506_v61 = vld [vmem:[%s6123_s20 + $0x6a8] sm:$0xf] }
 0x1c1   : > { %v7522_v34 = vadd.f32 %v2147_v12, %v2025_v46  ;;  %v5901_v46 = vld [vmem:[%s6123_s20 + $0x638] sm:$0xf0]  ;;  %v5906_v15 = vld [vmem:[%s6123_s20 + $0x664] sm:$0xf] }
 0x1c2   : > { %3603 = vmatpush.bf16.msra.mxu3 %v5350_v9  ;;  %v5893_v9 = vld [vmem:[%s6123_s20 + $0x5f8] sm:$0xf0] }
 0x1c3   : > { %3458 = vmatpush.bf16.msra.mxu0 %v5275_v0  ;;  %v5889_v0 = vld [vmem:[%s6123_s20 + $0x5d8] sm:$0xf0]  ;;  %v2134_v62 = vpop.f32.mrf.mxu0 }
 0x1c4   : > { %3578 = vmatpush.bf16.msra.mxu1 %v5330_v8  ;;  %3591 = vmatpush.bf16.msra.mxu2 %v5334_v51  ;;  %v5413_v8 = vor.u32 %v5893_v9, %v5412_v50  ;;  %v5394_v51 = vld [vmem:[%s6123_s20 + $0x5dc] sm:$0xf0]  ;;  %v2135_v47 = vadd.f32 %v2134_v62, %v7477_v16  ;;  %v5443_v16 = vld [vmem:[%s6123_s20 + $0x630] sm:$0xf]  ;;  %v5432_v50 = vor.u32 %v5898_v48, %v5431_v29 }
 0x1c5   : > { %v5397_v32 = vor.u32 %v5888_v40, %v5394_v51  ;;  %v5922_v40 = vld [vmem:[%s6123_s20 + $0x6e0] sm:$0xf0]  ;;  %v5921_v51 = vld [vmem:[%s6123_s20 + $0x6dc] sm:$0xf] }
 0x1c6   : > { %3604 = vmatpush.bf16.msra.mxu3 %v5338_v41  ;;  %v5400_v41 = vld [vmem:[%s6123_s20 + $0x5d8] sm:$0xf] }
 0x1c7   : > { %3459 = vmatpush.bf16.msra.mxu0 %v5263_v21  ;;  %v5886_v21 = vld [vmem:[%s6123_s20 + $0x5c0] sm:$0xf0] }
 0x1c8   : > { %3579 = vmatpush.bf16.msra.mxu1 %v5318_v35  ;;  %3592 = vmatpush.bf16.msra.mxu2 %v5322_v28  ;;  %v5401_v35 = vor.u32 %v5890_v18, %v5400_v41  ;;  %v5388_v28 = vld [vmem:[%s6123_s20 + $0x5c0] sm:$0xf]  ;;  %v2264_v53 = vpop.f32.mrf.mxu2  ;;  %v5381_v36 = vor.u32 %v5886_v21, %v5380_v38  ;;  %v2277_v55 = vpop.f32.mrf.mxu3  ;;  %v5532_v41 = vld [vmem:[%s6123_s20 + $0x6e4] sm:$0xf0] }
 0x1c9   : > { %v7540_v58 = vadd.f32 %v2264_v53, %v7487_v54  ;;  %v5884_v54 = vld [vmem:[%s6123_s20 + $0x5b0] sm:$0xf0]  ;;  %v2149_v44 = vpop.f32.mrf.mxu1  ;;  %v5535_v38 = vor.u32 %v5921_v51, %v5532_v41  ;;  %v5520_v53 = vld [vmem:[%s6123_s20 + $0x6cc] sm:$0xf0] }
 0x1ca   : > { %3605 = vmatpush.bf16.msra.mxu3 %v5326_v33  ;;  %v5887_v33 = vld [vmem:[%s6123_s20 + $0x5c8] sm:$0xf0]  ;;  %v5377_v52 = vor.u32 %v5884_v54, %v5376_v20  ;;  %v5508_v20 = vld [vmem:[%s6123_s20 + $0x6b4] sm:$0xf0]  ;;  %v5897_v54 = vld [vmem:[%s6123_s20 + $0x61c] sm:$0xf] }
 0x1cb   : > { %3460 = vmatpush.bf16.msra.mxu0 %v5251_v26  ;;  %v5389_v43 = vor.u32 %v5887_v33, %v5388_v28  ;;  %v5444_v26 = vor.u32 %v5901_v46, %v5443_v16  ;;  %v5919_v16 = vld [vmem:[%s6123_s20 + $0x6c8] sm:$0xf0]  ;;  %v5918_v46 = vld [vmem:[%s6123_s20 + $0x6c4] sm:$0xf] }
 0x1cc   : > { %3580 = vmatpush.bf16.msra.mxu1 %v5306_v63  ;;  %3593 = vmatpush.bf16.msra.mxu2 %v5310_v4  ;;  %v7545_v63 = vadd.f32 %v2277_v55, %v2135_v47  ;;  %v2136_v4 = vpop.f32.mrf.mxu0  ;;  %v5903_v47 = vld [vmem:[%s6123_s20 + $0x64c] sm:$0xf]  ;;  %v5519_v55 = vor.u32 %v5919_v16, %v5518_v59  ;;  %v5523_v2 = vor.u32 %v5918_v46, %v5520_v53  ;;  %v5526_v53 = vld [vmem:[%s6123_s20 + $0x6c8] sm:$0xf] }
 0x1ce   : > { %3606 = vmatpush.bf16.msra.mxu3 %v5314_v7  ;;  %5302 = vmatmul.msk.bf16.vlgmr.msra.gmra.mxu0 %vm1986_vm5, %v7459_v1  ;;  %v5393_v1 = vor.u32 %v5889_v0, %v5392_v22  ;;  %v5909_v7 = vld [vmem:[%s6123_s20 + $0x67c] sm:$0xf]  ;;  %v5475_v0 = vld [vmem:[%s6123_s20 + $0x668] sm:$0xf] }
 0x1cf   : > { %3722 = vmatpush.bf16.msrb.mxu0 %v5417_v6  ;;  %5363 = vmatmul.msk.bf16.vlgmr.msra.gmra.mxu1 %vm1986_vm5, %v3489_v56  ;;  %v5481_v6 = vld [vmem:[%s6123_s20 + $0x684] sm:$0xf0] }
 0x1d0   : > { %3735 = vmatpush.bf16.msrb.mxu1 %v5421_v24  ;;  %3748 = vmatpush.bf16.msrb.mxu2 %v5425_v25  ;;  %v5487_v24 = vld [vmem:[%s6123_s20 + $0x680] sm:$0xf]  ;;  %v5925_v25 = vld [vmem:[%s6123_s20 + $0x6f8] sm:$0xf0]  ;;  %v5484_v9 = vor.u32 %v5909_v7, %v5481_v6  ;;  %v2266_v12 = vpop.f32.mrf.mxu2  ;;  %v2279_v18 = vpop.f32.mrf.mxu3  ;;  %v5433_v6 = vld [vmem:[%s6123_s20 + $0x624] sm:$0xf0] }
 0x1d1   : > { %5364 = vmatmul.msk.bf16.vlgmr.msra.gmra.mxu2 %vm1986_vm5, %v3489_v56  ;;  %5365 = vmatmul.msk.bf16.vlgmr.msra.gmra.mxu3 %vm1986_vm5, %v3489_v56  ;;  %v5911_v56 = vld [vmem:[%s6123_s20 + $0x688] sm:$0xf0]  ;;  %v5538_v18 = vld [vmem:[%s6123_s20 + $0x6e0] sm:$0xf] }
 0x1d2   : > { %3868 = vmatpush.bf16.msrb.mxu3 %v5480_v19  ;;  %v5924_v19 = vld [vmem:[%s6123_s20 + $0x6f4] sm:$0xf]  ;;  %v5488_v14 = vor.u32 %v5911_v56, %v5487_v24  ;;  %v5439_v24 = vld [vmem:[%s6123_s20 + $0x620] sm:$0xf]  ;;  %v5899_v56 = vld [vmem:[%s6123_s20 + $0x628] sm:$0xf0] }
 0x1d3   : > { %3723 = vmatpush.bf16.msrb.mxu0 %v5405_v10  ;;  %v5469_v10 = vld [vmem:[%s6123_s20 + $0x66c] sm:$0xf0]  ;;  %v5547_v22 = vor.u32 %v5924_v19, %v5544_v13  ;;  %v5913_v19 = vld [vmem:[%s6123_s20 + $0x698] sm:$0xf0]  ;;  %v5912_v13 = vld [vmem:[%s6123_s20 + $0x694] sm:$0xf] }
 0x1d4   : > { %3736 = vmatpush.bf16.msrb.mxu1 %v5409_v11  ;;  %3749 = vmatpush.bf16.msrb.mxu2 %v5413_v8  ;;  %v5543_v11 = vor.u32 %v5925_v25, %v5542_v37  ;;  %v5908_v8 = vld [vmem:[%s6123_s20 + $0x670] sm:$0xf0]  ;;  %v5472_v30 = vor.u32 %v5906_v15, %v5469_v10  ;;  %v2290_v21 = vpop.f32.mrf.mxu0  ;;  %v5494_v25 = vld [vmem:[%s6123_s20 + $0x690] sm:$0xf]  ;;  %v5605_v15 = vld [vmem:[%s6123_s20 + $0x768] sm:$0xf] }
 0x1d5   : > { %v5476_v62 = vor.u32 %v5908_v8, %v5475_v0  ;;  %v2296_v28 = vadd.f32 %v2290_v21, %v7522_v34  ;;  %v5940_v10 = vld [vmem:[%s6123_s20 + $0x770] sm:$0xf0]  ;;  %v5607_v0 = vld [vmem:[%s6123_s20 + $0x774] sm:$0xf0]  ;;  %v5613_v8 = vld [vmem:[%s6123_s20 + $0x770] sm:$0xf]  ;;  %v5495_v12 = vor.u32 %v5913_v19, %v5494_v25 }
 0x1d6   : > { %3869 = vmatpush.bf16.msrb.mxu3 %v5468_v45  ;;  %v5530_v45 = vld [vmem:[%s6123_s20 + $0x6d8] sm:$0xf]  ;;  %v5606_v41 = vor.u32 %v5940_v10, %v5605_v15  ;;  %v5595_v21 = vld [vmem:[%s6123_s20 + $0x75c] sm:$0xf0]  ;;  %v5557_v10 = vld [vmem:[%s6123_s20 + $0x708] sm:$0xf] }
 0x1d7   : > { %3724 = vmatpush.bf16.msrb.mxu0 %v5393_v1  ;;  %v5457_v1 = vld [vmem:[%s6123_s20 + $0x654] sm:$0xf0] }
 0x1d8   : > { %3737 = vmatpush.bf16.msrb.mxu1 %v5397_v32  ;;  %3750 = vmatpush.bf16.msrb.mxu2 %v5401_v35  ;;  %v5531_v32 = vor.u32 %v5922_v40, %v5530_v45  ;;  %v2410_v35 = vpop.f32.mrf.mxu1  ;;  %v5460_v34 = vor.u32 %v5903_v47, %v5457_v1  ;;  %v5941_v45 = vld [vmem:[%s6123_s20 + $0x778] sm:$0xf0]  ;;  %v5593_v1 = vld [vmem:[%s6123_s20 + $0x750] sm:$0xf] }
 0x1d9   : > { %v7580_v33 = vadd.f32 %v2410_v35, %v7540_v58  ;;  %v5451_v58 = vld [vmem:[%s6123_s20 + $0x638] sm:$0xf]  ;;  %v5614_v47 = vor.u32 %v5941_v45, %v5613_v8  ;;  %v5565_v45 = vld [vmem:[%s6123_s20 + $0x710] sm:$0xf] }
 0x1da   : > { %3870 = vmatpush.bf16.msrb.mxu3 %v5456_v42  ;;  %v5463_v42 = vld [vmem:[%s6123_s20 + $0x650] sm:$0xf]  ;;  %v5452_v44 = vor.u32 %v5902_v49, %v5451_v58  ;;  %v5601_v35 = vld [vmem:[%s6123_s20 + $0x758] sm:$0xf] }
 0x1db   : > { %3725 = vmatpush.bf16.msrb.mxu0 %v5381_v36  ;;  %v5464_v60 = vor.u32 %v5905_v27, %v5463_v42  ;;  %v5900_v36 = vld [vmem:[%s6123_s20 + $0x634] sm:$0xf]  ;;  %v5938_v42 = vld [vmem:[%s6123_s20 + $0x760] sm:$0xf0]  ;;  %v5559_v8 = vld [vmem:[%s6123_s20 + $0x714] sm:$0xf0] }
 0x1dc   : > { %3738 = vmatpush.bf16.msrb.mxu1 %v5385_v23  ;;  %3751 = vmatpush.bf16.msrb.mxu2 %v5389_v43  ;;  %v5445_v23 = vld [vmem:[%s6123_s20 + $0x63c] sm:$0xf0]  ;;  %v5916_v43 = vld [vmem:[%s6123_s20 + $0x6b0] sm:$0xf0]  ;;  %v2423_v4 = vpop.f32.mrf.mxu2  ;;  %v2436_v7 = vpop.f32.mrf.mxu3 }
 0x1dd   : > { %v5448_v29 = vor.u32 %v5900_v36, %v5445_v23  ;;  %v5507_v48 = vor.u32 %v5916_v43, %v5506_v61  ;;  %v5602_v36 = vor.u32 %v5938_v42, %v5601_v35  ;;  %v5583_v43 = vld [vmem:[%s6123_s20 + $0x744] sm:$0xf0] }
 0x1de   : > { %3871 = vmatpush.bf16.msrb.mxu3 %v5444_v26  ;;  %v5915_v26 = vld [vmem:[%s6123_s20 + $0x6ac] sm:$0xf] }
 0x1df   : > { %3726 = vmatpush.bf16.msrb.mxu0 %v5369_v3  ;;  %v5511_v37 = vor.u32 %v5915_v26, %v5508_v20  ;;  %v2441_v3 = vadd.f32 %v2423_v4, %v7545_v63  ;;  %v5436_v63 = vor.u32 %v5897_v54, %v5433_v6  ;;  %v5589_v26 = vld [vmem:[%s6123_s20 + $0x740] sm:$0xf]  ;;  %v5935_v20 = vld [vmem:[%s6123_s20 + $0x748] sm:$0xf0]  ;;  %v5514_v54 = vld [vmem:[%s6123_s20 + $0x6b0] sm:$0xf] }
 0x1e0   : > { %3739 = vmatpush.bf16.msrb.mxu1 %v5373_v57  ;;  %3752 = vmatpush.bf16.msrb.mxu2 %v5377_v52  ;;  %v7601_v57 = vadd.f32 %v2436_v7, %v2296_v28  ;;  %v2292_v52 = vpop.f32.mrf.mxu0  ;;  %v7624_v28 = vrot.slane %v7397_v39, 3  ;;  %v5933_v39 = vld [vmem:[%s6123_s20 + $0x73c] sm:$0xf]  ;;  %v5590_v4 = vor.u32 %v5935_v20, %v5589_v26  ;;  %v5931_v7 = vld [vmem:[%s6123_s20 + $0x728] sm:$0xf0] }
 0x1e1   : > { %v5930_v6 = vld [vmem:[%s6123_s20 + $0x724] sm:$0xf] }
 0x1e2   : > { %3872 = vmatpush.bf16.msrb.mxu3 %v5432_v50  ;;  %5426 = vmatmul.msk.bf16.vlgmr.msrb.gmra.mxu0 %vm1986_vm5, %v3635_v31  ;;  %v2412_v50 = vpop.f32.mrf.mxu1 }
 0x1e3   : > { %3881 = vmatpush.bf16.msra.mxu0 %v5484_v9  ;;  %5427 = vmatmul.msk.bf16.vlgmr.msrb.gmra.mxu1 %vm1986_vm5, %v3635_v31  ;;  %v5496_v9 = vld [vmem:[%s6123_s20 + $0x69c] sm:$0xf0]  ;;  %v5502_v50 = vld [vmem:[%s6123_s20 + $0x698] sm:$0xf] }
 0x1e4   : > { %3894 = vmatpush.bf16.msra.mxu1 %v5488_v14  ;;  %4014 = vmatpush.bf16.msra.mxu2 %v5543_v11  ;;  %v5550_v14 = vld [vmem:[%s6123_s20 + $0x6f8] sm:$0xf]  ;;  %v5939_v11 = vld [vmem:[%s6123_s20 + $0x76c] sm:$0xf]  ;;  %v5499_v40 = vor.u32 %v5912_v13, %v5496_v9  ;;  %v2425_v27 = vpop.f32.mrf.mxu2  ;;  %v2438_v59 = vpop.f32.mrf.mxu3  ;;  %v5914_v9 = vld [vmem:[%s6123_s20 + $0x6a0] sm:$0xf0] }
 0x1e5   : > { %5428 = vmatmul.msk.bf16.vlgmr.msrb.gmra.mxu2 %vm1986_vm5, %v3635_v31  ;;  %5489 = vmatmul.msk.bf16.vlgmr.msrb.gmra.mxu3 %vm1986_vm5, %v7569_v5  ;;  %v5926_v31 = vld [vmem:[%s6123_s20 + $0x700] sm:$0xf0] }
 0x1e6   : > { %4027 = vmatpush.bf16.msra.mxu3 %v5547_v22  ;;  %v5440_v22 = vor.u32 %v5899_v56, %v5439_v24  ;;  %v5551_v51 = vor.u32 %v5926_v31, %v5550_v14  ;;  %v5571_v24 = vld [vmem:[%s6123_s20 + $0x72c] sm:$0xf0]  ;;  %v5577_v56 = vld [vmem:[%s6123_s20 + $0x728] sm:$0xf] }
 0x1e7   : > { %3882 = vmatpush.bf16.msra.mxu0 %v5472_v30  ;;  %v5923_v30 = vld [vmem:[%s6123_s20 + $0x6e8] sm:$0xf0]  ;;  %v5574_v19 = vor.u32 %v5930_v6, %v5571_v24 }
 0x1e8   : > { %3895 = vmatpush.bf16.msra.mxu1 %v5476_v62  ;;  %4015 = vmatpush.bf16.msra.mxu2 %v5531_v32  ;;  %v5610_v62 = vor.u32 %v5939_v11, %v5607_v0  ;;  %v5937_v32 = vld [vmem:[%s6123_s20 + $0x758] sm:$0xf0]  ;;  %v5539_v16 = vor.u32 %v5923_v30, %v5538_v18  ;;  %v2556_v23 = vpop.f32.mrf.mxu0  ;;  %v5928_v11 = vld [vmem:[%s6123_s20 + $0x710] sm:$0xf0]  ;;  %v4073_v30 = vrot.slane %v7408_v17, 3 }
 0x1e9   : > { %v5594_v46 = vor.u32 %v5937_v32, %v5593_v1  ;;  %v2586_v49 = vadd.f32 %v2556_v23, %v7580_v33 }
 0x1ea   : > { %4028 = vmatpush.bf16.msra.mxu3 %v5535_v38  ;;  %v5936_v38 = vld [vmem:[%s6123_s20 + $0x754] sm:$0xf]  ;;  %v2569_v58 = vpop.f32.mrf.mxu1 }
 0x1eb   : > { %3883 = vmatpush.bf16.msra.mxu0 %v5460_v34  ;;  %v5920_v34 = vld [vmem:[%s6123_s20 + $0x6d0] sm:$0xf0]  ;;  %v7636_v61 = vadd.f32 %v2569_v58, %v2441_v3 }
 0x1ec   : > { %3896 = vmatpush.bf16.msra.mxu1 %v5464_v60  ;;  %4016 = vmatpush.bf16.msra.mxu2 %v5519_v55  ;;  %v5598_v60 = vor.u32 %v5936_v38, %v5595_v21  ;;  %v5581_v55 = vld [vmem:[%s6123_s20 + $0x738] sm:$0xf] }
 0x1ee   : > { %4029 = vmatpush.bf16.msra.mxu3 %v5523_v2  ;;  %v5934_v2 = vld [vmem:[%s6123_s20 + $0x740] sm:$0xf0] }
 0x1ef   : > { %3884 = vmatpush.bf16.msra.mxu0 %v5448_v29  ;;  %v5582_v33 = vor.u32 %v5934_v2, %v5581_v55  ;;  %v5917_v29 = vld [vmem:[%s6123_s20 + $0x6b8] sm:$0xf0] }
 0x1f0   : > { %3897 = vmatpush.bf16.msra.mxu1 %v5452_v44  ;;  %4017 = vmatpush.bf16.msra.mxu2 %v5507_v48  ;;  %v5569_v44 = vld [vmem:[%s6123_s20 + $0x720] sm:$0xf]  ;;  %v5586_v48 = vor.u32 %v5933_v39, %v5583_v43  ;;  %v5515_v3 = vor.u32 %v5917_v29, %v5514_v54  ;;  %v2582_v13 = vpop.f32.mrf.mxu2  ;;  %v2702_v52 = vpop.f32.mrf.mxu3 }
 0x1f1   : > { %v5570_v25 = vor.u32 %v5931_v7, %v5569_v44  ;;  %v2588_v31 = vadd.f32 %v2582_v13, %v7601_v57  ;;  %v2732_v15 = vadd.f32 %v2702_v52, %v2586_v49 }
 0x1f2   : > { %4030 = vmatpush.bf16.msra.mxu3 %v5511_v37  ;;  %v5932_v37 = vld [vmem:[%s6123_s20 + $0x730] sm:$0xf0]  ;;  %v2571_v0 = vpop.f32.mrf.mxu1 }
 0x1f3   : > { %3885 = vmatpush.bf16.msra.mxu0 %v5436_v63  ;;  %v5578_v14 = vor.u32 %v5932_v37, %v5577_v56  ;;  %v5927_v63 = vld [vmem:[%s6123_s20 + $0x70c] sm:$0xf] }
 0x1f4   : > { %3898 = vmatpush.bf16.msra.mxu1 %v5440_v22  ;;  %4018 = vmatpush.bf16.msra.mxu2 %v5495_v12  ;;  %v2558_v22 = vpop.f32.mrf.mxu0  ;;  %v5929_v12 = vld [vmem:[%s6123_s20 + $0x718] sm:$0xf0] }
 0x1f5   : > { %v5566_v18 = vor.u32 %v5929_v12, %v5565_v45 }
 0x1f6   : > { %4031 = vmatpush.bf16.msra.mxu3 %v5499_v40  ;;  %5490 = vmatmul.msk.bf16.vlgmr.msra.gmra.mxu0 %vm1986_vm5, %v7569_v5  ;;  %v5503_v40 = vor.u32 %v5914_v9, %v5502_v50 }
 0x1f7   : > { %4040 = vmatpush.bf16.msrb.mxu0 %v5551_v51  ;;  %5491 = vmatmul.msk.bf16.vlgmr.msra.gmra.mxu1 %vm1986_vm5, %v7569_v5  ;;  %v5527_v5 = vor.u32 %v5920_v34, %v5526_v53  ;;  %v5558_v51 = vor.u32 %v5928_v11, %v5557_v10 }
 0x1f8   : > { %4160 = vmatpush.bf16.msrb.mxu1 %v5606_v41  ;;  %4173 = vmatpush.bf16.msrb.mxu2 %v5610_v62  ;;  %v5562_v41 = vor.u32 %v5927_v63, %v5559_v8  ;;  %v2584_v57 = vpop.f32.mrf.mxu2  ;;  %v2704_v62 = vpop.f32.mrf.mxu3 }
 0x1f9   : > { %5552 = vmatmul.msk.bf16.vlgmr.msra.gmra.mxu2 %vm1986_vm5, %v7624_v28  ;;  %5553 = vmatmul.msk.bf16.vlgmr.msra.gmra.mxu3 %vm1986_vm5, %v7624_v28 }
 0x1fa   : > { %4186 = vmatpush.bf16.msrb.mxu3 %v5614_v47 }
 0x1fb   : > { %4041 = vmatpush.bf16.msrb.mxu0 %v5539_v16 }
 0x1fc   : > { %4161 = vmatpush.bf16.msrb.mxu1 %v5594_v46  ;;  %4174 = vmatpush.bf16.msrb.mxu2 %v5598_v60  ;;  %v2715_v47 = vpop.f32.mrf.mxu0  ;;  %v2728_v1 = vpop.f32.mrf.mxu1 }
 0x1fd   : > { %v2733_v32 = vadd.f32 %v2715_v47, %v7636_v61  ;;  %v2734_v17 = vadd.f32 %v2728_v1, %v2588_v31 }
 0x1fe   : > { %4187 = vmatpush.bf16.msrb.mxu3 %v5602_v36 }
 0x1ff   : > { %4042 = vmatpush.bf16.msrb.mxu0 %v5527_v5 }
 0x200   : > { %4162 = vmatpush.bf16.msrb.mxu1 %v5582_v33  ;;  %4175 = vmatpush.bf16.msrb.mxu2 %v5586_v48 }
 0x202   : > { %4188 = vmatpush.bf16.msrb.mxu3 %v5590_v4 }
 0x203   : > { %4043 = vmatpush.bf16.msrb.mxu0 %v5515_v3 }
 0x204   : > { %4163 = vmatpush.bf16.msrb.mxu1 %v5570_v25  ;;  %4176 = vmatpush.bf16.msrb.mxu2 %v5574_v19  ;;  %v2848_v38 = vpop.f32.mrf.mxu2  ;;  %v2861_v21 = vpop.f32.mrf.mxu3 }
 0x205   : > { %v2878_v35 = vadd.f32 %v2848_v38, %v2732_v15  ;;  %v2879_v42 = vadd.f32 %v2861_v21, %v2733_v32  ;;  %v2717_v27 = vpop.f32.mrf.mxu0  ;;  %v2730_v59 = vpop.f32.mrf.mxu1 }
 0x206   : > { %4189 = vmatpush.bf16.msrb.mxu3 %v5578_v14 }
 0x207   : > { %4044 = vmatpush.bf16.msrb.mxu0 %v5503_v40 }
 0x208   : > { %4164 = vmatpush.bf16.msrb.mxu1 %v5558_v51  ;;  %4177 = vmatpush.bf16.msrb.mxu2 %v5562_v41 }
 0x20a   : > { %4190 = vmatpush.bf16.msrb.mxu3 %v5566_v18  ;;  %5554 = vmatmul.msk.bf16.vlgmr.msrb.gmra.mxu0 %vm1986_vm5, %v7624_v28 }
 0x20b   : > { %5615 = vmatmul.msk.bf16.vlgmr.msrb.gmra.mxu1 %vm1986_vm5, %v4073_v30  ;;  %5616 = vmatmul.msk.bf16.vlgmr.msrb.gmra.mxu2 %vm1986_vm5, %v4073_v30 }
 0x20c   : > { %v2850_v16 = vpop.f32.mrf.mxu2  ;;  %v2863_v46 = vpop.f32.mrf.mxu3 }
 0x20d   : > { %5617 = vmatmul.msk.bf16.vlgmr.msrb.gmra.mxu3 %vm1986_vm5, %v4073_v30 }
 0x20f   : > { %v2874_v28 = vpop.f32.mrf.mxu0 }
 0x210   : > { %v2994_v53 = vpop.f32.mrf.mxu1  ;;  %v2880_v34 = vadd.f32 %v2874_v28, %v2734_v17 }
 0x211   : > { %v3024_v60 = vadd.f32 %v2994_v53, %v2878_v35 }
 0x217   : > { %v2876_v2 = vpop.f32.mrf.mxu0 }
 0x218   : > { %v3007_v36 = vpop.f32.mrf.mxu2  ;;  %v3020_v23 = vpop.f32.mrf.mxu3 }
 0x219   : > { %v3025_v58 = vadd.f32 %v3007_v36, %v2879_v42  ;;  %v3026_v55 = vadd.f32 %v3020_v23, %v2880_v34  ;;  %v2996_v39 = vpop.f32.mrf.mxu1 }
 0x220   : > { %v3009_v49 = vpop.f32.mrf.mxu2  ;;  %v3022_v61 = vpop.f32.mrf.mxu3 }
 0x223   : > { %v3139_v43 = vpop.f32.mrf.mxu0 }
 0x224   : > { %v3152_v26 = vpop.f32.mrf.mxu1  ;;  %v3169_v20 = vadd.f32 %v3139_v43, %v3024_v60 }
 0x225   : > { %v3170_v5 = vadd.f32 %v3152_v26, %v3025_v58 }
 0x22b   : > { %v3141_v48 = vpop.f32.mrf.mxu0 }
 0x22c   : > { %v3165_v33 = vpop.f32.mrf.mxu2  ;;  %v3290_v54 = vpop.f32.mrf.mxu3 }
 0x22d   : > { %v3171_v29 = vadd.f32 %v3165_v33, %v3026_v55  ;;  %v3320_v44 = vadd.f32 %v3290_v54, %v3169_v20  ;;  %v3154_v4 = vpop.f32.mrf.mxu1  ;;  %v4211_v54 = vlaneseq }
 0x22e   : > { %v4199_v4 = vld [vmem:[#allocation3] sm:$0x7] }
 0x22f   : > { %vm4213_vm8 = vcmp.lt.s32.totalorder %v4211_v54, 300 }
 0x234   : > { %v3167_v7 = vpop.f32.mrf.mxu2  ;;  %v3292_v6 = vpop.f32.mrf.mxu3 }
 0x237   : > { %v3303_v24 = vpop.f32.mrf.mxu0 }
 0x238   : > { %v3316_v56 = vpop.f32.mrf.mxu1  ;;  %v3321_v37 = vadd.f32 %v3303_v24, %v3170_v5 }
 0x239   : > { %v3322_v3 = vadd.f32 %v3316_v56, %v3171_v29 }
 0x23f   : > { %v3305_v13 = vpop.f32.mrf.mxu0 }
 0x240   : > { %v3436_v25 = vpop.f32.mrf.mxu2  ;;  %v3449_v19 = vpop.f32.mrf.mxu3 }
 0x241   : > { %v3318_v52 = vpop.f32.mrf.mxu1  ;;  %v3467_v38 = vadd.f32 %v3449_v19, %v3321_v37  ;;  %v3466_v27 = vadd.f32 %v3436_v25, %v3320_v44 }
 0x248   : > { %v3438_v50 = vpop.f32.mrf.mxu2  ;;  %v3451_v9 = vpop.f32.mrf.mxu3 }
 0x24b   : > { %v3462_v14 = vpop.f32.mrf.mxu0 }
 0x24c   : > { %v3582_v31 = vpop.f32.mrf.mxu1  ;;  %v3468_v21 = vadd.f32 %v3462_v14, %v3322_v3 }
 0x24d   : > { %v3612_v53 = vadd.f32 %v3582_v31, %v3466_v27 }
 0x253   : > { %v3464_v11 = vpop.f32.mrf.mxu0 }
 0x254   : > { %v3595_v15 = vpop.f32.mrf.mxu2  ;;  %v3608_v10 = vpop.f32.mrf.mxu3 }
 0x255   : > { %v3584_v63 = vpop.f32.mrf.mxu1  ;;  %v3613_v59 = vadd.f32 %v3595_v15, %v3467_v38  ;;  %v3614_v16 = vadd.f32 %v3608_v10, %v3468_v21 }
 0x25c   : > { %v3597_v22 = vpop.f32.mrf.mxu2  ;;  %v3610_v0 = vpop.f32.mrf.mxu3 }
 0x25f   : > { %v3728_v8 = vpop.f32.mrf.mxu0 }
 0x260   : > { %v3741_v45 = vpop.f32.mrf.mxu1  ;;  %v3758_v36 = vadd.f32 %v3728_v8, %v3612_v53 }
 0x261   : > { %v3759_v34 = vadd.f32 %v3741_v45, %v3613_v59 }
 0x267   : > { %v3730_v51 = vpop.f32.mrf.mxu0 }
 0x268   : > { %v3754_v12 = vpop.f32.mrf.mxu2  ;;  %v3874_v40 = vpop.f32.mrf.mxu3 }
 0x269   : > { %v3743_v41 = vpop.f32.mrf.mxu1  ;;  %v3760_v60 = vadd.f32 %v3754_v12, %v3614_v16  ;;  %v3904_v55 = vadd.f32 %v3874_v40, %v3758_v36 }
 0x270   : > { %v3756_v18 = vpop.f32.mrf.mxu2  ;;  %v3876_v30 = vpop.f32.mrf.mxu3 }
 0x273   : > { %v3887_v57 = vpop.f32.mrf.mxu0 }
 0x274   : > { %v3900_v62 = vpop.f32.mrf.mxu1  ;;  %v3905_v23 = vadd.f32 %v3887_v57, %v3759_v34 }
 0x275   : > { %v3906_v58 = vadd.f32 %v3900_v62, %v3760_v60 }
 0x27b   : > { %v3889_v32 = vpop.f32.mrf.mxu0 }
 0x27c   : > { %v4020_v47 = vpop.f32.mrf.mxu2  ;;  %v4033_v1 = vpop.f32.mrf.mxu3 }
 0x27d   : > { %v3902_v17 = vpop.f32.mrf.mxu1  ;;  %v4051_v2 = vadd.f32 %v4033_v1, %v3905_v23  ;;  %v4050_v43 = vadd.f32 %v4020_v47, %v3904_v55 }
 0x284   : > { %v4022_v35 = vpop.f32.mrf.mxu2  ;;  %v4035_v42 = vpop.f32.mrf.mxu3 }
 0x287   : > { %v4046_v46 = vpop.f32.mrf.mxu0 }
 0x288   : > { %v4166_v28 = vpop.f32.mrf.mxu1  ;;  %v4052_v39 = vadd.f32 %v4046_v46, %v3906_v58 }
 0x289   : > { %v4196_v29 = vadd.f32 %v4166_v28, %v4050_v43 }
 0x28e   : > { %v4179_v49 = vpop.f32.mrf.mxu2 }
 0x28f   : > { %v4197_v26 = vadd.f32 %v4179_v49, %v4051_v2  ;;  %v4048_v5 = vpop.f32.mrf.mxu0 }
 0x290   : > { %v4192_v61 = vpop.f32.mrf.mxu3  ;;  %v4168_v33 = vpop.f32.mrf.mxu1 }
 0x291   : > { %v4198_v20 = vadd.f32 %v4192_v61, %v4052_v39  ;;  %v4203_v44 = vrot.slane %v4197_v26, 7 }
 0x293   : > { %v4204_v48 = vrot.slane %v4198_v20, 6  ;;  %v4206_v7 = vsel %vm4205_vm6, %v4196_v29, %v4203_v44 }
 0x294   : > { %4219 = sbr.rel (%p5618_p8) target bundleno = 966 (0x3c6), region = 68 }
 0x295   : > { %v4208_v6 = vsel %vm4207_vm7, %v4206_v7, %v4204_v48 }
 0x296   : > { %v4210_v24 = vadd.f32 %v4208_v6, %v4199_v4  ;;  %v4181_v56 = vpop.f32.mrf.mxu2 }
 0x298   : > { %v4194_v37 = vpop.f32.mrf.mxu3  ;;  %4215 = vst.msk [vmem:[#allocation3] sm:$0x7] %vm4213_vm8, %v4210_v24 }
 0x299   : > { %v5949_v3 = vld [vmem:[%s7774_s5 + $0x38] sm:$0xff]  ;;  %v5948_v19 = vld [vmem:[%s7774_s5 + $0x30] sm:$0xff]  ;;  %vm4390_vm9 = vcmask 1045504   ;;  %v4221_v15 = vld [vmem:[%s7773_s4] sm:$0x7]  ;;  %vm4386_vm10 = vcmask 359424  }
 0x29a   : > { %v5957_v25 = vld [vmem:[%s7774_s5 + $0x78] sm:$0xff]  ;;  %4394 = vmatpush.bf16.msra.mxu0 %v5949_v3  ;;  %v5956_v13 = vld [vmem:[%s7774_s5 + $0x70] sm:$0xff]  ;;  %v5947_v10 = vld [vmem:[%s7774_s5 + $0x28] sm:$0xff]  ;;  %vm4442_vm11 = vcmask 408576   ;;  %vm4469_vm12 = vcmask 32768  }
 0x29b   : > { %4407 = vmatpush.bf16.msra.mxu1 %v5957_v25  ;;  %v5693_v52 = vld [vmem:[%s7774_s5 + $0x90] sm:$0xf]  ;;  %v5960_v50 = vld [vmem:[%s7774_s5 + $0x90] sm:$0x30]  ;;  %v5955_v11 = vld [vmem:[%s7774_s5 + $0x68] sm:$0xff] }
 0x29c   : > { %v5694_v9 = vor.u32 %v5960_v50, %v5693_v52  ;;  %v5959_v22 = vld [vmem:[%s7774_s5 + $0x88] sm:$0xff]  ;;  %v5946_v8 = vld [vmem:[%s7774_s5 + $0x20] sm:$0xff]  ;;  %v5945_v51 = vld [vmem:[%s7774_s5 + $0x18] sm:$0xff] }
 0x29d   : > { %v5954_v45 = vld [vmem:[%s7774_s5 + $0x60] sm:$0xff]  ;;  %v5953_v41 = vld [vmem:[%s7774_s5 + $0x58] sm:$0xff]  ;;  %v5944_v30 = vld [vmem:[%s7774_s5 + $0x10] sm:$0xff] }
 0x29e   : > { %v4392_v14 = vsel %vm4390_vm9, %v5694_v9, 0  ;;  %4395 = vmatpush.bf16.msra.mxu0 %v5948_v19  ;;  %v5958_v12 = vld [vmem:[%s7774_s5 + $0x80] sm:$0xff]  ;;  %v5952_v57 = vld [vmem:[%s7774_s5 + $0x50] sm:$0xff]  ;;  %v5943_v62 = vld [vmem:[%s7774_s5 + $0x8] sm:$0xff] }
 0x29f   : > { %v4220_v31 = vld [vmem:[#allocation3] sm:$0x7]  ;;  %4408 = vmatpush.bf16.msra.mxu1 %v5956_v13  ;;  %4425 = vmatpush.bf16.msra.mxu2 %v4392_v14  ;;  %v5951_v47 = vld [vmem:[%s7774_s5 + $0x48] sm:$0xff]  ;;  %v5942_v17 = vld [vmem:[%s7774_s5] sm:$0xff] }
 0x2a0   : > { %v4222_v63 = vadd.f32 %v4221_v15, %v4220_v31  ;;  %v5950_v38 = vld [vmem:[%s7774_s5 + $0x40] sm:$0xff]  ;;  %v4440_v42 = vld [vmem:[%s7776_s7 + $0x30] sm:$0x3]  ;;  %v4439_v27 = vld [vmem:[%s7776_s7 + $0x28] sm:$0xff] }
 0x2a1   : > { %5696 = vmatpush.msk.msra.mxu3 %vm4207_vm7, %v4440_v42  ;;  %v4438_v59 = vld [vmem:[%s7776_s7 + $0x20] sm:$0xff]  ;;  %v4437_v16 = vld [vmem:[%s7776_s7 + $0x18] sm:$0xff]  ;;  %v4436_v46 = vld [vmem:[%s7776_s7 + $0x10] sm:$0xff] }
 0x2a2   : > { %v4223_v0 = vmax.f32 %v4222_v63, 0.0  ;;  %4396 = vmatpush.bf16.msra.mxu0 %v5947_v10  ;;  %v4435_v28 = vld [vmem:[%s7776_s7 + $0x8] sm:$0xff]  ;;  %v4434_v53 = vld [vmem:[%s7776_s7] sm:$0xff] }
 0x2a3   : > { %4409 = vmatpush.bf16.msra.mxu1 %v5955_v11  ;;  %4426 = vmatpush.bf16.msra.mxu2 %v5959_v22  ;;  %v4272_v60 = vld [vmem:[%s7775_s6] sm:$0x1] }
 0x2a4   : > { %v4227_v40 = vperm.slane %v4223_v0, 2  ;;  %v4225_v1 = vperm.slane %v4223_v0, 0  ;;  %v4226_v32 = vperm.slane %v4223_v0, 1  ;;  %4459 = vmatpush.msra.mxu3 %v4439_v27  ;;  %v4441_v26 = vld [vmem:[%s7777_s8] sm:$0x1] }
 0x2a6   : > { %4397 = vmatpush.bf16.msra.mxu0 %v5946_v8  ;;  %v4233_v18 = vpack.c.bf16 %v4227_v40, %v4227_v40  ;;  %v4231_v21 = vpack.c.bf16 %v4225_v1, %v4225_v1  ;;  %v4232_v35 = vpack.c.bf16 %v4226_v32, %v4226_v32  ;;  %4460 = vmatpush.msra.mxu3 %v4438_v59 }
 0x2a7   : > { %4410 = vmatpush.bf16.msra.mxu1 %v5954_v45  ;;  %4427 = vmatpush.bf16.msra.mxu2 %v5958_v12 }
 0x2a8   : > { %4461 = vmatpush.msra.mxu3 %v4437_v16 }
 0x2aa   : > { %4398 = vmatpush.bf16.msra.mxu0 %v5945_v51  ;;  %5695 = vmatmul.msk.bf16.vlgmr.msra.gmra.mxu2 %vm4386_vm10, %v4233_v18 }
 0x2ab   : > { %4411 = vmatpush.bf16.msra.mxu1 %v5953_v41  ;;  %4462 = vmatpush.msra.mxu3 %v4436_v46 }
 0x2ad   : > { %4463 = vmatpush.msra.mxu3 %v4435_v28 }
 0x2ae   : > { %4399 = vmatpush.bf16.msra.mxu0 %v5944_v30 }
 0x2af   : > { %4412 = vmatpush.bf16.msra.mxu1 %v5952_v57  ;;  %4464 = vmatpush.msra.mxu3 %v4434_v53 }
 0x2b2   : > { %4400 = vmatpush.bf16.msra.mxu0 %v5943_v62 }
 0x2b3   : > { %4413 = vmatpush.bf16.msra.mxu1 %v5951_v47 }
 0x2b6   : > { %4401 = vmatpush.bf16.msra.mxu0 %v5942_v17 }
 0x2b7   : > { %4414 = vmatpush.bf16.msra.mxu1 %v5950_v38 }
 0x2b9   : > { %4402 = vmatmul.bf16.vlgmr.msra.gmra.mxu0 %v4231_v21 }
 0x2ba   : > { %4415 = vmatmul.bf16.vlgmr.msra.gmra.mxu1 %v4232_v35 }
 0x32d   : > { %v4429_v34 = vpop.f32.mrf.mxu2 }
 0x335   : > { %v4431_v55 = vpop.f32.mrf.mxu2 }
 0x336   : > { %v4403_v36 = vpop.f32.mrf.mxu0 }
 0x337   : > { %v4416_v23 = vpop.f32.mrf.mxu1  ;;  %v4404_v58 = vadd.f32 %v4403_v36, %v4272_v60 }
 0x339   : > { %v4417_v2 = vadd.f32 %v4416_v23, %v4404_v58 }
 0x33b   : > { %v4430_v39 = vadd.f32 %v4429_v34, %v4417_v2 }
 0x33d   : > { %v4433_v49 = vmax.f32 %v4430_v39, 0.0 }
 0x33e   : > { %v4405_v61 = vpop.f32.mrf.mxu0 }
 0x33f   : > { %v4418_v43 = vpop.f32.mrf.mxu1  ;;  %5697 = vmatmul.msk.f32.vlgmr.msra.gmra.mxu3 %vm4442_vm11, %v4433_v49 }
 0x3c2   : > { %v4466_v20 = vpop.f32.mrf.mxu3 }
 0x3c3   : > { %v4467_v5 = vadd.f32 %v4466_v20, %v4441_v26 }
 0x3c5   : > { %4470 = vst.msk [vmem:[#allocation8] sm:$0x1] %vm4469_vm12, %v4467_v5 }
 0x3c6 PF: > { %p5976_p9 = scmp.eq.s32.totalorder %s6110_s12, 4  ;;  %s6050_s20 = smov [#allocation8]  }
 0x3c7   : > { %s4477_s21 = sshll.u32 %s6050_s20, 4  ;;  %s4479_s13 = sshll.u32 %s7778_s9, 4  ;;  %s4478_s21 = int_to_ptr.vmem [resolvable:$true] %s4477_s21  ;;  %s4480_s13 = int_to_ptr.hbm [resolvable:$true] %s4479_s13 }
 0x3c8   : > { %5967 = dma.vmem_to_hbm [thread:$0]  (%p5976_p9), %s4478_s21, 16, %s4480_s13, [#allocation6]  }
 0x3c9   : > { %6041 = dma.done.wait (%p5976_p9), [#allocation6], 16  }
 0x3ca   : > { %6043 = vsyncadd (%p5976_p9), [#allocation6], 4294967280 }
 0x3cb PF: > { %s22_s11 = sadd.s32 1, %s6046_s11  }
 0x3cc   : > { %p19_p10 = scmp.ge.s32.totalorder %s22_s11, 7  }
 0x3ce   :  { %21 = sbr.rel (!%p19_p10) target bundleno = 4 (0x4), region = 101 }
 0x3d3   :  { %4493 = vsyncpa [#allocation6], 1 }
 0x3d4   :  { %4495 = vsyncpa [#allocation6 + $0x1], 1 }
 0x3d5   :  { %4496 = vsyncpa [#allocation7], 1 }
 0x3d6   :  { %4498 = vsyncpa [#allocation7 + $0x1], 1 }

</bundles_post_ra>
